<compile_context>
chip_gen: v5e
topology: v5e:2x2
jax: 0.10.0
libtpu: 0.0.40
codegen_flags: <defaults>
</compile_context>

<pallas_src>
import functools

import jax
import jax.numpy as jnp
from jax import lax
from jax.experimental import pallas as pl
from jax.experimental.pallas import tpu as pltpu

EPS = 1e-5                       # nn.LayerNorm default eps
DEFAULT_BLOCK_N = 512            # node-tile rows; ~64 KiB/tile at hidden=32 fp32
VMEM_LIMIT_BYTES = 32 * 1024 * 1024  # explicit scoped-VMEM limit (safe on v5e/v6e/v7x)


def _round_up(n, m):
    return ((n + m - 1) // m) * m


def _compiler_params(semantics):
    return pltpu.CompilerParams(dimension_semantics=semantics,
                                vmem_limit_bytes=VMEM_LIMIT_BYTES)


def _row_mask(tile_i, block_n, n_valid):
    """(block_n, 1) fp32 mask: 1.0 for real node rows, 0.0 for padded rows."""
    rows = tile_i * block_n + lax.broadcasted_iota(jnp.int32, (block_n, 1), 0)
    return (rows < n_valid).astype(jnp.float32)


def _layernorm(x, gamma, beta):
    mu = jnp.mean(x, axis=-1, keepdims=True)
    xc = x - mu
    var = jnp.mean(xc * xc, axis=-1, keepdims=True)
    return xc * lax.rsqrt(var + EPS) * gamma + beta


# ---------------------------------------------------------------------------
# Kernel 1: input MLP  (fcs[0] -> LayerNorm -> ReLU), node-tiled
# ---------------------------------------------------------------------------
def input_mlp_kernel(x_ref, w_ref, b_ref, g_ref, bt_ref, o_ref,
                     *, block_n, n_valid):
    i = pl.program_id(0)
    h = jnp.dot(x_ref[...].astype(jnp.bfloat16), w_ref[...],
                preferred_element_type=jnp.float32) + b_ref[...]
    h = _layernorm(h, g_ref[...], bt_ref[...])
    h = jnp.maximum(h, 0.0)
    # keep padded node rows exactly zero in every stored activation
    o_ref[...] = h * _row_mask(i, block_n, n_valid)


def input_mlp(x, w, b, gamma, beta, *, block_n, n_valid):
    n_pad, in_ch = x.shape
    hid = w.shape[1]
    kern = functools.partial(input_mlp_kernel, block_n=block_n, n_valid=n_valid)
    return pl.pallas_call(
        kern,
        out_shape=jax.ShapeDtypeStruct((n_pad, hid), jnp.float32),
        grid=(n_pad // block_n,),
        in_specs=[
            pl.BlockSpec((block_n, in_ch), lambda i: (i, 0)),
            pl.BlockSpec((in_ch, hid), lambda i: (0, 0)),
            pl.BlockSpec((1, hid), lambda i: (0, 0)),
            pl.BlockSpec((1, hid), lambda i: (0, 0)),
            pl.BlockSpec((1, hid), lambda i: (0, 0)),
        ],
        out_specs=pl.BlockSpec((block_n, hid), lambda i: (i, 0)),
        compiler_params=_compiler_params(("parallel",)),
    )(x, w.astype(jnp.bfloat16), b, gamma, beta)


# ---------------------------------------------------------------------------
# Kernel 2a: attention statistics pass (reduction over node tiles)
#   accumulates sum(Q_raw^2), sum(K_raw^2), K_raw^T V_raw (per head), sum_l K_raw
# ---------------------------------------------------------------------------
def attn_stats_kernel(x_ref, wqkv_ref, bqkv_ref,
                      kv_ref, ksum_ref, q2_ref, k2_ref,
                      *, block_n, n_valid, num_heads, head_dim):
    i = pl.program_id(0)

    @pl.when(i == 0)
    def _():
        kv_ref[...] = jnp.zeros_like(kv_ref)
        ksum_ref[...] = jnp.zeros_like(ksum_ref)
        q2_ref[...] = jnp.zeros_like(q2_ref)
        k2_ref[...] = jnp.zeros_like(k2_ref)

    dh = num_heads * head_dim
    x = x_ref[...]
    qkv = jnp.dot(x.astype(jnp.bfloat16), wqkv_ref[...],
                  preferred_element_type=jnp.float32) + bqkv_ref[...]
    # zero padded rows (kills their bias contribution to the global sums)
    qkv = qkv * _row_mask(i, block_n, n_valid)
    q = qkv[:, :dh]
    k = qkv[:, dh:2 * dh]
    v = qkv[:, 2 * dh:]

    q2_ref[...] += jnp.sum(jnp.sum(q * q, axis=1, keepdims=True),
                           axis=0, keepdims=True)
    k2_ref[...] += jnp.sum(jnp.sum(k * k, axis=1, keepdims=True),
                           axis=0, keepdims=True)

    # static unroll over heads (num_heads=1 here); fp32 accumulators
    for h in range(num_heads):
        kh = k[:, h * head_dim:(h + 1) * head_dim]
        vh = v[:, h * head_dim:(h + 1) * head_dim]
        # K^T V contracted over the node axis; Mosaic lowers the dim-0
        # contraction to a transposed-operand matmul.
        kv_ref[h * head_dim:(h + 1) * head_dim, :] += lax.dot_general(
            kh, vh, (((0,), (0,)), ((), ())), preferred_element_type=jnp.float32)
        ksum_ref[h:h + 1, :] += jnp.sum(kh, axis=0, keepdims=True)


def attn_stats(x, wqkv, bqkv, *, block_n, n_valid, num_heads, head_dim):
    n_pad, hid = x.shape
    dh = num_heads * head_dim
    kern = functools.partial(attn_stats_kernel, block_n=block_n, n_valid=n_valid,
                             num_heads=num_heads, head_dim=head_dim)
    return pl.pallas_call(
        kern,
        out_shape=(
            jax.ShapeDtypeStruct((num_heads * head_dim, head_dim), jnp.float32),
            jax.ShapeDtypeStruct((num_heads, head_dim), jnp.float32),
            jax.ShapeDtypeStruct((1, 1), jnp.float32),
            jax.ShapeDtypeStruct((1, 1), jnp.float32),
        ),
        grid=(n_pad // block_n,),
        in_specs=[
            pl.BlockSpec((block_n, hid), lambda i: (i, 0)),
            pl.BlockSpec((hid, 3 * dh), lambda i: (0, 0)),
            pl.BlockSpec((1, 3 * dh), lambda i: (0, 0)),
        ],
        out_specs=(
            pl.BlockSpec((num_heads * head_dim, head_dim), lambda i: (0, 0)),
            pl.BlockSpec((num_heads, head_dim), lambda i: (0, 0)),
            pl.BlockSpec((1, 1), lambda i: (0, 0)),
            pl.BlockSpec((1, 1), lambda i: (0, 0)),
        ),
        compiler_params=_compiler_params(("arbitrary",)),
    )(x, wqkv.astype(jnp.bfloat16), bqkv)


# ---------------------------------------------------------------------------
# Kernel 2b: attention apply pass (per node tile) + residual + LayerNorm
#   num   = (Q_raw @ K_raw^T V_raw) / (||Q|| ||K||) + N * V_raw
#   denom = (Q_raw . sum_l K_raw) / (||Q|| ||K||) + N
# ---------------------------------------------------------------------------
def attn_apply_kernel(x_ref, wqkv_ref, bqkv_ref, kv_ref, ksum_ref,
                      q2_ref, k2_ref, g_ref, bt_ref, o_ref,
                      *, block_n, n_valid, num_heads, head_dim, alpha):
    i = pl.program_id(0)
    dh = num_heads * head_dim
    nf = jnp.float32(n_valid)

    x = x_ref[...]
    # recompute q/v from the fused projection (cheaper than storing them in HBM)
    qkv = jnp.dot(x.astype(jnp.bfloat16), wqkv_ref[...],
                  preferred_element_type=jnp.float32) + bqkv_ref[...]
    q = qkv[:, :dh]
    v = qkv[:, 2 * dh:]

    # 1 / (||Q||_F * ||K||_F): the Frobenius normalization factors out of both
    # the numerator and denominator, so it is applied once as a scalar scale.
    scale = lax.rsqrt(q2_ref[...] * k2_ref[...])            # (1, 1) fp32

    acc = jnp.zeros((block_n, head_dim), jnp.float32)
    for h in range(num_heads):                               # static unroll, heads=1
        qh = q[:, h * head_dim:(h + 1) * head_dim]
        vh = v[:, h * head_dim:(h + 1) * head_dim]
        kvh = kv_ref[h * head_dim:(h + 1) * head_dim, :]
        ksh = ksum_ref[h:h + 1, :]
        num = jnp.dot(qh, kvh, preferred_element_type=jnp.float32) * scale + nf * vh
        den = jnp.sum(qh * ksh, axis=-1, keepdims=True) * scale + nf
        acc = acc + num * pl.reciprocal(den, approx=True)
    attn = acc * (1.0 / num_heads)                           # mean over heads

    xn = alpha * attn + (1.0 - alpha) * x                    # residual
    out = _layernorm(xn, g_ref[...], bt_ref[...])
    o_ref[...] = out * _row_mask(i, block_n, n_valid)        # keep pad rows at 0


def attn_apply(x, wqkv, bqkv, kv, ksum, q2, k2, gamma, beta,
               *, block_n, n_valid, num_heads, head_dim, alpha):
    n_pad, hid = x.shape
    dh = num_heads * head_dim
    kern = functools.partial(attn_apply_kernel, block_n=block_n, n_valid=n_valid,
                             num_heads=num_heads, head_dim=head_dim, alpha=alpha)
    flops = (2 * n_pad * hid * 3 * dh
             + num_heads * (2 * n_pad * head_dim * head_dim + 4 * n_pad * head_dim)
             + 10 * n_pad * hid)
    bytes_accessed = 8 * n_pad * hid + 2 * hid * 3 * dh + 4 * dh * head_dim
    return pl.pallas_call(
        kern,
        out_shape=jax.ShapeDtypeStruct((n_pad, hid), jnp.float32),
        grid=(n_pad // block_n,),
        in_specs=[
            pl.BlockSpec((block_n, hid), lambda i: (i, 0)),
            pl.BlockSpec((hid, 3 * dh), lambda i: (0, 0)),
            pl.BlockSpec((1, 3 * dh), lambda i: (0, 0)),
            pl.BlockSpec((num_heads * head_dim, head_dim), lambda i: (0, 0)),
            pl.BlockSpec((num_heads, head_dim), lambda i: (0, 0)),
            pl.BlockSpec((1, 1), lambda i: (0, 0)),
            pl.BlockSpec((1, 1), lambda i: (0, 0)),
            pl.BlockSpec((1, hid), lambda i: (0, 0)),
            pl.BlockSpec((1, hid), lambda i: (0, 0)),
        ],
        out_specs=pl.BlockSpec((block_n, hid), lambda i: (i, 0)),
        input_output_aliases={0: 0},     # overwrite the layer input in place
        cost_estimate=pl.CostEstimate(flops=flops, transcendentals=2 * n_pad,
                                      bytes_accessed=bytes_accessed),
        compiler_params=_compiler_params(("parallel",)),
    )(x, wqkv.astype(jnp.bfloat16), bqkv, kv, ksum, q2, k2, gamma, beta)


# ---------------------------------------------------------------------------
# Kernel 3: aggregate + global_mean_pool + final fc
#   per-graph sums/counts accumulated over node tiles; the one-hot block is
#   built on the fly from the streamed batch indices (never materialized in HBM).
# ---------------------------------------------------------------------------
def pool_fc_kernel(x_ref, batch_ref, wfc_ref, bfc_ref, o_ref,
                   acc_ref, cnt_ref, *, num_graphs, graph_weight):
    i = pl.program_id(0)

    @pl.when(i == 0)
    def _():
        acc_ref[...] = jnp.zeros_like(acc_ref)
        cnt_ref[...] = jnp.zeros_like(cnt_ref)

    x = x_ref[...]                                   # (block_n, hid)
    seg = batch_ref[...]                             # (block_n, 1) int32, -1 = pad
    gids = lax.broadcasted_iota(jnp.int32, (x.shape[0], num_graphs), 1)
    onehot = (seg == gids).astype(jnp.float32)       # pad rows are all-zero
    acc_ref[...] += lax.dot_general(onehot, x, (((0,), (0,)), ((), ())),
                                    preferred_element_type=jnp.float32)
    cnt_ref[...] += lax.dot_general(onehot, jnp.ones((x.shape[0], 1), jnp.float32),
                                    (((0,), (0,)), ((), ())),
                                    preferred_element_type=jnp.float32)

    @pl.when(i == pl.num_programs(0) - 1)
    def _():
        pooled = acc_ref[...] / jnp.maximum(cnt_ref[...], 1.0)
        # TODO(synk): SGFormer default gnn=None, so the x2 = self.gnn(x, adj)
        # branch has no defined semantics; we treat x2 = 0 and keep only
        # (1 - graph_weight) * x1 (aggregate='add').
        pooled = (1.0 - graph_weight) * pooled
        o_ref[...] = jnp.dot(pooled, wfc_ref[...],
                             preferred_element_type=jnp.float32) + bfc_ref[...]


def pool_fc(x, batch_col, wfc, bfc, *, block_n, num_graphs, graph_weight):
    n_pad, hid = x.shape
    out_c = wfc.shape[1]
    kern = functools.partial(pool_fc_kernel, num_graphs=num_graphs,
                             graph_weight=graph_weight)
    return pl.pallas_call(
        kern,
        out_shape=jax.ShapeDtypeStruct((num_graphs, out_c), jnp.float32),
        grid=(n_pad // block_n,),
        in_specs=[
            pl.BlockSpec((block_n, hid), lambda i: (i, 0)),
            pl.BlockSpec((block_n, 1), lambda i: (i, 0)),
            pl.BlockSpec((hid, out_c), lambda i: (0, 0)),
            pl.BlockSpec((1, out_c), lambda i: (0, 0)),
        ],
        out_specs=pl.BlockSpec((num_graphs, out_c), lambda i: (0, 0)),
        scratch_shapes=[pltpu.VMEM((num_graphs, hid), jnp.float32),
                        pltpu.VMEM((num_graphs, 1), jnp.float32)],
        compiler_params=_compiler_params(("arbitrary",)),
    )(x, batch_col, wfc, bfc)


# ---------------------------------------------------------------------------
# Parameter init (PyTorch-Linear-like uniform) + forward glue
# ---------------------------------------------------------------------------
def init_linear(key, fan_in, fan_out):
    kw, kb = jax.random.split(key)
    bound = 1.0 / (fan_in ** 0.5)
    w = jax.random.uniform(kw, (fan_in, fan_out), jnp.float32, -bound, bound)
    b = jax.random.uniform(kb, (1, fan_out), jnp.float32, -bound, bound)
    return w, b


def init_sgformer(key, in_channels, hidden, out_channels, num_layers, num_heads):
    keys = jax.random.split(key, 2 + 3 * num_layers)
    params = {}
    params["fc0_w"], params["fc0_b"] = init_linear(keys[0], in_channels, hidden)
    params["ln0_g"] = jnp.ones((1, hidden), jnp.float32)
    params["ln0_b"] = jnp.zeros((1, hidden), jnp.float32)
    params["layers"] = []
    dh = hidden * num_heads
    for i in range(num_layers):
        kq, kk, kv = keys[1 + 3 * i], keys[2 + 3 * i], keys[3 + 3 * i]
        wq, bq = init_linear(kq, hidden, dh)
        wk, bk = init_linear(kk, hidden, dh)
        wv, bv = init_linear(kv, hidden, dh)
        params["layers"].append(dict(
            wqkv=jnp.concatenate([wq, wk, wv], axis=1),   # fused Q|K|V projection
            bqkv=jnp.concatenate([bq, bk, bv], axis=1),
            ln_g=jnp.ones((1, hidden), jnp.float32),
            ln_b=jnp.zeros((1, hidden), jnp.float32)))
    params["fc_w"], params["fc_b"] = init_linear(keys[-1], hidden, out_channels)
    return params


def sgformer_forward(params, x, batch, *, num_graphs, num_heads=1,
                     alpha=0.5, graph_weight=0.8, block_n=DEFAULT_BLOCK_N):
    n = x.shape[0]
    hidden = params["fc0_w"].shape[1]
    head_dim = hidden          # TransConvLayer(hidden, hidden, heads)

    block_n = min(block_n, _round_up(n, 8))
    n_pad = _round_up(n, block_n)

    # pad nodes to a whole number of tiles; padded rows masked inside kernels
    x_pad = jnp.zeros((n_pad, x.shape[1]), jnp.float32).at[:n].set(x)
    batch_col = jnp.full((n_pad, 1), -1, jnp.int32).at[:n, 0].set(
        batch.astype(jnp.int32))

    # TransConv: input MLP + LN + ReLU (dropout = identity at inference)
    h = input_mlp(x_pad, params["fc0_w"], params["fc0_b"],
                  params["ln0_g"], params["ln0_b"],
                  block_n=block_n, n_valid=n)

    # stacked TransConvLayers: stats pass + apply pass (residual + LN fused)
    for lp in params["layers"]:
        kv, ksum, q2, k2 = attn_stats(h, lp["wqkv"], lp["bqkv"],
                                      block_n=block_n, n_valid=n,
                                      num_heads=num_heads, head_dim=head_dim)
        h = attn_apply(h, lp["wqkv"], lp["bqkv"], kv, ksum, q2, k2,
                       lp["ln_g"], lp["ln_b"],
                       block_n=block_n, n_valid=n,
                       num_heads=num_heads, head_dim=head_dim, alpha=alpha)

    # aggregate='add' (gnn=None), global_mean_pool, final fc
    return pool_fc(h, batch_col, params["fc_w"], params["fc_b"],
                   block_n=block_n, num_graphs=num_graphs,
                   graph_weight=graph_weight)


if __name__ == "__main__":
    # Small, module-consistent shapes; 3 node tiles (last one padded) so the
    # grid pipelining, accumulators and row masking are all exercised.
    N_NODES = 320
    IN_CHANNELS = 16
    HIDDEN = 32
    OUT_CHANNELS = 8
    NUM_LAYERS = 2
    NUM_HEADS = 1
    NUM_GRAPHS = 2
    BLOCK_N = 128

    key = jax.random.PRNGKey(0)
    kx, kp = jax.random.split(key)
    x = jax.random.normal(kx, (N_NODES, IN_CHANNELS), jnp.float32)
    batch = jnp.repeat(jnp.arange(NUM_GRAPHS, dtype=jnp.int32),
                       N_NODES // NUM_GRAPHS)
    # adj / edge_index is unused by TransConv (and gnn is None) -> no dummy needed.

    params = init_sgformer(kp, IN_CHANNELS, HIDDEN, OUT_CHANNELS,
                           NUM_LAYERS, NUM_HEADS)

    fwd = jax.jit(functools.partial(
        sgformer_forward, num_graphs=NUM_GRAPHS, num_heads=NUM_HEADS,
        alpha=0.5, graph_weight=0.8, block_n=BLOCK_N))
    out = jax.block_until_ready(fwd(params, x, batch))
    assert out.shape == (NUM_GRAPHS, OUT_CHANNELS)
    print("KERNEL_OK")
</pallas_src>

<mosaic_0001>
module attributes {stable_mosaic.version = 11 : i64} {
  func.func @input_mlp_kernel(%arg0: i32, %arg1: memref<128x16xf32, #tpu.memory_space<vmem>>, %arg2: memref<16x32xbf16, #tpu.memory_space<vmem>>, %arg3: memref<1x32xf32, #tpu.memory_space<vmem>>, %arg4: memref<1x32xf32, #tpu.memory_space<vmem>>, %arg5: memref<1x32xf32, #tpu.memory_space<vmem>>, %arg6: memref<128x32xf32, #tpu.memory_space<vmem>>) attributes {dimension_semantics = [#tpu.dimension_semantics<parallel>], iteration_bounds = array<i64: 3>, scalar_prefetch = 0 : i64, scratch_operands = 0 : i64, tpu.core_type = #tpu.core_type<tc>, window_params = [{transform_indices = @transform_0, window_bounds = array<i64: 128, 16>}, {pipeline_mode = #tpu.pipeline_mode<synchronous>, transform_indices = @transform_1, window_bounds = array<i64: 16, 32>}, {pipeline_mode = #tpu.pipeline_mode<synchronous>, transform_indices = @transform_2, window_bounds = array<i64: 1, 32>}, {pipeline_mode = #tpu.pipeline_mode<synchronous>, transform_indices = @transform_3, window_bounds = array<i64: 1, 32>}, {pipeline_mode = #tpu.pipeline_mode<synchronous>, transform_indices = @transform_4, window_bounds = array<i64: 1, 32>}, {transform_indices = @transform_5, window_bounds = array<i64: 128, 32>}]} {
    %c0 = arith.constant 0 : index
    %c0_0 = arith.constant 0 : index
    %0 = vector.load %arg1[%c0, %c0_0] : memref<128x16xf32, #tpu.memory_space<vmem>>, vector<128x16xf32>
    %1 = arith.truncf %0 : vector<128x16xf32> to vector<128x16xbf16>
    %c0_1 = arith.constant 0 : index
    %c0_2 = arith.constant 0 : index
    %2 = vector.load %arg2[%c0_1, %c0_2] : memref<16x32xbf16, #tpu.memory_space<vmem>>, vector<16x32xbf16>
    %cst = arith.constant dense<0.000000e+00> : vector<128x32xf32>
    %3 = tpu.matmul %1, %2, %cst {dimension_numbers = #tpu.dot_dimension_numbers<[1], [0], [0], [1], [0, 0, 1, 1], [], []>} : vector<128x16xbf16>, vector<16x32xbf16>, vector<128x32xf32> -> vector<128x32xf32>
    %c0_3 = arith.constant 0 : index
    %c0_4 = arith.constant 0 : index
    %4 = vector.load %arg3[%c0_3, %c0_4] : memref<1x32xf32, #tpu.memory_space<vmem>>, vector<1x32xf32>
    %5 = vector.broadcast %4 : vector<1x32xf32> to vector<128x32xf32>
    %6 = arith.addf %3, %5 : vector<128x32xf32>
    %c0_5 = arith.constant 0 : index
    %c0_6 = arith.constant 0 : index
    %7 = vector.load %arg4[%c0_5, %c0_6] : memref<1x32xf32, #tpu.memory_space<vmem>>, vector<1x32xf32>
    %c0_7 = arith.constant 0 : index
    %c0_8 = arith.constant 0 : index
    %8 = vector.load %arg5[%c0_7, %c0_8] : memref<1x32xf32, #tpu.memory_space<vmem>>, vector<1x32xf32>
    %cst_9 = arith.constant dense<0.000000e+00> : vector<128xf32>
    %9 = vector.multi_reduction <add>, %6, %cst_9 [1] : vector<128x32xf32> to vector<128xf32>
    %10 = vector.shape_cast %9 : vector<128xf32> to vector<128x1xf32>
    %cst_10 = arith.constant 3.200000e+01 : f32
    %11 = vector.broadcast %cst_10 : f32 to vector<128x1xf32>
    %12 = arith.divf %10, %11 : vector<128x1xf32>
    %13 = vector.broadcast %12 : vector<128x1xf32> to vector<128x32xf32>
    %14 = arith.subf %6, %13 : vector<128x32xf32>
    %15 = arith.mulf %14, %14 : vector<128x32xf32>
    %cst_11 = arith.constant dense<0.000000e+00> : vector<128xf32>
    %16 = vector.multi_reduction <add>, %15, %cst_11 [1] : vector<128x32xf32> to vector<128xf32>
    %17 = vector.shape_cast %16 : vector<128xf32> to vector<128x1xf32>
    %cst_12 = arith.constant 3.200000e+01 : f32
    %18 = vector.broadcast %cst_12 : f32 to vector<128x1xf32>
    %19 = arith.divf %17, %18 : vector<128x1xf32>
    %cst_13 = arith.constant 9.99999974E-6 : f32
    %20 = vector.broadcast %cst_13 : f32 to vector<128x1xf32>
    %21 = arith.addf %19, %20 : vector<128x1xf32>
    %22 = math.rsqrt %21 : vector<128x1xf32>
    %23 = vector.broadcast %22 : vector<128x1xf32> to vector<128x32xf32>
    %24 = arith.mulf %14, %23 : vector<128x32xf32>
    %25 = vector.broadcast %7 : vector<1x32xf32> to vector<128x32xf32>
    %26 = arith.mulf %24, %25 : vector<128x32xf32>
    %27 = vector.broadcast %8 : vector<1x32xf32> to vector<128x32xf32>
    %28 = arith.addf %26, %27 : vector<128x32xf32>
    %cst_14 = arith.constant 0.000000e+00 : f32
    %29 = vector.broadcast %cst_14 : f32 to vector<128x32xf32>
    %30 = arith.maximumf %28, %29 : vector<128x32xf32>
    %c128_i32 = arith.constant 128 : i32
    %31 = arith.muli %arg0, %c128_i32 : i32
    %32 = tpu.iota {dimensions = array<i32: 0>} : vector<128x1xi32>
    %33 = vector.broadcast %31 : i32 to vector<128x1xi32>
    %34 = arith.addi %33, %32 : vector<128x1xi32>
    %c320_i32 = arith.constant 320 : i32
    %35 = vector.broadcast %c320_i32 : i32 to vector<128x1xi32>
    %36 = arith.cmpi slt, %34, %35 : vector<128x1xi32>
    %37 = arith.extui %36 : vector<128x1xi1> to vector<128x1xi32>
    %38 = arith.sitofp %37 : vector<128x1xi32> to vector<128x1xf32>
    %39 = vector.broadcast %38 : vector<128x1xf32> to vector<128x32xf32>
    %40 = arith.mulf %30, %39 : vector<128x32xf32>
    %c0_15 = arith.constant 0 : index
    %c0_16 = arith.constant 0 : index
    %41 = vector.load %arg6[%c0_15, %c0_16] : memref<128x32xf32, #tpu.memory_space<vmem>>, vector<128x32xf32>
    tpu.vector_store %arg6[%c0_15, %c0_16], %40 {strides = array<i32>} : memref<128x32xf32, #tpu.memory_space<vmem>>, vector<128x32xf32>,
    return
  }
  func.func @transform_0(%arg0: i32) -> (i32, i32) {
    %c0_i32 = arith.constant 0 : i32
    %c0_i32_0 = arith.constant 0 : i32
    return %arg0, %c0_i32 : i32, i32
  }
  func.func @transform_1(%arg0: i32) -> (i32, i32) {
    %c0_i32 = arith.constant 0 : i32
    %c0_i32_0 = arith.constant 0 : i32
    %c0_i32_1 = arith.constant 0 : i32
    return %c0_i32, %c0_i32_0 : i32, i32
  }
  func.func @transform_2(%arg0: i32) -> (i32, i32) {
    %c0_i32 = arith.constant 0 : i32
    %c0_i32_0 = arith.constant 0 : i32
    %c0_i32_1 = arith.constant 0 : i32
    return %c0_i32, %c0_i32_0 : i32, i32
  }
  func.func @transform_3(%arg0: i32) -> (i32, i32) {
    %c0_i32 = arith.constant 0 : i32
    %c0_i32_0 = arith.constant 0 : i32
    %c0_i32_1 = arith.constant 0 : i32
    return %c0_i32, %c0_i32_0 : i32, i32
  }
  func.func @transform_4(%arg0: i32) -> (i32, i32) {
    %c0_i32 = arith.constant 0 : i32
    %c0_i32_0 = arith.constant 0 : i32
    %c0_i32_1 = arith.constant 0 : i32
    return %c0_i32, %c0_i32_0 : i32, i32
  }
  func.func @transform_5(%arg0: i32) -> (i32, i32) {
    %c0_i32 = arith.constant 0 : i32
    %c0_i32_0 = arith.constant 0 : i32
    return %arg0, %c0_i32 : i32, i32
  }
}

module attributes {stable_mosaic.version = 11 : i64} {
  func.func @attn_stats_kernel(%arg0: i32, %arg1: memref<128x32xf32, #tpu.memory_space<vmem>>, %arg2: memref<32x96xbf16, #tpu.memory_space<vmem>>, %arg3: memref<1x96xf32, #tpu.memory_space<vmem>>, %arg4: memref<32x32xf32, #tpu.memory_space<vmem>>, %arg5: memref<1x32xf32, #tpu.memory_space<vmem>>, %arg6: memref<1x1xf32, #tpu.memory_space<vmem>>, %arg7: memref<1x1xf32, #tpu.memory_space<vmem>>) attributes {dimension_semantics = [#tpu.dimension_semantics<arbitrary>], iteration_bounds = array<i64: 3>, scalar_prefetch = 0 : i64, scratch_operands = 0 : i64, tpu.core_type = #tpu.core_type<tc>, window_params = [{transform_indices = @transform_0, window_bounds = array<i64: 128, 32>}, {pipeline_mode = #tpu.pipeline_mode<synchronous>, transform_indices = @transform_1, window_bounds = array<i64: 32, 96>}, {pipeline_mode = #tpu.pipeline_mode<synchronous>, transform_indices = @transform_2, window_bounds = array<i64: 1, 96>}, {pipeline_mode = #tpu.pipeline_mode<synchronous>, transform_indices = @transform_3, window_bounds = array<i64: 32, 32>}, {pipeline_mode = #tpu.pipeline_mode<synchronous>, transform_indices = @transform_4, window_bounds = array<i64: 1, 32>}, {pipeline_mode = #tpu.pipeline_mode<synchronous>, transform_indices = @transform_5, window_bounds = array<i64: 1, 1>}, {pipeline_mode = #tpu.pipeline_mode<synchronous>, transform_indices = @transform_6, window_bounds = array<i64: 1, 1>}]} {
    %c0_i32 = arith.constant 0 : i32
    %0 = arith.cmpi eq, %arg0, %c0_i32 : i32
    %1 = arith.extui %0 : i1 to i32
    %c0_i32_0 = arith.constant 0 : i32
    %2 = arith.cmpi ne, %1, %c0_i32_0 : i32
    scf.if %2 {
      %cst_28 = arith.constant 0.000000e+00 : f32
      %48 = vector.broadcast %cst_28 : f32 to vector<32x32xf32>
      %c0_29 = arith.constant 0 : index
      %c0_30 = arith.constant 0 : index
      %49 = vector.load %arg4[%c0_29, %c0_30] : memref<32x32xf32, #tpu.memory_space<vmem>>, vector<32x32xf32>
      tpu.vector_store %arg4[%c0_29, %c0_30], %48 {strides = array<i32>} : memref<32x32xf32, #tpu.memory_space<vmem>>, vector<32x32xf32>,
      %cst_31 = arith.constant 0.000000e+00 : f32
      %50 = vector.broadcast %cst_31 : f32 to vector<1x32xf32>
      %c0_32 = arith.constant 0 : index
      %c0_33 = arith.constant 0 : index
      %51 = vector.load %arg5[%c0_32, %c0_33] : memref<1x32xf32, #tpu.memory_space<vmem>>, vector<1x32xf32>
      tpu.vector_store %arg5[%c0_32, %c0_33], %50 {strides = array<i32>} : memref<1x32xf32, #tpu.memory_space<vmem>>, vector<1x32xf32>,
      %cst_34 = arith.constant 0.000000e+00 : f32
      %52 = vector.broadcast %cst_34 : f32 to vector<1x1xf32>
      %c0_35 = arith.constant 0 : index
      %c0_36 = arith.constant 0 : index
      %53 = vector.load %arg6[%c0_35, %c0_36] : memref<1x1xf32, #tpu.memory_space<vmem>>, vector<1x1xf32>
      tpu.vector_store %arg6[%c0_35, %c0_36], %52 {strides = array<i32>} : memref<1x1xf32, #tpu.memory_space<vmem>>, vector<1x1xf32>,
      %cst_37 = arith.constant 0.000000e+00 : f32
      %54 = vector.broadcast %cst_37 : f32 to vector<1x1xf32>
      %c0_38 = arith.constant 0 : index
      %c0_39 = arith.constant 0 : index
      %55 = vector.load %arg7[%c0_38, %c0_39] : memref<1x1xf32, #tpu.memory_space<vmem>>, vector<1x1xf32>
      tpu.vector_store %arg7[%c0_38, %c0_39], %54 {strides = array<i32>} : memref<1x1xf32, #tpu.memory_space<vmem>>, vector<1x1xf32>,
    } else {
    }
    %c0 = arith.constant 0 : index
    %c0_1 = arith.constant 0 : index
    %3 = vector.load %arg1[%c0, %c0_1] : memref<128x32xf32, #tpu.memory_space<vmem>>, vector<128x32xf32>
    %4 = arith.truncf %3 : vector<128x32xf32> to vector<128x32xbf16>
    %c0_2 = arith.constant 0 : index
    %c0_3 = arith.constant 0 : index
    %5 = vector.load %arg2[%c0_2, %c0_3] : memref<32x96xbf16, #tpu.memory_space<vmem>>, vector<32x96xbf16>
    %cst = arith.constant dense<0.000000e+00> : vector<128x96xf32>
    %6 = tpu.matmul %4, %5, %cst {dimension_numbers = #tpu.dot_dimension_numbers<[1], [0], [0], [1], [0, 0, 1, 1], [], []>} : vector<128x32xbf16>, vector<32x96xbf16>, vector<128x96xf32> -> vector<128x96xf32>
    %c0_4 = arith.constant 0 : index
    %c0_5 = arith.constant 0 : index
    %7 = vector.load %arg3[%c0_4, %c0_5] : memref<1x96xf32, #tpu.memory_space<vmem>>, vector<1x96xf32>
    %8 = vector.broadcast %7 : vector<1x96xf32> to vector<128x96xf32>
    %9 = arith.addf %6, %8 : vector<128x96xf32>
    %c128_i32 = arith.constant 128 : i32
    %10 = arith.muli %arg0, %c128_i32 : i32
    %11 = tpu.iota {dimensions = array<i32: 0>} : vector<128x1xi32>
    %12 = vector.broadcast %10 : i32 to vector<128x1xi32>
    %13 = arith.addi %12, %11 : vector<128x1xi32>
    %c320_i32 = arith.constant 320 : i32
    %14 = vector.broadcast %c320_i32 : i32 to vector<128x1xi32>
    %15 = arith.cmpi slt, %13, %14 : vector<128x1xi32>
    %16 = arith.extui %15 : vector<128x1xi1> to vector<128x1xi32>
    %17 = arith.sitofp %16 : vector<128x1xi32> to vector<128x1xf32>
    %18 = vector.broadcast %17 : vector<128x1xf32> to vector<128x96xf32>
    %19 = arith.mulf %9, %18 : vector<128x96xf32>
    %20 = vector.extract_strided_slice %19 {offsets = [0, 0], sizes = [128, 32], strides = [1, 1]} : vector<128x96xf32> to vector<128x32xf32>
    %21 = vector.extract_strided_slice %19 {offsets = [0, 32], sizes = [128, 32], strides = [1, 1]} : vector<128x96xf32> to vector<128x32xf32>
    %22 = vector.extract_strided_slice %19 {offsets = [0, 64], sizes = [128, 32], strides = [1, 1]} : vector<128x96xf32> to vector<128x32xf32>
    %c0_6 = arith.constant 0 : index
    %c0_7 = arith.constant 0 : index
    %23 = vector.load %arg6[%c0_6, %c0_7] : memref<1x1xf32, #tpu.memory_space<vmem>>, vector<1x1xf32>
    %24 = arith.mulf %20, %20 : vector<128x32xf32>
    %cst_8 = arith.constant dense<0.000000e+00> : vector<128xf32>
    %25 = vector.multi_reduction <add>, %24, %cst_8 [1] : vector<128x32xf32> to vector<128xf32>
    %26 = vector.shape_cast %25 : vector<128xf32> to vector<128x1xf32>
    %cst_9 = arith.constant dense<0.000000e+00> : vector<1xf32>
    %27 = vector.multi_reduction <add>, %26, %cst_9 [0] : vector<128x1xf32> to vector<1xf32>
    %28 = vector.shape_cast %27 : vector<1xf32> to vector<1x1xf32>
    %29 = arith.addf %23, %28 : vector<1x1xf32>
    %c0_10 = arith.constant 0 : index
    %c0_11 = arith.constant 0 : index
    %30 = vector.load %arg6[%c0_10, %c0_11] : memref<1x1xf32, #tpu.memory_space<vmem>>, vector<1x1xf32>
    tpu.vector_store %arg6[%c0_10, %c0_11], %29 {strides = array<i32>} : memref<1x1xf32, #tpu.memory_space<vmem>>, vector<1x1xf32>,
    %c0_12 = arith.constant 0 : index
    %c0_13 = arith.constant 0 : index
    %31 = vector.load %arg7[%c0_12, %c0_13] : memref<1x1xf32, #tpu.memory_space<vmem>>, vector<1x1xf32>
    %32 = arith.mulf %21, %21 : vector<128x32xf32>
    %cst_14 = arith.constant dense<0.000000e+00> : vector<128xf32>
    %33 = vector.multi_reduction <add>, %32, %cst_14 [1] : vector<128x32xf32> to vector<128xf32>
    %34 = vector.shape_cast %33 : vector<128xf32> to vector<128x1xf32>
    %cst_15 = arith.constant dense<0.000000e+00> : vector<1xf32>
    %35 = vector.multi_reduction <add>, %34, %cst_15 [0] : vector<128x1xf32> to vector<1xf32>
    %36 = vector.shape_cast %35 : vector<1xf32> to vector<1x1xf32>
    %37 = arith.addf %31, %36 : vector<1x1xf32>
    %c0_16 = arith.constant 0 : index
    %c0_17 = arith.constant 0 : index
    %38 = vector.load %arg7[%c0_16, %c0_17] : memref<1x1xf32, #tpu.memory_space<vmem>>, vector<1x1xf32>
    tpu.vector_store %arg7[%c0_16, %c0_17], %37 {strides = array<i32>} : memref<1x1xf32, #tpu.memory_space<vmem>>, vector<1x1xf32>,
    %c0_18 = arith.constant 0 : index
    %c0_19 = arith.constant 0 : index
    %39 = vector.load %arg4[%c0_18, %c0_19] : memref<32x32xf32, #tpu.memory_space<vmem>>, vector<32x32xf32>
    %cst_20 = arith.constant dense<0.000000e+00> : vector<32x32xf32>
    %40 = tpu.matmul %21, %22, %cst_20 {dimension_numbers = #tpu.dot_dimension_numbers<[0], [0], [1], [1], [0, 1, 1, 1], [], []>} : vector<128x32xf32>, vector<128x32xf32>, vector<32x32xf32> -> vector<32x32xf32>
    %41 = arith.addf %39, %40 : vector<32x32xf32>
    %c0_21 = arith.constant 0 : index
    %c0_22 = arith.constant 0 : index
    %42 = vector.load %arg4[%c0_21, %c0_22] : memref<32x32xf32, #tpu.memory_space<vmem>>, vector<32x32xf32>
    tpu.vector_store %arg4[%c0_21, %c0_22], %41 {strides = array<i32>} : memref<32x32xf32, #tpu.memory_space<vmem>>, vector<32x32xf32>,
    %c0_23 = arith.constant 0 : index
    %c0_24 = arith.constant 0 : index
    %43 = vector.load %arg5[%c0_23, %c0_24] : memref<1x32xf32, #tpu.memory_space<vmem>>, vector<1x32xf32>
    %cst_25 = arith.constant dense<0.000000e+00> : vector<32xf32>
    %44 = vector.multi_reduction <add>, %21, %cst_25 [0] : vector<128x32xf32> to vector<32xf32>
    %45 = vector.shape_cast %44 : vector<32xf32> to vector<1x32xf32>
    %46 = arith.addf %43, %45 : vector<1x32xf32>
    %c0_26 = arith.constant 0 : index
    %c0_27 = arith.constant 0 : index
    %47 = vector.load %arg5[%c0_26, %c0_27] : memref<1x32xf32, #tpu.memory_space<vmem>>, vector<1x32xf32>
    tpu.vector_store %arg5[%c0_26, %c0_27], %46 {strides = array<i32>} : memref<1x32xf32, #tpu.memory_space<vmem>>, vector<1x32xf32>,
    return
  }
  func.func @transform_0(%arg0: i32) -> (i32, i32) {
    %c0_i32 = arith.constant 0 : i32
    %c0_i32_0 = arith.constant 0 : i32
    return %arg0, %c0_i32 : i32, i32
  }
  func.func @transform_1(%arg0: i32) -> (i32, i32) {
    %c0_i32 = arith.constant 0 : i32
    %c0_i32_0 = arith.constant 0 : i32
    %c0_i32_1 = arith.constant 0 : i32
    return %c0_i32, %c0_i32_0 : i32, i32
  }
  func.func @transform_2(%arg0: i32) -> (i32, i32) {
    %c0_i32 = arith.constant 0 : i32
    %c0_i32_0 = arith.constant 0 : i32
    %c0_i32_1 = arith.constant 0 : i32
    return %c0_i32, %c0_i32_0 : i32, i32
  }
  func.func @transform_3(%arg0: i32) -> (i32, i32) {
    %c0_i32 = arith.constant 0 : i32
    %c0_i32_0 = arith.constant 0 : i32
    %c0_i32_1 = arith.constant 0 : i32
    return %c0_i32, %c0_i32_0 : i32, i32
  }
  func.func @transform_4(%arg0: i32) -> (i32, i32) {
    %c0_i32 = arith.constant 0 : i32
    %c0_i32_0 = arith.constant 0 : i32
    %c0_i32_1 = arith.constant 0 : i32
    return %c0_i32, %c0_i32_0 : i32, i32
  }
  func.func @transform_5(%arg0: i32) -> (i32, i32) {
    %c0_i32 = arith.constant 0 : i32
    %c0_i32_0 = arith.constant 0 : i32
    %c0_i32_1 = arith.constant 0 : i32
    return %c0_i32, %c0_i32_0 : i32, i32
  }
  func.func @transform_6(%arg0: i32) -> (i32, i32) {
    %c0_i32 = arith.constant 0 : i32
    %c0_i32_0 = arith.constant 0 : i32
    %c0_i32_1 = arith.constant 0 : i32
    return %c0_i32, %c0_i32_0 : i32, i32
  }
}

module attributes {stable_mosaic.version = 11 : i64} {
  func.func @attn_apply_kernel(%arg0: i32, %arg1: memref<128x32xf32, #tpu.memory_space<vmem>>, %arg2: memref<32x96xbf16, #tpu.memory_space<vmem>>, %arg3: memref<1x96xf32, #tpu.memory_space<vmem>>, %arg4: memref<32x32xf32, #tpu.memory_space<vmem>>, %arg5: memref<1x32xf32, #tpu.memory_space<vmem>>, %arg6: memref<1x1xf32, #tpu.memory_space<vmem>>, %arg7: memref<1x1xf32, #tpu.memory_space<vmem>>, %arg8: memref<1x32xf32, #tpu.memory_space<vmem>>, %arg9: memref<1x32xf32, #tpu.memory_space<vmem>>, %arg10: memref<128x32xf32, #tpu.memory_space<vmem>>) attributes {dimension_semantics = [#tpu.dimension_semantics<parallel>], iteration_bounds = array<i64: 3>, scalar_prefetch = 0 : i64, scratch_operands = 0 : i64, tpu.core_type = #tpu.core_type<tc>, window_params = [{transform_indices = @transform_0, window_bounds = array<i64: 128, 32>}, {pipeline_mode = #tpu.pipeline_mode<synchronous>, transform_indices = @transform_1, window_bounds = array<i64: 32, 96>}, {pipeline_mode = #tpu.pipeline_mode<synchronous>, transform_indices = @transform_2, window_bounds = array<i64: 1, 96>}, {pipeline_mode = #tpu.pipeline_mode<synchronous>, transform_indices = @transform_3, window_bounds = array<i64: 32, 32>}, {pipeline_mode = #tpu.pipeline_mode<synchronous>, transform_indices = @transform_4, window_bounds = array<i64: 1, 32>}, {pipeline_mode = #tpu.pipeline_mode<synchronous>, transform_indices = @transform_5, window_bounds = array<i64: 1, 1>}, {pipeline_mode = #tpu.pipeline_mode<synchronous>, transform_indices = @transform_6, window_bounds = array<i64: 1, 1>}, {pipeline_mode = #tpu.pipeline_mode<synchronous>, transform_indices = @transform_7, window_bounds = array<i64: 1, 32>}, {pipeline_mode = #tpu.pipeline_mode<synchronous>, transform_indices = @transform_8, window_bounds = array<i64: 1, 32>}, {transform_indices = @transform_9, window_bounds = array<i64: 128, 32>}]} {
    %c0 = arith.constant 0 : index
    %c0_0 = arith.constant 0 : index
    %0 = vector.load %arg1[%c0, %c0_0] : memref<128x32xf32, #tpu.memory_space<vmem>>, vector<128x32xf32>
    %1 = arith.truncf %0 : vector<128x32xf32> to vector<128x32xbf16>
    %c0_1 = arith.constant 0 : index
    %c0_2 = arith.constant 0 : index
    %2 = vector.load %arg2[%c0_1, %c0_2] : memref<32x96xbf16, #tpu.memory_space<vmem>>, vector<32x96xbf16>
    %cst = arith.constant dense<0.000000e+00> : vector<128x96xf32>
    %3 = tpu.matmul %1, %2, %cst {dimension_numbers = #tpu.dot_dimension_numbers<[1], [0], [0], [1], [0, 0, 1, 1], [], []>} : vector<128x32xbf16>, vector<32x96xbf16>, vector<128x96xf32> -> vector<128x96xf32>
    %c0_3 = arith.constant 0 : index
    %c0_4 = arith.constant 0 : index
    %4 = vector.load %arg3[%c0_3, %c0_4] : memref<1x96xf32, #tpu.memory_space<vmem>>, vector<1x96xf32>
    %5 = vector.broadcast %4 : vector<1x96xf32> to vector<128x96xf32>
    %6 = arith.addf %3, %5 : vector<128x96xf32>
    %7 = vector.extract_strided_slice %6 {offsets = [0, 0], sizes = [128, 32], strides = [1, 1]} : vector<128x96xf32> to vector<128x32xf32>
    %8 = vector.extract_strided_slice %6 {offsets = [0, 64], sizes = [128, 32], strides = [1, 1]} : vector<128x96xf32> to vector<128x32xf32>
    %c0_5 = arith.constant 0 : index
    %c0_6 = arith.constant 0 : index
    %9 = vector.load %arg6[%c0_5, %c0_6] : memref<1x1xf32, #tpu.memory_space<vmem>>, vector<1x1xf32>
    %c0_7 = arith.constant 0 : index
    %c0_8 = arith.constant 0 : index
    %10 = vector.load %arg7[%c0_7, %c0_8] : memref<1x1xf32, #tpu.memory_space<vmem>>, vector<1x1xf32>
    %11 = arith.mulf %9, %10 : vector<1x1xf32>
    %12 = math.rsqrt %11 : vector<1x1xf32>
    %cst_9 = arith.constant 0.000000e+00 : f32
    %13 = vector.broadcast %cst_9 : f32 to vector<128x32xf32>
    %c0_10 = arith.constant 0 : index
    %c0_11 = arith.constant 0 : index
    %14 = vector.load %arg4[%c0_10, %c0_11] : memref<32x32xf32, #tpu.memory_space<vmem>>, vector<32x32xf32>
    %c0_12 = arith.constant 0 : index
    %c0_13 = arith.constant 0 : index
    %15 = vector.load %arg5[%c0_12, %c0_13] : memref<1x32xf32, #tpu.memory_space<vmem>>, vector<1x32xf32>
    %cst_14 = arith.constant dense<0.000000e+00> : vector<128x32xf32>
    %16 = tpu.matmul %7, %14, %cst_14 {dimension_numbers = #tpu.dot_dimension_numbers<[1], [0], [0], [1], [0, 0, 1, 1], [], []>} : vector<128x32xf32>, vector<32x32xf32>, vector<128x32xf32> -> vector<128x32xf32>
    %17 = vector.broadcast %12 : vector<1x1xf32> to vector<128x32xf32>
    %18 = arith.mulf %16, %17 : vector<128x32xf32>
    %cst_15 = arith.constant 3.200000e+02 : f32
    %19 = vector.broadcast %cst_15 : f32 to vector<128x32xf32>
    %20 = arith.mulf %19, %8 : vector<128x32xf32>
    %21 = arith.addf %18, %20 : vector<128x32xf32>
    %22 = vector.broadcast %15 : vector<1x32xf32> to vector<128x32xf32>
    %23 = arith.mulf %7, %22 : vector<128x32xf32>
    %cst_16 = arith.constant dense<0.000000e+00> : vector<128xf32>
    %24 = vector.multi_reduction <add>, %23, %cst_16 [1] : vector<128x32xf32> to vector<128xf32>
    %25 = vector.shape_cast %24 : vector<128xf32> to vector<128x1xf32>
    %26 = vector.broadcast %12 : vector<1x1xf32> to vector<128x1xf32>
    %27 = arith.mulf %25, %26 : vector<128x1xf32>
    %cst_17 = arith.constant 3.200000e+02 : f32
    %28 = vector.broadcast %cst_17 : f32 to vector<128x1xf32>
    %29 = arith.addf %27, %28 : vector<128x1xf32>
    %30 = tpu.reciprocal %29 {approx = true} : vector<128x1xf32> -> vector<128x1xf32>
    %31 = vector.broadcast %30 : vector<128x1xf32> to vector<128x32xf32>
    %32 = arith.mulf %21, %31 : vector<128x32xf32>
    %33 = arith.addf %13, %32 : vector<128x32xf32>
    %cst_18 = arith.constant 1.000000e+00 : f32
    %34 = vector.broadcast %cst_18 : f32 to vector<128x32xf32>
    %35 = arith.mulf %33, %34 : vector<128x32xf32>
    %cst_19 = arith.constant 5.000000e-01 : f32
    %36 = vector.broadcast %cst_19 : f32 to vector<128x32xf32>
    %37 = arith.mulf %36, %35 : vector<128x32xf32>
    %cst_20 = arith.constant 5.000000e-01 : f32
    %38 = vector.broadcast %cst_20 : f32 to vector<128x32xf32>
    %39 = arith.mulf %38, %0 : vector<128x32xf32>
    %40 = arith.addf %37, %39 : vector<128x32xf32>
    %c0_21 = arith.constant 0 : index
    %c0_22 = arith.constant 0 : index
    %41 = vector.load %arg8[%c0_21, %c0_22] : memref<1x32xf32, #tpu.memory_space<vmem>>, vector<1x32xf32>
    %c0_23 = arith.constant 0 : index
    %c0_24 = arith.constant 0 : index
    %42 = vector.load %arg9[%c0_23, %c0_24] : memref<1x32xf32, #tpu.memory_space<vmem>>, vector<1x32xf32>
    %cst_25 = arith.constant dense<0.000000e+00> : vector<128xf32>
    %43 = vector.multi_reduction <add>, %40, %cst_25 [1] : vector<128x32xf32> to vector<128xf32>
    %44 = vector.shape_cast %43 : vector<128xf32> to vector<128x1xf32>
    %cst_26 = arith.constant 3.200000e+01 : f32
    %45 = vector.broadcast %cst_26 : f32 to vector<128x1xf32>
    %46 = arith.divf %44, %45 : vector<128x1xf32>
    %47 = vector.broadcast %46 : vector<128x1xf32> to vector<128x32xf32>
    %48 = arith.subf %40, %47 : vector<128x32xf32>
    %49 = arith.mulf %48, %48 : vector<128x32xf32>
    %cst_27 = arith.constant dense<0.000000e+00> : vector<128xf32>
    %50 = vector.multi_reduction <add>, %49, %cst_27 [1] : vector<128x32xf32> to vector<128xf32>
    %51 = vector.shape_cast %50 : vector<128xf32> to vector<128x1xf32>
    %cst_28 = arith.constant 3.200000e+01 : f32
    %52 = vector.broadcast %cst_28 : f32 to vector<128x1xf32>
    %53 = arith.divf %51, %52 : vector<128x1xf32>
    %cst_29 = arith.constant 9.99999974E-6 : f32
    %54 = vector.broadcast %cst_29 : f32 to vector<128x1xf32>
    %55 = arith.addf %53, %54 : vector<128x1xf32>
    %56 = math.rsqrt %55 : vector<128x1xf32>
    %57 = vector.broadcast %56 : vector<128x1xf32> to vector<128x32xf32>
    %58 = arith.mulf %48, %57 : vector<128x32xf32>
    %59 = vector.broadcast %41 : vector<1x32xf32> to vector<128x32xf32>
    %60 = arith.mulf %58, %59 : vector<128x32xf32>
    %61 = vector.broadcast %42 : vector<1x32xf32> to vector<128x32xf32>
    %62 = arith.addf %60, %61 : vector<128x32xf32>
    %c128_i32 = arith.constant 128 : i32
    %63 = arith.muli %arg0, %c128_i32 : i32
    %64 = tpu.iota {dimensions = array<i32: 0>} : vector<128x1xi32>
    %65 = vector.broadcast %63 : i32 to vector<128x1xi32>
    %66 = arith.addi %65, %64 : vector<128x1xi32>
    %c320_i32 = arith.constant 320 : i32
    %67 = vector.broadcast %c320_i32 : i32 to vector<128x1xi32>
    %68 = arith.cmpi slt, %66, %67 : vector<128x1xi32>
    %69 = arith.extui %68 : vector<128x1xi1> to vector<128x1xi32>
    %70 = arith.sitofp %69 : vector<128x1xi32> to vector<128x1xf32>
    %71 = vector.broadcast %70 : vector<128x1xf32> to vector<128x32xf32>
    %72 = arith.mulf %62, %71 : vector<128x32xf32>
    %c0_30 = arith.constant 0 : index
    %c0_31 = arith.constant 0 : index
    %73 = vector.load %arg10[%c0_30, %c0_31] : memref<128x32xf32, #tpu.memory_space<vmem>>, vector<128x32xf32>
    tpu.vector_store %arg10[%c0_30, %c0_31], %72 {strides = array<i32>} : memref<128x32xf32, #tpu.memory_space<vmem>>, vector<128x32xf32>,
    return
  }
  func.func @transform_0(%arg0: i32) -> (i32, i32) {
    %c0_i32 = arith.constant 0 : i32
    %c0_i32_0 = arith.constant 0 : i32
    return %arg0, %c0_i32 : i32, i32
  }
  func.func @transform_1(%arg0: i32) -> (i32, i32) {
    %c0_i32 = arith.constant 0 : i32
    %c0_i32_0 = arith.constant 0 : i32
    %c0_i32_1 = arith.constant 0 : i32
    return %c0_i32, %c0_i32_0 : i32, i32
  }
  func.func @transform_2(%arg0: i32) -> (i32, i32) {
    %c0_i32 = arith.constant 0 : i32
    %c0_i32_0 = arith.constant 0 : i32
    %c0_i32_1 = arith.constant 0 : i32
    return %c0_i32, %c0_i32_0 : i32, i32
  }
  func.func @transform_3(%arg0: i32) -> (i32, i32) {
    %c0_i32 = arith.constant 0 : i32
    %c0_i32_0 = arith.constant 0 : i32
    %c0_i32_1 = arith.constant 0 : i32
    return %c0_i32, %c0_i32_0 : i32, i32
  }
  func.func @transform_4(%arg0: i32) -> (i32, i32) {
    %c0_i32 = arith.constant 0 : i32
    %c0_i32_0 = arith.constant 0 : i32
    %c0_i32_1 = arith.constant 0 : i32
    return %c0_i32, %c0_i32_0 : i32, i32
  }
  func.func @transform_5(%arg0: i32) -> (i32, i32) {
    %c0_i32 = arith.constant 0 : i32
    %c0_i32_0 = arith.constant 0 : i32
    %c0_i32_1 = arith.constant 0 : i32
    return %c0_i32, %c0_i32_0 : i32, i32
  }
  func.func @transform_6(%arg0: i32) -> (i32, i32) {
    %c0_i32 = arith.constant 0 : i32
    %c0_i32_0 = arith.constant 0 : i32
    %c0_i32_1 = arith.constant 0 : i32
    return %c0_i32, %c0_i32_0 : i32, i32
  }
  func.func @transform_7(%arg0: i32) -> (i32, i32) {
    %c0_i32 = arith.constant 0 : i32
    %c0_i32_0 = arith.constant 0 : i32
    %c0_i32_1 = arith.constant 0 : i32
    return %c0_i32, %c0_i32_0 : i32, i32
  }
  func.func @transform_8(%arg0: i32) -> (i32, i32) {
    %c0_i32 = arith.constant 0 : i32
    %c0_i32_0 = arith.constant 0 : i32
    %c0_i32_1 = arith.constant 0 : i32
    return %c0_i32, %c0_i32_0 : i32, i32
  }
  func.func @transform_9(%arg0: i32) -> (i32, i32) {
    %c0_i32 = arith.constant 0 : i32
    %c0_i32_0 = arith.constant 0 : i32
    return %arg0, %c0_i32 : i32, i32
  }
}

module attributes {stable_mosaic.version = 11 : i64} {
  func.func @pool_fc_kernel(%arg0: i32, %arg1: memref<128x32xf32, #tpu.memory_space<vmem>>, %arg2: memref<128x1xi32, #tpu.memory_space<vmem>>, %arg3: memref<32x8xf32, #tpu.memory_space<vmem>>, %arg4: memref<1x8xf32, #tpu.memory_space<vmem>>, %arg5: memref<2x8xf32, #tpu.memory_space<vmem>>, %arg6: memref<2x32xf32, #tpu.memory_space<vmem>>, %arg7: memref<2x1xf32, #tpu.memory_space<vmem>>) attributes {dimension_semantics = [#tpu.dimension_semantics<arbitrary>], iteration_bounds = array<i64: 3>, scalar_prefetch = 0 : i64, scratch_operands = 2 : i64, tpu.core_type = #tpu.core_type<tc>, window_params = [{transform_indices = @transform_0, window_bounds = array<i64: 128, 32>}, {transform_indices = @transform_1, window_bounds = array<i64: 128, 1>}, {pipeline_mode = #tpu.pipeline_mode<synchronous>, transform_indices = @transform_2, window_bounds = array<i64: 32, 8>}, {pipeline_mode = #tpu.pipeline_mode<synchronous>, transform_indices = @transform_3, window_bounds = array<i64: 1, 8>}, {pipeline_mode = #tpu.pipeline_mode<synchronous>, transform_indices = @transform_4, window_bounds = array<i64: 2, 8>}]} {
    %c0_i32 = arith.constant 0 : i32
    %0 = arith.cmpi eq, %arg0, %c0_i32 : i32
    %1 = arith.extui %0 : i1 to i32
    %c0_i32_0 = arith.constant 0 : i32
    %2 = arith.cmpi ne, %1, %c0_i32_0 : i32
    scf.if %2 {
      %cst_15 = arith.constant 0.000000e+00 : f32
      %22 = vector.broadcast %cst_15 : f32 to vector<2x32xf32>
      %c0_16 = arith.constant 0 : index
      %c0_17 = arith.constant 0 : index
      %23 = vector.load %arg6[%c0_16, %c0_17] : memref<2x32xf32, #tpu.memory_space<vmem>>, vector<2x32xf32>
      tpu.vector_store %arg6[%c0_16, %c0_17], %22 {strides = array<i32>} : memref<2x32xf32, #tpu.memory_space<vmem>>, vector<2x32xf32>,
      %cst_18 = arith.constant 0.000000e+00 : f32
      %24 = vector.broadcast %cst_18 : f32 to vector<2x1xf32>
      %c0_19 = arith.constant 0 : index
      %c0_20 = arith.constant 0 : index
      %25 = vector.load %arg7[%c0_19, %c0_20] : memref<2x1xf32, #tpu.memory_space<vmem>>, vector<2x1xf32>
      tpu.vector_store %arg7[%c0_19, %c0_20], %24 {strides = array<i32>} : memref<2x1xf32, #tpu.memory_space<vmem>>, vector<2x1xf32>,
    } else {
    }
    %c0 = arith.constant 0 : index
    %c0_1 = arith.constant 0 : index
    %3 = vector.load %arg1[%c0, %c0_1] : memref<128x32xf32, #tpu.memory_space<vmem>>, vector<128x32xf32>
    %c0_2 = arith.constant 0 : index
    %c0_3 = arith.constant 0 : index
    %4 = vector.load %arg2[%c0_2, %c0_3] : memref<128x1xi32, #tpu.memory_space<vmem>>, vector<128x1xi32>
    %5 = tpu.iota {dimensions = array<i32: 1>} : vector<128x2xi32>
    %6 = vector.broadcast %4 : vector<128x1xi32> to vector<128x2xi32>
    %7 = arith.cmpi eq, %6, %5 : vector<128x2xi32>
    %8 = arith.extui %7 : vector<128x2xi1> to vector<128x2xi32>
    %9 = arith.sitofp %8 : vector<128x2xi32> to vector<128x2xf32>
    %c0_4 = arith.constant 0 : index
    %c0_5 = arith.constant 0 : index
    %10 = vector.load %arg6[%c0_4, %c0_5] : memref<2x32xf32, #tpu.memory_space<vmem>>, vector<2x32xf32>
    %cst = arith.constant dense<0.000000e+00> : vector<2x32xf32>
    %11 = tpu.matmul %9, %3, %cst {dimension_numbers = #tpu.dot_dimension_numbers<[0], [0], [1], [1], [0, 1, 1, 1], [], []>} : vector<128x2xf32>, vector<128x32xf32>, vector<2x32xf32> -> vector<2x32xf32>
    %12 = arith.addf %10, %11 : vector<2x32xf32>
    %c0_6 = arith.constant 0 : index
    %c0_7 = arith.constant 0 : index
    %13 = vector.load %arg6[%c0_6, %c0_7] : memref<2x32xf32, #tpu.memory_space<vmem>>, vector<2x32xf32>
    tpu.vector_store %arg6[%c0_6, %c0_7], %12 {strides = array<i32>} : memref<2x32xf32, #tpu.memory_space<vmem>>, vector<2x32xf32>,
    %c0_8 = arith.constant 0 : index
    %c0_9 = arith.constant 0 : index
    %14 = vector.load %arg7[%c0_8, %c0_9] : memref<2x1xf32, #tpu.memory_space<vmem>>, vector<2x1xf32>
    %cst_10 = arith.constant 1.000000e+00 : f32
    %15 = vector.broadcast %cst_10 : f32 to vector<128x1xf32>
    %cst_11 = arith.constant dense<0.000000e+00> : vector<2x1xf32>
    %16 = tpu.matmul %9, %15, %cst_11 {dimension_numbers = #tpu.dot_dimension_numbers<[0], [0], [1], [1], [0, 1, 1, 1], [], []>} : vector<128x2xf32>, vector<128x1xf32>, vector<2x1xf32> -> vector<2x1xf32>
    %17 = arith.addf %14, %16 : vector<2x1xf32>
    %c0_12 = arith.constant 0 : index
    %c0_13 = arith.constant 0 : index
    %18 = vector.load %arg7[%c0_12, %c0_13] : memref<2x1xf32, #tpu.memory_space<vmem>>, vector<2x1xf32>
    tpu.vector_store %arg7[%c0_12, %c0_13], %17 {strides = array<i32>} : memref<2x1xf32, #tpu.memory_space<vmem>>, vector<2x1xf32>,
    %c2_i32 = arith.constant 2 : i32
    %19 = arith.cmpi eq, %arg0, %c2_i32 : i32
    %20 = arith.extui %19 : i1 to i32
    %c0_i32_14 = arith.constant 0 : i32
    %21 = arith.cmpi ne, %20, %c0_i32_14 : i32
    scf.if %21 {
      %c0_15 = arith.constant 0 : index
      %c0_16 = arith.constant 0 : index
      %22 = vector.load %arg6[%c0_15, %c0_16] : memref<2x32xf32, #tpu.memory_space<vmem>>, vector<2x32xf32>
      %c0_17 = arith.constant 0 : index
      %c0_18 = arith.constant 0 : index
      %23 = vector.load %arg7[%c0_17, %c0_18] : memref<2x1xf32, #tpu.memory_space<vmem>>, vector<2x1xf32>
      %cst_19 = arith.constant 1.000000e+00 : f32
      %24 = vector.broadcast %cst_19 : f32 to vector<2x1xf32>
      %25 = arith.maximumf %23, %24 : vector<2x1xf32>
      %26 = vector.broadcast %25 : vector<2x1xf32> to vector<2x32xf32>
      %27 = arith.divf %22, %26 : vector<2x32xf32>
      %cst_20 = arith.constant 2.000000e-01 : f32
      %28 = vector.broadcast %cst_20 : f32 to vector<2x32xf32>
      %29 = arith.mulf %28, %27 : vector<2x32xf32>
      %c0_21 = arith.constant 0 : index
      %c0_22 = arith.constant 0 : index
      %30 = vector.load %arg3[%c0_21, %c0_22] : memref<32x8xf32, #tpu.memory_space<vmem>>, vector<32x8xf32>
      %cst_23 = arith.constant dense<0.000000e+00> : vector<2x8xf32>
      %31 = tpu.matmul %29, %30, %cst_23 {dimension_numbers = #tpu.dot_dimension_numbers<[1], [0], [0], [1], [0, 0, 1, 1], [], []>} : vector<2x32xf32>, vector<32x8xf32>, vector<2x8xf32> -> vector<2x8xf32>
      %c0_24 = arith.constant 0 : index
      %c0_25 = arith.constant 0 : index
      %32 = vector.load %arg4[%c0_24, %c0_25] : memref<1x8xf32, #tpu.memory_space<vmem>>, vector<1x8xf32>
      %33 = vector.broadcast %32 : vector<1x8xf32> to vector<2x8xf32>
      %34 = arith.addf %31, %33 : vector<2x8xf32>
      %c0_26 = arith.constant 0 : index
      %c0_27 = arith.constant 0 : index
      %35 = vector.load %arg5[%c0_26, %c0_27] : memref<2x8xf32, #tpu.memory_space<vmem>>, vector<2x8xf32>
      tpu.vector_store %arg5[%c0_26, %c0_27], %34 {strides = array<i32>} : memref<2x8xf32, #tpu.memory_space<vmem>>, vector<2x8xf32>,
    } else {
    }
    return
  }
  func.func @transform_0(%arg0: i32) -> (i32, i32) {
    %c0_i32 = arith.constant 0 : i32
    %c0_i32_0 = arith.constant 0 : i32
    return %arg0, %c0_i32 : i32, i32
  }
  func.func @transform_1(%arg0: i32) -> (i32, i32) {
    %c0_i32 = arith.constant 0 : i32
    %c0_i32_0 = arith.constant 0 : i32
    return %arg0, %c0_i32 : i32, i32
  }
  func.func @transform_2(%arg0: i32) -> (i32, i32) {
    %c0_i32 = arith.constant 0 : i32
    %c0_i32_0 = arith.constant 0 : i32
    %c0_i32_1 = arith.constant 0 : i32
    return %c0_i32, %c0_i32_0 : i32, i32
  }
  func.func @transform_3(%arg0: i32) -> (i32, i32) {
    %c0_i32 = arith.constant 0 : i32
    %c0_i32_0 = arith.constant 0 : i32
    %c0_i32_1 = arith.constant 0 : i32
    return %c0_i32, %c0_i32_0 : i32, i32
  }
  func.func @transform_4(%arg0: i32) -> (i32, i32) {
    %c0_i32 = arith.constant 0 : i32
    %c0_i32_0 = arith.constant 0 : i32
    %c0_i32_1 = arith.constant 0 : i32
    return %c0_i32, %c0_i32_0 : i32, i32
  }
}

</mosaic_0001>

<bundles_post_ra>
// kernel: sgformer_forward.6
= control target key start
LH: loop header
LB: loop body
LE: loop exit
PB: predicated region body
PF: predicated region fallthrough
CT: control target
= control target key end

     0   :  { %s1057_s18 = smov 0   ;;  %s1588_s0 = inlined_call_operand.vmem [shape: f32[384,16], index: 0, kind: input, shape index: {}]   ;;  %s1589_s1 = inlined_call_operand.vmem [shape: bf16[16,32], index: 1, kind: input, shape index: {}]   ;;  %s1590_s2 = inlined_call_operand.vmem [shape: f32[1,32], index: 2, kind: input, shape index: {}]   ;;  %s1591_s3 = inlined_call_operand.vmem [shape: f32[1,32], index: 3, kind: input, shape index: {}]   ;;  %s1592_s4 = inlined_call_operand.vmem [shape: f32[1,32], index: 4, kind: input, shape index: {}]   ;;  %s1593_s5 = inlined_call_operand.vmem [shape: f32[384,32], index: 5, kind: output, shape index: {}]  }
   0x1 LB: > { %s926_s19 = sadd.s32 4294967295, %s1023_s18   ;;  %p930_p0 = scmp.ge.s32.totalorder %s1023_s18, 1  ;;  %s1023_s18 = sphi %s1057_s18, %s15_s18  }
   0x2   : > { %p188_p1 = scmp.lt.s32.totalorder %s1023_s18, 4 }
   0x4   : > { %p189_p2 = pnand %p930_p0, %p188_p1 }
   0x5   : > { %s931_s22 = sshll.u32 (!%p189_p2), %s926_s19, 4  ;;  %s947_s29 = sshll.u32 (!%p189_p2), %s926_s19, 7 }
   0x6   : > { %192 = sbr.rel (%p189_p2) target bundleno = 487 (0x1e7), region = 40  ;;  %p217_p3 = scmp.lt.s32.totalorder (!%p189_p2), %s931_s22, 47 }
   0xb   : > { %v966_v0 = vld [vmem:[%s1589_s1] sm:$0xff]  ;;  %s1595_s22 = smov (!%p217_p3, %s931_s22), 47  ;;  %vm265_vm0 = vcmask 130048   ;;  %vm341_vm1 = vcmask 261120  }
   0xc   : > { %297 = vmatpush.bf16.msra.mxu0 %v966_v0  ;;  %967 = vmatpush.bf16.msra.mxu1 %v966_v0  ;;  %s932_s23 = sshll.u32 %s1595_s22, 3  ;;  %v1089_v25 = vld [vmem:[%s1590_s2] ss:$0 sm:$0xff] }
   0xd   : > { %968 = vmatpush.bf16.msra.mxu2 %v966_v0  ;;  %969 = vmatpush.bf16.msra.mxu3 %v966_v0  ;;  %s220_s26 = scalar_lea.vmem %s1588_s0, %s932_s23  ;;  %s1388_s11 = scalar_lea.vmem %s1593_s5, %s932_s23 }
   0xe   : > { %v229_v1 = vld [vmem:[%s220_s26] sm:$0xff]  ;;  %v230_v2 = vld [vmem:[%s220_s26 + $0x8] sm:$0xff]  ;;  %v231_v13 = vld [vmem:[%s220_s26 + $0x10] sm:$0xff] }
   0xf   : > { %v233_v3 = vld [vmem:[%s220_s26 + $0x20] sm:$0xff]  ;;  %v245_v4 = vpack.c.bf16 %v230_v2, %v229_v1  ;;  %v234_v5 = vld [vmem:[%s220_s26 + $0x28] sm:$0xff]  ;;  %v232_v14 = vld [vmem:[%s220_s26 + $0x18] sm:$0xff] }
  0x10   : > { %v237_v6 = vld [vmem:[%s220_s26 + $0x40] sm:$0xff]  ;;  %v238_v7 = vld [vmem:[%s220_s26 + $0x48] sm:$0xff]  ;;  %v247_v8 = vpack.c.bf16 %v234_v5, %v233_v3  ;;  %v239_v15 = vld [vmem:[%s220_s26 + $0x50] sm:$0xff]  ;;  %v246_v21 = vpack.c.bf16 %v232_v14, %v231_v13 }
  0x11   : > { %v249_v9 = vpack.c.bf16 %v238_v7, %v237_v6  ;;  %v241_v10 = vld [vmem:[%s220_s26 + $0x60] sm:$0xff]  ;;  %v242_v11 = vld [vmem:[%s220_s26 + $0x68] sm:$0xff]  ;;  %939 = vmatmul.msk.bf16.vlgmr.msra.gmra.mxu0 %vm265_vm0, %v245_v4  ;;  %v240_v16 = vld [vmem:[%s220_s26 + $0x58] sm:$0xff] }
  0x12   : > { %v251_v12 = vpack.c.bf16 %v242_v11, %v241_v10  ;;  %941 = vmatmul.msk.bf16.vlgmr.msra.gmra.mxu1 %vm265_vm0, %v247_v8  ;;  %v235_v17 = vld [vmem:[%s220_s26 + $0x30] sm:$0xff]  ;;  %v236_v18 = vld [vmem:[%s220_s26 + $0x38] sm:$0xff]  ;;  %v250_v22 = vpack.c.bf16 %v240_v16, %v239_v15  ;;  %v1025_v10 = vmov 32.0  }
  0x13   : > { %943 = vmatmul.msk.bf16.vlgmr.msra.gmra.mxu2 %vm265_vm0, %v249_v9  ;;  %v243_v19 = vld [vmem:[%s220_s26 + $0x70] sm:$0xff]  ;;  %v244_v20 = vld [vmem:[%s220_s26 + $0x78] sm:$0xff]  ;;  %v248_v23 = vpack.c.bf16 %v236_v18, %v235_v17  ;;  %983 = vrcp.f32 %v1025_v10 }
  0x14   : > { %945 = vmatmul.msk.bf16.vlgmr.msra.gmra.mxu3 %vm265_vm0, %v251_v12  ;;  %v252_v24 = vpack.c.bf16 %v244_v20, %v243_v19 }
  0x19   : > { %v984_v11 = vpop.eup %983 }
  0x1a   : > { %v391_v12 = vmul.f32 32.0, %v984_v11  ;;  %vm395_vm2 = vweird.f32 %v984_v11 }
  0x1c   : > { %v392_v13 = vsub.f32 1.0, %v391_v12 }
  0x1e   : > { %v393_v14 = vmul.f32 %v984_v11, %v392_v13 }
  0x20   : > { %v394_v15 = vadd.f32 %v984_v11, %v393_v14 }
  0x21   : > { %940 = vmatmul.msk.bf16.gmra.mxu0 %vm265_vm0, %v246_v21 }
  0x22   : > { %942 = vmatmul.msk.bf16.gmra.mxu1 %vm265_vm0, %v248_v23  ;;  %v1171_v16 = vsel %vm395_vm2, %v984_v11, %v394_v15 }
  0x23   : > { %944 = vmatmul.msk.bf16.gmra.mxu2 %vm265_vm0, %v250_v22 }
  0x24   : > { %946 = vmatmul.msk.bf16.gmra.mxu3 %vm265_vm0, %v252_v24 }
  0x8e   : > { %v299_v26 = vpop.f32.mrf.mxu0 }
  0x8f   : > { %v1092_v27 = vadd.f32 %v1089_v25, %v299_v26  ;;  %v309_v28 = vpop.f32.mrf.mxu1 }
  0x90   : > { %v1095_v29 = vadd.f32 %v1089_v25, %v309_v28 }
  0x91   : > { %v342_v30 = vsel %vm341_vm1, %v1092_v27, 0.0 }
  0x92   : > { %v354_v31 = vsel %vm341_vm1, %v1095_v29, 0.0  ;;  %343 = vadd.xlane.f32.xlu0 %v342_v30 }
  0x93   : > { %355 = vadd.xlane.f32.xlu2 %v354_v31 }
  0x96   : > { %v319_v32 = vpop.f32.mrf.mxu2  ;;  %v301_v36 = vpop.f32.mrf.mxu0 }
  0x97   : > { %v1102_v33 = vadd.f32 %v1089_v25, %v319_v32  ;;  %v329_v34 = vpop.f32.mrf.mxu3  ;;  %v311_v39 = vpop.f32.mrf.mxu1  ;;  %v1112_v40 = vadd.f32 %v1089_v25, %v301_v36 }
  0x98   : > { %v1105_v35 = vadd.f32 %v1089_v25, %v329_v34  ;;  %v1115_v42 = vadd.f32 %v1089_v25, %v311_v39 }
  0x99   : > { %v366_v37 = vsel %vm341_vm1, %v1102_v33, 0.0  ;;  %v345_v46 = vsel %vm341_vm1, %v1112_v40, 0.0 }
  0x9a   : > { %v378_v38 = vsel %vm341_vm1, %v1105_v35, 0.0  ;;  %v357_v48 = vsel %vm341_vm1, %v1115_v42, 0.0 }
  0x9b   : > { %379 = vadd.xlane.f32.xlu0 %v378_v38  ;;  %367 = vadd.xlane.f32.xlu2 %v366_v37 }
  0x9e   : > { %v321_v41 = vpop.f32.mrf.mxu2  ;;  %v304_v47 = vpop.f32.mrf.mxu0 }
  0x9f   : > { %v331_v43 = vpop.f32.mrf.mxu3  ;;  %v1127_v49 = vadd.f32 %v1089_v25, %v304_v47  ;;  %v1130_v50 = vadd.f32 %v1089_v25, %v321_v41  ;;  %v314_v55 = vpop.f32.mrf.mxu1 }
  0xa0   : > { %v1118_v44 = vadd.f32 %v1089_v25, %v331_v43  ;;  %v1140_v57 = vadd.f32 %v1089_v25, %v314_v55 }
  0xa1   : > { %v348_v53 = vsel %vm341_vm1, %v1127_v49, 0.0  ;;  %v369_v54 = vsel %vm341_vm1, %v1130_v50, 0.0 }
  0xa2   : > { %v381_v45 = vsel %vm341_vm1, %v1118_v44, 0.0  ;;  %v360_v61 = vsel %vm341_vm1, %v1140_v57, 0.0 }
  0xa3   : > { %382 = vadd.xlane.f32.xlu1 %v381_v45  ;;  %346 = vadd.xlane.f32.xlu0 %v345_v46 }
  0xa4   : > { %358 = vadd.xlane.f32.xlu2 %v357_v48 }
  0xa6   : > { %v324_v51 = vpop.f32.mrf.mxu2  ;;  %v306_v0 = vpop.f32.mrf.mxu0 }
  0xa7   : > { %v334_v52 = vpop.f32.mrf.mxu3  ;;  %v1137_v56 = vadd.f32 %v1089_v25, %v324_v51  ;;  %v1158_v3 = vadd.f32 %v1089_v25, %v306_v0  ;;  %v316_v7 = vpop.f32.mrf.mxu1 }
  0xa8   : > { %v1152_v1 = vadd.f32 %v1089_v25, %v334_v52  ;;  %v1167_v8 = vadd.f32 %v1089_v25, %v316_v7 }
  0xa9   : > { %v372_v60 = vsel %vm341_vm1, %v1137_v56, 0.0  ;;  %v351_v6 = vsel %vm341_vm1, %v1158_v3, 0.0 }
  0xaa   : > { %v384_v4 = vsel %vm341_vm1, %v1152_v1, 0.0  ;;  %v363_v9 = vsel %vm341_vm1, %v1167_v8, 0.0 }
  0xab   : > { %349 = vadd.xlane.f32.xlu1 %v348_v53  ;;  %370 = vadd.xlane.f32.xlu0 %v369_v54 }
  0xae   : > { %v326_v58 = vpop.f32.mrf.mxu2 }
  0xaf   : > { %v1143_v59 = vadd.f32 %v1089_v25, %v326_v58  ;;  %v336_v63 = vpop.f32.mrf.mxu3 }
  0xb0   : > { %v1155_v2 = vadd.f32 %v1089_v25, %v336_v63 }
  0xb1   : > { %v375_v62 = vsel %vm341_vm1, %v1143_v59, 0.0 }
  0xb2   : > { %376 = vadd.xlane.f32.xlu2 %v375_v62  ;;  %v387_v5 = vsel %vm341_vm1, %v1155_v2, 0.0 }
  0xb3   : > { %373 = vadd.xlane.f32.xlu1 %v372_v60  ;;  %361 = vadd.xlane.f32.xlu0 %v360_v61 }
  0xba   : > { %385 = vadd.xlane.f32.xlu2 %v384_v4 }
  0xbb   : > { %352 = vadd.xlane.f32.xlu1 %v351_v6  ;;  %388 = vadd.xlane.f32.xlu0 %v387_v5 }
  0xc3   : > { %364 = vadd.xlane.f32.xlu1 %v363_v9 }
 0x105   : > { %v344_v17 = vpop.xlane.xlu0 %343 }
 0x106   : > { %v356_v18 = vpop.xlane.xlu2 %355  ;;  %v397_v19 = vmul.f32 %v1171_v16, %v344_v17 }
 0x107   : > { %v401_v20 = vmul.f32 %v1171_v16, %v356_v18 }
 0x108   : > { %v1176_v21 = vsub.f32 %v1092_v27, %v397_v19 }
 0x109   : > { %v1179_v22 = vsub.f32 %v1095_v29, %v401_v20 }
 0x10a   : > { %v429_v23 = vmul.f32 %v1176_v21, %v1176_v21 }
 0x10b   : > { %v433_v24 = vmul.f32 %v1179_v22, %v1179_v22 }
 0x10c   : > { %v445_v25 = vsel %vm341_vm1, %v429_v23, 0.0 }
 0x10d   : > { %v457_v26 = vsel %vm341_vm1, %v433_v24, 0.0  ;;  %446 = vadd.xlane.f32.xlu1 %v445_v25 }
 0x10e   : > { %v380_v28 = vpop.xlane.xlu0 %379  ;;  %458 = vadd.xlane.f32.xlu2 %v457_v26  ;;  %v368_v30 = vpop.xlane.xlu2 %367 }
 0x10f   : > { %v409_v27 = vmul.f32 %v1171_v16, %v380_v28  ;;  %v405_v31 = vmul.f32 %v1171_v16, %v368_v30 }
 0x111   : > { %v1190_v29 = vsub.f32 %v1105_v35, %v409_v27  ;;  %v1193_v32 = vsub.f32 %v1102_v33, %v405_v31 }
 0x113   : > { %v441_v34 = vmul.f32 %v1190_v29, %v1190_v29  ;;  %v437_v36 = vmul.f32 %v1193_v32, %v1193_v32 }
 0x115   : > { %v481_v37 = vsel %vm341_vm1, %v441_v34, 0.0  ;;  %v469_v39 = vsel %vm341_vm1, %v437_v36, 0.0 }
 0x116   : > { %v1200_v38 = vpop.xlane.xlu1 %382  ;;  %482 = vadd.xlane.f32.xlu1 %v481_v37  ;;  %v347_v41 = vpop.xlane.xlu0 %346  ;;  %470 = vadd.xlane.f32.xlu0 %v469_v39 }
 0x117   : > { %v359_v43 = vpop.xlane.xlu2 %358  ;;  %v398_v35 = vmul.f32 %v1171_v16, %v347_v41  ;;  %v410_v31 = vmul.f32 %v1171_v16, %v1200_v38 }
 0x118   : > { %v402_v33 = vmul.f32 %v1171_v16, %v359_v43  ;;  %v756_v43 = vlaneseq }
 0x119   : > { %v1206_v45 = vsub.f32 %v1112_v40, %v398_v35  ;;  %v1281_v37 = vsub.f32 %v1118_v44, %v410_v31 }
 0x11a   : > { %v1209_v46 = vsub.f32 %v1115_v42, %v402_v33  ;;  %v1288_v33 = vshrl.u32 %v756_v43, 7 }
 0x11b   : > { %v430_v47 = vmul.f32 %v1206_v45, %v1206_v45 }
 0x11c   : > { %v434_v48 = vmul.f32 %v1209_v46, %v1209_v46  ;;  %v758_v43 = vadd.s32 8, %v1288_v33 }
 0x11d   : > { %v448_v51 = vsel %vm341_vm1, %v430_v47, 0.0 }
 0x11e   : > { %v350_v52 = vpop.xlane.xlu1 %349  ;;  %v460_v53 = vsel %vm341_vm1, %v434_v48, 0.0  ;;  %449 = vadd.xlane.f32.xlu2 %v448_v51  ;;  %v371_v54 = vpop.xlane.xlu0 %370 }
 0x11f   : > { %v399_v55 = vmul.f32 %v1171_v16, %v350_v52  ;;  %461 = vadd.xlane.f32.xlu0 %v460_v53  ;;  %v406_v40 = vmul.f32 %v1171_v16, %v371_v54  ;;  %v761_v53 = vadd.s32 32, %v1288_v33  ;;  %v1295_v54 = vstv %s947_s29 }
 0x121   : > { %v1220_v42 = vsub.f32 %v1127_v49, %v399_v55  ;;  %v1223_v58 = vsub.f32 %v1130_v50, %v406_v40  ;;  %v778_v40 = vadd.s32 %v1295_v54, %v761_v53 }
 0x123   : > { %v431_v60 = vmul.f32 %v1220_v42, %v1220_v42  ;;  %v438_v61 = vmul.f32 %v1223_v58, %v1223_v58  ;;  %vm794_vm3 = vcmp.lt.s32.totalorder %v778_v40, 320 }
 0x125   : > { %v377_v62 = vpop.xlane.xlu2 %376  ;;  %v472_v63 = vsel %vm341_vm1, %v438_v61, 0.0  ;;  %v451_v5 = vsel %vm341_vm1, %v431_v60, 0.0 }
 0x126   : > { %v408_v0 = vmul.f32 %v1171_v16, %v377_v62  ;;  %v374_v4 = vpop.xlane.xlu1 %373  ;;  %473 = vadd.xlane.f32.xlu1 %v472_v63  ;;  %v362_v49 = vpop.xlane.xlu0 %361 }
 0x127   : > { %v407_v6 = vmul.f32 %v1171_v16, %v374_v4  ;;  %452 = vadd.xlane.f32.xlu0 %v451_v5  ;;  %v403_v50 = vmul.f32 %v1171_v16, %v362_v49  ;;  %v769_v49 = vadd.s32 96, %v1288_v33 }
 0x128   : > { %v1235_v7 = vsub.f32 %v1143_v59, %v408_v0 }
 0x129   : > { %v1238_v9 = vsub.f32 %v1137_v56, %v407_v6  ;;  %v1241_v10 = vsub.f32 %v1140_v57, %v403_v50 }
 0x12a   : > { %v440_v11 = vmul.f32 %v1235_v7, %v1235_v7 }
 0x12b   : > { %v439_v12 = vmul.f32 %v1238_v9, %v1238_v9  ;;  %v435_v13 = vmul.f32 %v1241_v10, %v1241_v10 }
 0x12c   : > { %v478_v57 = vsel %vm341_vm1, %v440_v11, 0.0  ;;  %v774_v11 = vadd.s32 %v1295_v54, %v1288_v33 }
 0x12d   : > { %v386_v14 = vpop.xlane.xlu2 %385  ;;  %v475_v15 = vsel %vm341_vm1, %v439_v12, 0.0  ;;  %v463_v59 = vsel %vm341_vm1, %v435_v13, 0.0  ;;  %v765_v13 = vadd.s32 64, %v1288_v33 }
 0x12e   : > { %v411_v56 = vmul.f32 %v1171_v16, %v386_v14  ;;  %v353_v17 = vpop.xlane.xlu1 %352  ;;  %476 = vadd.xlane.f32.xlu2 %v475_v15  ;;  %464 = vadd.xlane.f32.xlu1 %v463_v59  ;;  %v389_v18 = vpop.xlane.xlu0 %388  ;;  %v1026_v15 = vmov 0.0   ;;  %vm790_vm4 = vcmp.lt.s32.totalorder %v774_v11, 320 }
 0x12f   : > { %v400_v19 = vmul.f32 %v1171_v16, %v353_v17  ;;  %479 = vadd.xlane.f32.xlu0 %v478_v57  ;;  %v412_v24 = vmul.f32 %v1171_v16, %v389_v18  ;;  %v1311_v59 = vsel %vm794_vm3, 1.0, %v1026_v15  ;;  %v786_v17 = vadd.s32 %v1295_v54, %v769_v49 }
 0x130   : > { %v1255_v20 = vsub.f32 %v1152_v1, %v411_v56 }
 0x131   : > { %v1258_v23 = vsub.f32 %v1158_v3, %v400_v19  ;;  %v1266_v28 = vsub.f32 %v1155_v2, %v412_v24  ;;  %vm802_vm9 = vcmp.lt.s32.totalorder %v786_v17, 320 }
 0x132   : > { %v443_v25 = vmul.f32 %v1255_v20, %v1255_v20  ;;  %v1352_v53 = vsel %vm802_vm9, 1.0, %v1026_v15 }
 0x133   : > { %v432_v26 = vmul.f32 %v1258_v23, %v1258_v23  ;;  %v444_v36 = vmul.f32 %v1266_v28, %v1266_v28 }
 0x134   : > { %v487_v1 = vsel %vm341_vm1, %v443_v25, 0.0 }
 0x135   : > { %v454_v30 = vsel %vm341_vm1, %v432_v26, 0.0  ;;  %v490_v41 = vsel %vm341_vm1, %v444_v36, 0.0  ;;  %v1316_v26 = vadd.s32 %v1295_v54, %v765_v13 }
 0x136   : > { %v365_v27 = vpop.xlane.xlu1 %364  ;;  %455 = vadd.xlane.f32.xlu1 %v454_v30 }
 0x137   : > { %v404_v3 = vmul.f32 %v1171_v16, %v365_v27  ;;  %488 = vadd.xlane.f32.xlu0 %v487_v1  ;;  %vm798_vm12 = vcmp.lt.s32.totalorder %v1316_v26, 320 }
 0x139   : > { %v1274_v34 = vsub.f32 %v1167_v8, %v404_v3  ;;  %v442_v8 = vmul.f32 %v1281_v37, %v1281_v37 }
 0x13b   : > { %v436_v2 = vmul.f32 %v1274_v34, %v1274_v34  ;;  %v484_v38 = vsel %vm341_vm1, %v442_v8, 0.0 }
 0x13d   : > { %v466_v39 = vsel %vm341_vm1, %v436_v2, 0.0 }
 0x13e   : > { %467 = vadd.xlane.f32.xlu2 %v466_v39  ;;  %491 = vadd.xlane.f32.xlu1 %v490_v41  ;;  %v1332_v41 = vld [vmem:[%s1591_s3] ss:$0 sm:$0xff] }
 0x146   : > { %485 = vadd.xlane.f32.xlu2 %v484_v38 }
 0x180   : > { %v447_v35 = vpop.xlane.xlu1 %446 }
 0x181   : > { %v459_v47 = vpop.xlane.xlu2 %458  ;;  %v493_v44 = vmul.f32 %v447_v35, %v1171_v16  ;;  %v948_v35 = vsel %vm790_vm4, 1.0, %v1026_v15 }
 0x182   : > { %v497_v48 = vmul.f32 %v459_v47, %v1171_v16 }
 0x183   : > { %v509_v51 = vadd.f32 1e-05, %v493_v44 }
 0x184   : > { %v513_v52 = vadd.f32 1e-05, %v497_v48  ;;  %v1347_v48 = vld [vmem:[%s1592_s4] ss:$0 sm:$0xff] }
 0x185   : > { %985 = vrsqrt.f32 %v509_v51  ;;  %vm531_vm5 = vweird.f32 %v509_v51 }
 0x186   : > { %987 = vrsqrt.f32 %v513_v52  ;;  %vm571_vm7 = vweird.f32 %v513_v52 }
 0x189   : > { %v483_v55 = vpop.xlane.xlu1 %482  ;;  %v471_v61 = vpop.xlane.xlu0 %470 }
 0x18a   : > { %v505_v60 = vmul.f32 %v483_v55, %v1171_v16  ;;  %v501_v62 = vmul.f32 %v471_v61, %v1171_v16  ;;  %v762_v61 = vadd.s32 40, %v1288_v33 }
 0x18b   : > { %v986_v63 = vpop.eup %985 }
 0x18c   : > { %v1300_v0 = vadd.f32 1e-05, %v505_v60  ;;  %v988_v4 = vpop.eup %987  ;;  %v526_v5 = vmul.f32 %v986_v63, %v509_v51  ;;  %v1303_v6 = vadd.f32 1e-05, %v501_v62  ;;  %vm532_vm6 = vweird.f32 %v986_v63 }
 0x18d   : > { %v566_v50 = vmul.f32 %v988_v4, %v513_v52  ;;  %vm572_vm8 = vweird.f32 %v988_v4  ;;  %vm533_vm10 = vmor %vm531_vm5, %vm532_vm6 }
 0x18e   : > { %989 = vrsqrt.f32 %v1300_v0  ;;  %v527_v12 = vmul.f32 %v986_v63, %v526_v5  ;;  %vm573_vm11 = vmor %vm571_vm7, %vm572_vm8  ;;  %vm651_vm13 = vweird.f32 %v1300_v0  ;;  %vm611_vm0 = vweird.f32 %v1303_v6 }
 0x18f   : > { %991 = vrsqrt.f32 %v1303_v6  ;;  %v567_v14 = vmul.f32 %v988_v4, %v566_v50 }
 0x190   : > { %v528_v56 = vmul.f32 0.5, %v527_v12 }
 0x191   : > { %v450_v57 = vpop.xlane.xlu2 %449  ;;  %v568_v18 = vmul.f32 0.5, %v567_v14 }
 0x192   : > { %v494_v19 = vmul.f32 %v450_v57, %v1171_v16  ;;  %v462_v24 = vpop.xlane.xlu0 %461  ;;  %v529_v25 = vsub.f32 1.5, %v528_v56 }
 0x193   : > { %v498_v30 = vmul.f32 %v462_v24, %v1171_v16  ;;  %v569_v1 = vsub.f32 1.5, %v568_v18 }
 0x194   : > { %v1319_v27 = vpop.eup %989  ;;  %v1321_v3 = vadd.f32 1e-05, %v494_v19  ;;  %v530_v36 = vmul.f32 %v986_v63, %v529_v25  ;;  %v779_v19 = vadd.s32 %v1295_v54, %v762_v61 }
 0x195   : > { %v1323_v31 = vpop.eup %991  ;;  %v646_v2 = vmul.f32 %v1319_v27, %v1300_v0  ;;  %v1327_v39 = vadd.f32 1e-05, %v498_v30  ;;  %v570_v8 = vmul.f32 %v988_v4, %v569_v1  ;;  %vm652_vm14 = vweird.f32 %v1319_v27 }
 0x196   : > { %v606_v38 = vmul.f32 %v1323_v31, %v1303_v6  ;;  %993 = vrsqrt.f32 %v1321_v3  ;;  %v534_v47 = vsel %vm533_vm10, %v986_v63, %v530_v36  ;;  %vm612_vm15 = vweird.f32 %v1323_v31  ;;  %vm653_vm2 = vmor %vm651_vm13, %vm652_vm14 }
 0x197   : > { %v647_v44 = vmul.f32 %v1319_v27, %v646_v2  ;;  %995 = vrsqrt.f32 %v1327_v39  ;;  %v574_v51 = vsel %vm573_vm11, %v988_v4, %v570_v8  ;;  %v685_v52 = vmul.f32 %v534_v47, %v1176_v21  ;;  %vm613_vm3 = vmor %vm611_vm0, %vm612_vm15 }
 0x198   : > { %v607_v55 = vmul.f32 %v1323_v31, %v606_v38  ;;  %v689_v40 = vmul.f32 %v574_v51, %v1179_v22  ;;  %v1360_v4 = vadd.s32 %v1295_v54, %v758_v43  ;;  %vm795_vm6 = vcmp.lt.s32.totalorder %v779_v19, 320 }
 0x199   : > { %v648_v60 = vmul.f32 0.5, %v647_v44  ;;  %v474_v62 = vpop.xlane.xlu1 %473  ;;  %v704_v63 = vmul.f32 %v1332_v41, %v685_v52  ;;  %vm541_vm8 = vweird.f32 %v1321_v3  ;;  %vm581_vm10 = vweird.f32 %v1327_v39 }
 0x19a   : > { %v608_v5 = vmul.f32 0.5, %v607_v55  ;;  %v502_v21 = vmul.f32 %v474_v62, %v1171_v16  ;;  %v708_v49 = vmul.f32 %v1332_v41, %v689_v40  ;;  %v453_v25 = vpop.xlane.xlu0 %452  ;;  %vm791_vm4 = vcmp.lt.s32.totalorder %v1360_v4, 320 }
 0x19b   : > { %v649_v50 = vsub.f32 1.5, %v648_v60  ;;  %v723_v11 = vadd.f32 %v1347_v48, %v704_v63 }
 0x19c   : > { %v1366_v22 = vpop.eup %993  ;;  %v609_v12 = vsub.f32 1.5, %v608_v5  ;;  %v1370_v13 = vadd.f32 1e-05, %v502_v21  ;;  %v727_v56 = vadd.f32 %v1347_v48, %v708_v49 }
 0x19d   : > { %v1372_v14 = vpop.eup %995  ;;  %v650_v17 = vmul.f32 %v1319_v27, %v649_v50  ;;  %v536_v0 = vmul.f32 %v1366_v22, %v1321_v3  ;;  %v739_v57 = vmax.f32 %v723_v11, 0.0  ;;  %vm542_vm5 = vweird.f32 %v1366_v22 }
 0x19e   : > { %v610_v18 = vmul.f32 %v1323_v31, %v609_v12  ;;  %v576_v24 = vmul.f32 %v1372_v14, %v1327_v39  ;;  %v743_v6 = vmax.f32 %v727_v56, 0.0  ;;  %997 = vrsqrt.f32 %v1370_v13  ;;  %vm543_vm9 = vmor %vm541_vm8, %vm542_vm5 }
 0x19f   : > { %v654_v30 = vsel %vm653_vm2, %v1319_v27, %v650_v17  ;;  %v537_v1 = vmul.f32 %v1366_v22, %v536_v0  ;;  %v838_v36 = vmul.f32 %v948_v35, %v739_v57  ;;  %v956_v27 = vsel %vm798_vm12, 1.0, %v1026_v15 }
 0x1a0   : > { %v697_v2 = vmul.f32 %v654_v30, %v1190_v29  ;;  %v614_v8 = vsel %vm613_vm3, %v1323_v31, %v610_v18  ;;  %v577_v38 = vmul.f32 %v1372_v14, %v576_v24  ;;  %v842_v43 = vmul.f32 %v1311_v59, %v743_v6 }
 0x1a1   : > { %v693_v47 = vmul.f32 %v614_v8, %v1193_v32  ;;  %v538_v44 = vmul.f32 0.5, %v537_v1  ;;  %854 = vst.msk [vmem:[%s1388_s11] sm:$0xff] %vm341_vm1, %v838_v36  ;;  %v495_v31 = vmul.f32 %v453_v25, %v1171_v16  ;;  %v477_v35 = vpop.xlane.xlu2 %476  ;;  %vm582_vm7 = vweird.f32 %v1372_v14  ;;  %v465_v3 = vpop.xlane.xlu1 %464 }
 0x1a2   : > { %v716_v51 = vmul.f32 %v1332_v41, %v697_v2  ;;  %v578_v29 = vmul.f32 0.5, %v577_v38  ;;  %858 = vst.msk [vmem:[%s1388_s11 + $0x20] sm:$0xff] %vm341_vm1, %v842_v43  ;;  %v503_v62 = vmul.f32 %v477_v35, %v1171_v16  ;;  %vm583_vm11 = vmor %vm581_vm10, %vm582_vm7  ;;  %v766_v11 = vadd.s32 72, %v1288_v33  ;;  %v480_v0 = vpop.xlane.xlu0 %479 }
 0x1a3   : > { %v712_v59 = vmul.f32 %v1332_v41, %v693_v47  ;;  %v539_v52 = vsub.f32 1.5, %v538_v44  ;;  %v1414_v55 = vadd.f32 1e-05, %v495_v31  ;;  %v499_v6 = vmul.f32 %v465_v3, %v1171_v16 }
 0x1a4   : > { %v735_v32 = vadd.f32 %v1347_v48, %v716_v51  ;;  %v579_v26 = vsub.f32 1.5, %v578_v29  ;;  %v998_v40 = vpop.eup %997  ;;  %v1430_v24 = vadd.f32 1e-05, %v503_v62  ;;  %v759_v1 = vadd.s32 16, %v1288_v33 }
 0x1a5   : > { %v731_v60 = vadd.f32 %v1347_v48, %v712_v59  ;;  %v540_v61 = vmul.f32 %v1366_v22, %v539_v52  ;;  %v616_v21 = vmul.f32 %v998_v40, %v1370_v13  ;;  %999 = vrsqrt.f32 %v1414_v55 }
 0x1a6   : > { %v751_v63 = vmax.f32 %v735_v32, 0.0  ;;  %v580_v5 = vmul.f32 %v1372_v14, %v579_v26  ;;  %1001 = vrsqrt.f32 %v1430_v24  ;;  %vm622_vm12 = vweird.f32 %v998_v40 }
 0x1a7   : > { %v747_v49 = vmax.f32 %v731_v60, 0.0  ;;  %v544_v50 = vsel %vm543_vm9, %v1366_v22, %v540_v61  ;;  %v617_v39 = vmul.f32 %v998_v40, %v616_v21  ;;  %v949_v22 = vsel %vm791_vm4, 1.0, %v1026_v15 }
 0x1a8   : > { %v850_v12 = vmul.f32 %v1352_v53, %v751_v63  ;;  %v686_v56 = vmul.f32 %v544_v50, %v1206_v45  ;;  %v584_v17 = vsel %vm583_vm11, %v1372_v14, %v580_v5  ;;  %v953_v45 = vsel %vm795_vm6, 1.0, %v1026_v15 }
 0x1a9   : > { %v846_v57 = vmul.f32 %v956_v27, %v747_v49  ;;  %v690_v18 = vmul.f32 %v584_v17, %v1209_v46  ;;  %v618_v53 = vmul.f32 0.5, %v617_v39  ;;  %v783_v46 = vadd.s32 %v1295_v54, %v766_v11  ;;  %v456_v26 = vpop.xlane.xlu1 %455 }
 0x1aa   : > { %866 = vst.msk [vmem:[%s1388_s11 + $0x60] sm:$0xff] %vm341_vm1, %v850_v12  ;;  %v705_v25 = vmul.f32 %v1332_v41, %v686_v56  ;;  %vm621_vm13 = vweird.f32 %v1370_v13  ;;  %v1450_v2 = vadd.f32 1e-05, %v499_v6  ;;  %v504_v8 = vmul.f32 %v480_v0, %v1171_v16  ;;  %v489_v63 = vpop.xlane.xlu0 %488 }
 0x1ab   : > { %862 = vst.msk [vmem:[%s1388_s11 + $0x40] sm:$0xff] %vm341_vm1, %v846_v57  ;;  %v709_v14 = vmul.f32 %v1332_v41, %v690_v18  ;;  %v619_v4 = vsub.f32 1.5, %v618_v53  ;;  %v1000_v36 = vpop.eup %999  ;;  %v767_v47 = vadd.s32 80, %v1288_v33  ;;  %vm799_vm14 = vcmp.lt.s32.totalorder %v783_v46, 320  ;;  %vm623_vm15 = vmor %vm621_vm13, %vm622_vm12 }
 0x1ac   : > { %v724_v30 = vadd.f32 %v1347_v48, %v705_v25  ;;  %v546_v27 = vmul.f32 %v1000_v36, %v1414_v55  ;;  %1003 = vrsqrt.f32 %v1450_v2  ;;  %v1456_v31 = vadd.f32 1e-05, %v504_v8  ;;  %v1002_v35 = vpop.eup %1001 }
 0x1ad   : > { %v728_v19 = vadd.f32 %v1347_v48, %v709_v14  ;;  %v620_v43 = vmul.f32 %v998_v40, %v619_v4  ;;  %v776_v32 = vadd.s32 %v1295_v54, %v759_v1  ;;  %v784_v61 = vadd.s32 %v1295_v54, %v767_v47 }
 0x1ae   : > { %v740_v38 = vmax.f32 %v724_v30, 0.0  ;;  %v547_v13 = vmul.f32 %v1000_v36, %v546_v27  ;;  %v626_v62 = vmul.f32 %v1002_v35, %v1430_v24  ;;  %1005 = vrsqrt.f32 %v1456_v31 }
 0x1af   : > { %v744_v44 = vmax.f32 %v728_v19, 0.0  ;;  %v624_v29 = vsel %vm623_vm15, %v998_v40, %v620_v43  ;;  %v957_v40 = vsel %vm799_vm14, 1.0, %v1026_v15  ;;  %vm552_vm0 = vweird.f32 %v1000_v36 }
 0x1b0   : > { %v839_v51 = vmul.f32 %v949_v22, %v740_v38  ;;  %v694_v52 = vmul.f32 %v624_v29, %v1223_v58  ;;  %v548_v60 = vmul.f32 0.5, %v547_v13  ;;  %v763_v58 = vadd.s32 48, %v1288_v33 }
 0x1b1   : > { %v843_v59 = vmul.f32 %v953_v45, %v744_v44  ;;  %v627_v49 = vmul.f32 %v1002_v35, %v626_v62  ;;  %v496_v50 = vmul.f32 %v456_v26, %v1171_v16  ;;  %vm792_vm2 = vcmp.lt.s32.totalorder %v776_v32, 320  ;;  %v468_v19 = vpop.xlane.xlu2 %467 }
 0x1b2   : > { %855 = vst.msk [vmem:[%s1388_s11 + $0x8] sm:$0xff] %vm341_vm1, %v839_v51  ;;  %v713_v5 = vmul.f32 %v1332_v41, %v694_v52  ;;  %v549_v21 = vsub.f32 1.5, %v548_v60  ;;  %v1004_v11 = vpop.eup %1003  ;;  %vm551_vm3 = vweird.f32 %v1414_v55  ;;  %v507_v12 = vmul.f32 %v489_v63, %v1171_v16 }
 0x1b3   : > { %859 = vst.msk [vmem:[%s1388_s11 + $0x28] sm:$0xff] %vm341_vm1, %v843_v59  ;;  %vm800_vm4 = vcmp.lt.s32.totalorder %v784_v61, 320  ;;  %v628_v17 = vmul.f32 0.5, %v627_v49  ;;  %v586_v39 = vmul.f32 %v1004_v11, %v1450_v2  ;;  %vm553_vm5 = vmor %vm551_vm3, %vm552_vm0  ;;  %vm632_vm6 = vweird.f32 %v1002_v35  ;;  %v492_v59 = vpop.xlane.xlu1 %491 }
 0x1b4   : > { %v732_v3 = vadd.f32 %v1347_v48, %v713_v5  ;;  %v550_v56 = vmul.f32 %v1000_v36, %v549_v21  ;;  %v780_v57 = vadd.s32 %v1295_v54, %v763_v58  ;;  %v1477_v18 = vadd.f32 1e-05, %v496_v50  ;;  %v1006_v55 = vpop.eup %1005 }
 0x1b5   : > { %v629_v25 = vsub.f32 1.5, %v628_v17  ;;  %v587_v45 = vmul.f32 %v1004_v11, %v586_v39  ;;  %v1479_v53 = vadd.f32 1e-05, %v507_v12  ;;  %vm631_vm7 = vweird.f32 %v1430_v24 }
 0x1b6   : > { %v748_v0 = vmax.f32 %v732_v3, 0.0  ;;  %v554_v22 = vsel %vm553_vm5, %v1000_v36, %v550_v56  ;;  %1007 = vrsqrt.f32 %v1477_v18  ;;  %v768_v4 = vadd.s32 88, %v1288_v33  ;;  %vm633_vm8 = vmor %vm631_vm7, %vm632_vm6 }
 0x1b7   : > { %v687_v46 = vmul.f32 %v554_v22, %v1220_v42  ;;  %v630_v6 = vmul.f32 %v1002_v35, %v629_v25  ;;  %v588_v30 = vmul.f32 0.5, %v587_v45  ;;  %v636_v1 = vmul.f32 %v1006_v55, %v1456_v31 }
 0x1b8   : > { %v847_v14 = vmul.f32 %v957_v40, %v748_v0  ;;  %v950_v36 = vsel %vm792_vm2, 1.0, %v1026_v15  ;;  %v958_v42 = vsel %vm800_vm4, 1.0, %v1026_v15  ;;  %1009 = vrsqrt.f32 %v1479_v53 }
 0x1b9   : > { %v706_v8 = vmul.f32 %v1332_v41, %v687_v46  ;;  %v634_v24 = vsel %vm633_vm8, %v1002_v35, %v630_v6  ;;  %v589_v38 = vsub.f32 1.5, %v588_v30  ;;  %vm592_vm9 = vweird.f32 %v1004_v11 }
 0x1ba   : > { %863 = vst.msk [vmem:[%s1388_s11 + $0x48] sm:$0xff] %vm341_vm1, %v847_v14  ;;  %v637_v43 = vmul.f32 %v1006_v55, %v636_v1  ;;  %v695_v47 = vmul.f32 %v634_v24, %v1238_v9  ;;  %vm796_vm10 = vcmp.lt.s32.totalorder %v780_v57, 320  ;;  %v500_v44 = vmul.f32 %v468_v19, %v1171_v16  ;;  %v486_v14 = vpop.xlane.xlu2 %485 }
 0x1bb   : > { %v725_v27 = vadd.f32 %v1347_v48, %v706_v8  ;;  %v590_v51 = vmul.f32 %v1004_v11, %v589_v38  ;;  %vm591_vm11 = vweird.f32 %v1450_v2  ;;  %v785_v29 = vadd.s32 %v1295_v54, %v768_v4 }
 0x1bc   : > { %v638_v13 = vmul.f32 0.5, %v637_v43  ;;  %v1008_v52 = vpop.eup %1007  ;;  %v714_v35 = vmul.f32 %v1332_v41, %v695_v47  ;;  %vm593_vm12 = vmor %vm591_vm11, %vm592_vm9  ;;  %v760_v26 = vadd.s32 24, %v1288_v33  ;;  %v1502_v60 = vadd.f32 1e-05, %v500_v44 }
 0x1bd   : > { %v741_v32 = vmax.f32 %v725_v27, 0.0  ;;  %v594_v9 = vsel %vm593_vm12, %v1004_v11, %v590_v51  ;;  %vm642_vm13 = vweird.f32 %v1006_v55  ;;  %v556_v62 = vmul.f32 %v1008_v52, %v1477_v18 }
 0x1be   : > { %v639_v61 = vsub.f32 1.5, %v638_v13  ;;  %v1010_v2 = vpop.eup %1009  ;;  %v733_v40 = vadd.f32 %v1347_v48, %v714_v35  ;;  %v691_v5 = vmul.f32 %v594_v9, %v1241_v10  ;;  %v508_v58 = vmul.f32 %v492_v59, %v1171_v16 }
 0x1bf   : > { %v840_v63 = vmul.f32 %v950_v36, %v741_v32  ;;  %vm641_vm14 = vweird.f32 %v1456_v31  ;;  %v557_v49 = vmul.f32 %v1008_v52, %v556_v62  ;;  %v666_v50 = vmul.f32 %v1010_v2, %v1479_v53 }
 0x1c0   : > { %v640_v21 = vmul.f32 %v1006_v55, %v639_v61  ;;  %v749_v11 = vmax.f32 %v733_v40, 0.0  ;;  %v954_v3 = vsel %vm796_vm10, 1.0, %v1026_v15  ;;  %v710_v12 = vmul.f32 %v1332_v41, %v691_v5  ;;  %vm643_vm15 = vmor %vm641_vm14, %vm642_vm13 }
 0x1c1   : > { %856 = vst.msk [vmem:[%s1388_s11 + $0x10] sm:$0xff] %vm341_vm1, %v840_v63  ;;  %1011 = vrsqrt.f32 %v1502_v60  ;;  %vm801_vm0 = vcmp.lt.s32.totalorder %v785_v29, 320  ;;  %v558_v56 = vmul.f32 0.5, %v557_v49  ;;  %v667_v31 = vmul.f32 %v1010_v2, %v666_v50 }
 0x1c2   : > { %v644_v10 = vsel %vm643_vm15, %v1006_v55, %v640_v21  ;;  %v848_v17 = vmul.f32 %v958_v42, %v749_v11  ;;  %v729_v39 = vadd.f32 %v1347_v48, %v710_v12  ;;  %v1519_v22 = vadd.f32 1e-05, %v508_v58 }
 0x1c3   : > { %v696_v0 = vmul.f32 %v644_v10, %v1235_v7  ;;  %v777_v57 = vadd.s32 %v1295_v54, %v760_v26  ;;  %v559_v25 = vsub.f32 1.5, %v558_v56  ;;  %vm562_vm2 = vweird.f32 %v1008_v52 }
 0x1c4   : > { %v668_v45 = vmul.f32 0.5, %v667_v31  ;;  %864 = vst.msk [vmem:[%s1388_s11 + $0x50] sm:$0xff] %vm341_vm1, %v848_v17  ;;  %v745_v46 = vmax.f32 %v729_v39, 0.0  ;;  %v771_v6 = vadd.s32 112, %v1288_v33  ;;  %1013 = vrsqrt.f32 %v1519_v22 }
 0x1c5   : > { %v715_v55 = vmul.f32 %v1332_v41, %v696_v0  ;;  %v560_v30 = vmul.f32 %v1008_v52, %v559_v25  ;;  %vm561_vm3 = vweird.f32 %v1477_v18  ;;  %vm672_vm4 = vweird.f32 %v1010_v2 }
 0x1c6   : > { %v669_v7 = vsub.f32 1.5, %v668_v45  ;;  %v844_v1 = vmul.f32 %v954_v3, %v745_v46  ;;  %v959_v19 = vsel %vm801_vm0, 1.0, %v1026_v15  ;;  %vm563_vm5 = vmor %vm561_vm3, %vm562_vm2  ;;  %v506_v8 = vmul.f32 %v486_v14, %v1171_v16 }
 0x1c7   : > { %v1012_v4 = vpop.eup %1011  ;;  %v734_v36 = vadd.f32 %v1347_v48, %v715_v55  ;;  %v564_v42 = vsel %vm563_vm5, %v1008_v52, %v560_v30  ;;  %vm671_vm6 = vweird.f32 %v1479_v53  ;;  %v788_v27 = vadd.s32 %v1295_v54, %v771_v6 }
 0x1c8   : > { %v670_v24 = vmul.f32 %v1010_v2, %v669_v7  ;;  %v596_v38 = vmul.f32 %v1012_v4, %v1502_v60  ;;  %860 = vst.msk [vmem:[%s1388_s11 + $0x30] sm:$0xff] %vm341_vm1, %v844_v1  ;;  %v688_v43 = vmul.f32 %v564_v42, %v1258_v23  ;;  %vm673_vm7 = vmor %vm671_vm6, %vm672_vm4  ;;  %v1540_v47 = vadd.f32 1e-05, %v506_v8 }
 0x1c9   : > { %v750_v18 = vmax.f32 %v734_v36, 0.0  ;;  %vm793_vm8 = vcmp.lt.s32.totalorder %v777_v57, 320  ;;  %vm804_vm9 = vcmp.lt.s32.totalorder %v788_v27, 320  ;;  %v764_v35 = vadd.s32 56, %v1288_v33 }
 0x1ca   : > { %v674_v16 = vsel %vm673_vm7, %v1010_v2, %v670_v24  ;;  %v597_v44 = vmul.f32 %v1012_v4, %v596_v38  ;;  %v1014_v51 = vpop.eup %1013  ;;  %v707_v53 = vmul.f32 %v1332_v41, %v688_v43  ;;  %1015 = vrsqrt.f32 %v1540_v47 }
 0x1cb   : > { %v849_v29 = vmul.f32 %v959_v19, %v750_v18  ;;  %v699_v13 = vmul.f32 %v674_v16, %v1255_v20  ;;  %v676_v23 = vmul.f32 %v1014_v51, %v1519_v22  ;;  %v951_v26 = vsel %vm793_vm8, 1.0, %v1026_v15 }
 0x1cc   : > { %v598_v59 = vmul.f32 0.5, %v597_v44  ;;  %v726_v52 = vadd.f32 %v1347_v48, %v707_v53  ;;  %vm602_vm10 = vweird.f32 %v1012_v4  ;;  %v962_v2 = vsel %vm804_vm9, 1.0, %v1026_v15 }
 0x1cd   : > { %865 = vst.msk [vmem:[%s1388_s11 + $0x58] sm:$0xff] %vm341_vm1, %v849_v29  ;;  %v718_v32 = vmul.f32 %v1332_v41, %v699_v13  ;;  %v677_v61 = vmul.f32 %v1014_v51, %v676_v23  ;;  %vm601_vm11 = vweird.f32 %v1502_v60  ;;  %v781_v49 = vadd.s32 %v1295_v54, %v764_v35 }
 0x1ce   : > { %v599_v9 = vsub.f32 1.5, %v598_v59  ;;  %v742_v20 = vmax.f32 %v726_v52, 0.0  ;;  %vm603_vm12 = vmor %vm601_vm11, %vm602_vm10  ;;  %v772_v50 = vadd.s32 120, %v1288_v33  ;;  %vm682_vm13 = vweird.f32 %v1014_v51 }
 0x1cf   : > { %v737_v62 = vadd.f32 %v1347_v48, %v718_v32  ;;  %v678_v40 = vmul.f32 0.5, %v677_v61  ;;  %vm681_vm14 = vweird.f32 %v1519_v22  ;;  %vm797_vm15 = vcmp.lt.s32.totalorder %v781_v49, 320 }
 0x1d0   : > { %v600_v63 = vmul.f32 %v1012_v4, %v599_v9  ;;  %v1016_v5 = vpop.eup %1015  ;;  %v841_v58 = vmul.f32 %v951_v26, %v742_v20  ;;  %v789_v39 = vadd.s32 %v1295_v54, %v772_v50  ;;  %vm683_vm0 = vmor %vm681_vm14, %vm682_vm13  ;;  %v955_v22 = vsel %vm797_vm15, 1.0, %v1026_v15 }
 0x1d1   : > { %v753_v21 = vmax.f32 %v737_v62, 0.0  ;;  %v679_v3 = vsub.f32 1.5, %v678_v40  ;;  %v656_v12 = vmul.f32 %v1016_v5, %v1540_v47  ;;  %vm662_vm2 = vweird.f32 %v1016_v5 }
 0x1d2   : > { %v604_v11 = vsel %vm603_vm12, %v1012_v4, %v600_v63  ;;  %857 = vst.msk [vmem:[%s1388_s11 + $0x18] sm:$0xff] %vm341_vm1, %v841_v58  ;;  %vm805_vm3 = vcmp.lt.s32.totalorder %v789_v39, 320  ;;  %vm661_vm4 = vweird.f32 %v1540_v47 }
 0x1d3   : > { %v852_v10 = vmul.f32 %v962_v2, %v753_v21  ;;  %v692_v60 = vmul.f32 %v604_v11, %v1274_v34  ;;  %v680_v56 = vmul.f32 %v1014_v51, %v679_v3  ;;  %v657_v31 = vmul.f32 %v1016_v5, %v656_v12  ;;  %vm663_vm5 = vmor %vm661_vm4, %vm662_vm2 }
 0x1d4   : > { %v770_v34 = vadd.s32 104, %v1288_v33  ;;  %v963_v33 = vsel %vm805_vm3, 1.0, %v1026_v15 }
 0x1d5   : > { %868 = vst.msk [vmem:[%s1388_s11 + $0x70] sm:$0xff] %vm341_vm1, %v852_v10  ;;  %v711_v17 = vmul.f32 %v1332_v41, %v692_v60  ;;  %v684_v0 = vsel %vm683_vm0, %v1014_v51, %v680_v56  ;;  %v658_v57 = vmul.f32 0.5, %v657_v31 }
 0x1d6   : > { %v700_v45 = vmul.f32 %v684_v0, %v1266_v28  ;;  %v787_v28 = vadd.s32 %v1295_v54, %v770_v34 }
 0x1d7   : > { %v730_v25 = vadd.f32 %v1347_v48, %v711_v17  ;;  %v659_v14 = vsub.f32 1.5, %v658_v57 }
 0x1d8   : > { %v719_v55 = vmul.f32 %v1332_v41, %v700_v45  ;;  %vm803_vm6 = vcmp.lt.s32.totalorder %v787_v28, 320 }
 0x1d9   : > { %v746_v46 = vmax.f32 %v730_v25, 0.0  ;;  %v660_v6 = vmul.f32 %v1016_v5, %v659_v14  ;;  %v961_v24 = vsel %vm803_vm6, 1.0, %v1026_v15 }
 0x1da   : > { %v738_v7 = vadd.f32 %v1347_v48, %v719_v55 }
 0x1db   : > { %v845_v30 = vmul.f32 %v955_v22, %v746_v46  ;;  %v664_v4 = vsel %vm663_vm5, %v1016_v5, %v660_v6 }
 0x1dc   : > { %v754_v1 = vmax.f32 %v738_v7, 0.0  ;;  %v698_v19 = vmul.f32 %v664_v4, %v1281_v37 }
 0x1dd   : > { %861 = vst.msk [vmem:[%s1388_s11 + $0x38] sm:$0xff] %vm341_vm1, %v845_v30 }
 0x1de   : > { %v853_v36 = vmul.f32 %v963_v33, %v754_v1  ;;  %v717_v8 = vmul.f32 %v1332_v41, %v698_v19 }
 0x1e0   : > { %869 = vst.msk [vmem:[%s1388_s11 + $0x78] sm:$0xff] %vm341_vm1, %v853_v36  ;;  %v736_v42 = vadd.f32 %v1347_v48, %v717_v8 }
 0x1e2   : > { %v752_v54 = vmax.f32 %v736_v42, 0.0 }
 0x1e4   : > { %v851_v38 = vmul.f32 %v961_v24, %v752_v54 }
 0x1e6   : > { %867 = vst.msk [vmem:[%s1388_s11 + $0x68] sm:$0xff] %vm341_vm1, %v851_v38 }
 0x1e7 PF: > { %s15_s18 = sadd.s32 1, %s1023_s18  }
 0x1e8   : > { %p12_p4 = scmp.ge.s32.totalorder %s15_s18, 5  }
 0x1ea   :  { %14 = sbr.rel (!%p12_p4) target bundleno = 1 (0x1), region = 70 }

// kernel: sgformer_forward.7
= control target key start
LH: loop header
LB: loop body
LE: loop exit
PB: predicated region body
PF: predicated region fallthrough
CT: control target
= control target key end

     0   :  { %12 = vsyncpa [#allocation3], 0  ;;  %s1851_s0 = inlined_call_operand.vmem [shape: f32[384,32], index: 0, kind: input, shape index: {}]   ;;  %s1852_s1 = inlined_call_operand.vmem [shape: bf16[32,96], index: 1, kind: input, shape index: {}]   ;;  %s1853_s2 = inlined_call_operand.vmem [shape: f32[1,96], index: 2, kind: input, shape index: {}]   ;;  %s1854_s3 = inlined_call_operand.vmem [shape: f32[32,32], index: 3, kind: output, shape index: {0}]   ;;  %s1855_s4 = inlined_call_operand.vmem [shape: f32[1,32], index: 4, kind: output, shape index: {1}]   ;;  %s1856_s5 = inlined_call_operand.hbm [shape: f32[1,1], index: 5, kind: output, shape index: {2}]   ;;  %s1857_s6 = inlined_call_operand.hbm [shape: f32[1,1], index: 6, kind: output, shape index: {3}]  }
   0x1   :  { %13 = vsyncpa [#allocation5], 0  ;;  %s1293_s21 = smov 0  }
   0x2 LB: > { %s1299_s22 = sadd.s32 4294967295, %s1250_s21   ;;  %p1008_p0 = scmp.ge.s32.totalorder %s1250_s21, 1  ;;  %s1250_s21 = sphi %s1293_s21, %s19_s21  }
   0x3   : > { %p202_p1 = scmp.lt.s32.totalorder %s1250_s21, 4 }
   0x5   : > { %p203_p2 = pnand %p1008_p0, %p202_p1 }
   0x6   : > { %s1009_s23 = sshll.u32 (!%p203_p2), %s1299_s22, 4  ;;  %p1011_p4 = scmp.ne.s32.totalorder (!%p203_p2), %s1299_s22, 0 }
   0x7   : > { %206 = sbr.rel (%p203_p2) target bundleno = 846 (0x34e), region = 32  ;;  %p228_p3 = scmp.lt.s32.totalorder (!%p203_p2), %s1009_s23, 47 }
   0xc   : > { %s1859_s23 = smov (!%p228_p3, %s1009_s23), 47  ;;  %237 = sbr.rel (%p1011_p4) target bundleno = 25 (0x19), region = 36 }
   0xd   : > { %s1010_s24 = sshll.u32 %s1859_s23, 3 }
   0xe   : > { %s1307_s27 = scalar_lea.vmem %s1851_s0, %s1010_s24 }
  0x11   : > { %vm238_vm0 = vcmask 261120   ;;  %v1252_v0 = vmov 0.0   ;;  %vm243_vm1 = vcmask 253952   ;;  %vm245_vm2 = vcmask 0  }
  0x12   : > { %239 = vst.msk [vmem:[%s1854_s3] sm:$0xff] %vm238_vm0, %v1252_v0 }
  0x13   : > { %240 = vst.msk [vmem:[%s1854_s3 + $0x8] sm:$0xff] %vm238_vm0, %v1252_v0 }
  0x14   : > { %241 = vst.msk [vmem:[%s1854_s3 + $0x10] sm:$0xff] %vm238_vm0, %v1252_v0 }
  0x15   : > { %242 = vst.msk [vmem:[%s1854_s3 + $0x18] sm:$0xff] %vm238_vm0, %v1252_v0 }
  0x16   : > { %244 = vst.msk [vmem:[%s1855_s4] sm:$0x1] %vm243_vm1, %v1252_v0 }
  0x17   : > { %246 = vst.msk [vmem:[#allocation2] sm:$0x1] %vm245_vm2, %v1252_v0 }
  0x18   : > { %247 = vst.msk [vmem:[#allocation4] sm:$0x1] %vm245_vm2, %v1252_v0 }
  0x19 PF: > { %v1052_v1 = vld [vmem:[%s1852_s1 + $0x8] sm:$0xff]  ;;  %v1051_v2 = vld [vmem:[%s1852_s1] sm:$0xff]  ;;  %v254_v5 = vld [vmem:[%s1307_s27 + $0x30] sm:$0xff]  ;;  %vm292_vm3 = vcmask 261120   ;;  %v367_v27 = vlaneseq  ;;  %s1028_s18 = sshll.u32 %s1299_s22, 7  ;;  %v1253_v39 = vmov 0.0  }
  0x1a   : > { %v248_v3 = vld [vmem:[%s1307_s27] sm:$0xff]  ;;  %323 = vmatpush.bf16.msra.mxu0 %v1052_v1  ;;  %1053 = vmatpush.bf16.msra.mxu2 %v1052_v1  ;;  %v249_v4 = vld [vmem:[%s1307_s27 + $0x8] sm:$0xff]  ;;  %v255_v6 = vld [vmem:[%s1307_s27 + $0x38] sm:$0xff]  ;;  %v1358_v29 = vstv %s1028_s18  ;;  %vm876_vm9 = vcmask 523520   ;;  %s1254_s23 = smov 96   ;;  %s1255_s24 = smov 64  }
  0x1b   : > { %1054 = vmatpush.bf16.msra.mxu3 %v1052_v1  ;;  %v260_v7 = vld [vmem:[%s1307_s27 + $0x60] sm:$0xff]  ;;  %v261_v8 = vld [vmem:[%s1307_s27 + $0x68] sm:$0xff]  ;;  %v264_v9 = vpack.c.bf16 %v249_v4, %v248_v3  ;;  %v267_v10 = vpack.c.bf16 %v255_v6, %v254_v5  ;;  %v250_v12 = vld [vmem:[%s1307_s27 + $0x10] sm:$0xff]  ;;  %v1356_v28 = vshrl.u32 %v367_v27, 7  ;;  %p1081_p5 = scmp.eq.s32.totalorder %s1299_s22, 2  ;;  %s1256_s29 = smov [#allocation2]  }
  0x1c   : > { %v270_v11 = vpack.c.bf16 %v261_v8, %v260_v7  ;;  %v251_v13 = vld [vmem:[%s1307_s27 + $0x18] sm:$0xff]  ;;  %v256_v14 = vld [vmem:[%s1307_s27 + $0x40] sm:$0xff]  ;;  %v257_v15 = vld [vmem:[%s1307_s27 + $0x48] sm:$0xff]  ;;  %s933_s30 = sshll.u32 %s1256_s29, 4  ;;  %s935_s9 = sshll.u32 %s1856_s5, 4  ;;  %s934_s30 = int_to_ptr.vmem [resolvable:$true] %s933_s30  ;;  %s936_s9 = int_to_ptr.hbm [resolvable:$true] %s935_s9 }
  0x1d   : > { %v262_v16 = vld [vmem:[%s1307_s27 + $0x70] sm:$0xff]  ;;  %v263_v17 = vld [vmem:[%s1307_s27 + $0x78] sm:$0xff]  ;;  %v265_v18 = vpack.c.bf16 %v251_v13, %v250_v12  ;;  %v268_v19 = vpack.c.bf16 %v257_v15, %v256_v14  ;;  %v252_v21 = vld [vmem:[%s1307_s27 + $0x20] sm:$0xff]  ;;  %v385_v30 = vadd.s32 %v1358_v29, %v1356_v28  ;;  %v374_v31 = vadd.s32 48, %v1356_v28  ;;  %s947_s12 = sshll.u32 %s1857_s6, 4  ;;  %s1257_s13 = smov [#allocation4]   ;;  %s948_s12 = int_to_ptr.hbm [resolvable:$true] %s947_s12 }
  0x1e   : > { %324 = vmatpush.bf16.msra.mxu0 %v1051_v2  ;;  %1055 = vmatpush.bf16.msra.mxu2 %v1051_v2  ;;  %v271_v20 = vpack.c.bf16 %v263_v17, %v262_v16  ;;  %v253_v22 = vld [vmem:[%s1307_s27 + $0x28] sm:$0xff]  ;;  %v258_v23 = vld [vmem:[%s1307_s27 + $0x50] sm:$0xff]  ;;  %v259_v24 = vld [vmem:[%s1307_s27 + $0x58] sm:$0xff]  ;;  %v369_v33 = vadd.s32 8, %v1356_v28  ;;  %v376_v35 = vadd.s32 64, %v1356_v28  ;;  %v372_v36 = vadd.s32 32, %v1356_v28 }
  0x1f   : > { %1056 = vmatpush.bf16.msra.mxu3 %v1051_v2  ;;  %v266_v25 = vpack.c.bf16 %v253_v22, %v252_v21  ;;  %v269_v26 = vpack.c.bf16 %v259_v24, %v258_v23  ;;  %v1366_v32 = vld [vmem:[%s1853_s2] ss:$0 sm:$0xff]  ;;  %vm401_vm4 = vcmp.lt.s32.totalorder %v385_v30, 320  ;;  %v391_v34 = vadd.s32 %v1358_v29, %v374_v31  ;;  %s945_s14 = sshll.u32 %s1257_s13, 4  ;;  %s946_s14 = int_to_ptr.vmem [resolvable:$true] %s945_s14 }
  0x20   : > { %v380_v37 = vadd.s32 96, %v1356_v28  ;;  %v1029_v40 = vsel %vm401_vm4, 1.0, %v1253_v39  ;;  %v393_v41 = vadd.s32 %v1358_v29, %v376_v35  ;;  %v389_v42 = vadd.s32 %v1358_v29, %v372_v36 }
  0x21   : > { %1020 = vmatmul.msk.bf16.vlgmr.msra.gmra.mxu0 %vm292_vm3, %v264_v9  ;;  %1023 = vmatmul.msk.bf16.vlgmr.msra.gmra.mxu2 %vm292_vm3, %v267_v10  ;;  %v386_v44 = vadd.s32 %v1358_v29, %v369_v33  ;;  %vm407_vm5 = vcmp.lt.s32.totalorder %v391_v34, 320  ;;  %v375_v45 = vadd.s32 56, %v1356_v28  ;;  %v381_v50 = vadd.s32 104, %v1356_v28 }
  0x22   : > { %1026 = vmatmul.msk.bf16.vlgmr.msra.gmra.mxu3 %vm292_vm3, %v270_v11  ;;  %vm409_vm6 = vcmp.lt.s32.totalorder %v393_v41, 320  ;;  %vm405_vm7 = vcmp.lt.s32.totalorder %v389_v42, 320  ;;  %v397_v47 = vadd.s32 %v1358_v29, %v380_v37  ;;  %v370_v52 = vadd.s32 16, %v1356_v28 }
  0x23   : > { %v1383_v48 = vsel %vm409_vm6, 1.0, %v1253_v39  ;;  %v1386_v49 = vsel %vm405_vm7, 1.0, %v1253_v39  ;;  %vm402_vm8 = vcmp.lt.s32.totalorder %v386_v44, 320  ;;  %v1035_v54 = vsel %vm407_vm5, 1.0, %v1253_v39 }
  0x24   : > { %v392_v55 = vadd.s32 %v1358_v29, %v375_v45  ;;  %v377_v56 = vadd.s32 72, %v1356_v28  ;;  %v373_v57 = vadd.s32 40, %v1356_v28  ;;  %vm413_vm10 = vcmp.lt.s32.totalorder %v397_v47, 320 }
  0x25   : > { %v1030_v62 = vsel %vm402_vm8, 1.0, %v1253_v39  ;;  %v398_v63 = vadd.s32 %v1358_v29, %v381_v50  ;;  %v387_v5 = vadd.s32 %v1358_v29, %v370_v52  ;;  %v1041_v6 = vsel %vm413_vm10, 1.0, %v1253_v39 }
  0x26   : > { %v394_v0 = vadd.s32 %v1358_v29, %v377_v56  ;;  %v390_v1 = vadd.s32 %v1358_v29, %v373_v57  ;;  %vm408_vm11 = vcmp.lt.s32.totalorder %v392_v55, 320  ;;  %v371_v14 = vadd.s32 24, %v1356_v28 }
  0x27   : > { %vm414_vm14 = vcmp.lt.s32.totalorder %v398_v63, 320  ;;  %vm403_vm15 = vcmp.lt.s32.totalorder %v387_v5, 320  ;;  %v1036_v17 = vsel %vm408_vm11, 1.0, %v1253_v39  ;;  %v379_v35 = vadd.s32 88, %v1356_v28 }
  0x28   : > { %vm410_vm12 = vcmp.lt.s32.totalorder %v394_v0, 320  ;;  %vm406_vm13 = vcmp.lt.s32.totalorder %v390_v1, 320  ;;  %v1042_v21 = vsel %vm414_vm14, 1.0, %v1253_v39  ;;  %v1031_v24 = vsel %vm403_vm15, 1.0, %v1253_v39 }
  0x29   : > { %v1419_v10 = vsel %vm410_vm12, 1.0, %v1253_v39  ;;  %v1422_v11 = vsel %vm406_vm13, 1.0, %v1253_v39  ;;  %v388_v31 = vadd.s32 %v1358_v29, %v371_v14  ;;  %vm919_vm6 = vcmask 253952  }
  0x2a   : > { %vm552_vm7 = vcmask 0  }
  0x2b   : > { %vm404_vm1 = vcmp.lt.s32.totalorder %v388_v31, 320 }
  0x31   : > { %1021 = vmatmul.msk.bf16.gmra.mxu0 %vm292_vm3, %v265_v18  ;;  %1024 = vmatmul.msk.bf16.gmra.mxu2 %vm292_vm3, %v268_v19 }
  0x32   : > { %1027 = vmatmul.msk.bf16.gmra.mxu3 %vm292_vm3, %v271_v20 }
  0x41   : > { %1022 = vmatmul.msk.bf16.gmra.mxu0 %vm292_vm3, %v266_v25  ;;  %1025 = vmatmul.msk.bf16.gmra.mxu2 %vm292_vm3, %v269_v26  ;;  %v378_v25 = vadd.s32 80, %v1356_v28 }
  0x43   : > { %v395_v34 = vadd.s32 %v1358_v29, %v378_v25 }
  0x45   : > { %vm411_vm0 = vcmp.lt.s32.totalorder %v395_v34, 320 }
  0x46   : > { %v1039_v41 = vsel %vm411_vm0, 1.0, %v1253_v39 }
  0x9e   : > { %v326_v38 = vpop.f32.mrf.mxu0 }
  0x9f   : > { %v327_v43 = vadd.f32 %v1366_v32, %v326_v38  ;;  %v396_v38 = vadd.s32 %v1358_v29, %v379_v35 }
  0xa1   : > { %v1379_v46 = vmul.f32 %v1029_v40, %v327_v43  ;;  %vm412_vm2 = vcmp.lt.s32.totalorder %v396_v38, 320 }
  0xa2   : > { %v1040_v47 = vsel %vm412_vm2, 1.0, %v1253_v39 }
  0xa3   : > { %v466_v51 = vmul.f32 %v1379_v46, %v1379_v46  ;;  %v877_v7 = vsel %vm876_vm9, %v1379_v46, 0.0 }
  0xa4   : > { %v341_v53 = vpop.f32.mrf.mxu2 }
  0xa5   : > { %v342_v58 = vadd.f32 %v1366_v32, %v341_v53  ;;  %v356_v59 = vpop.f32.mrf.mxu3  ;;  %v482_v60 = vsel %vm292_vm3, %v466_v51, 0.0  ;;  %571 = vrot.lane.b32.xlu1 %v466_v51, %s1254_s23  ;;  %v1032_v53 = vsel %vm404_vm1, 1.0, %v1253_v39 }
  0xa6   : > { %v328_v61 = vpop.f32.mrf.mxu0  ;;  %483 = vadd.xlane.f32.xlu0 %v482_v60  ;;  %v357_v3 = vadd.f32 %v1366_v32, %v356_v59  ;;  %v383_v60 = vadd.s32 120, %v1356_v28 }
  0xa7   : > { %v1404_v2 = vmul.f32 %v1035_v54, %v342_v58  ;;  %v329_v4 = vadd.f32 %v1366_v32, %v328_v61  ;;  %v382_v54 = vadd.s32 112, %v1356_v28 }
  0xa8   : > { %v1424_v12 = vmul.f32 %v1041_v6, %v357_v3  ;;  %v400_v0 = vadd.s32 %v1358_v29, %v383_v60 }
  0xa9   : > { %v1412_v8 = vmul.f32 %v1030_v62, %v329_v4  ;;  %v1416_v9 = vmul.f32 %v1404_v2, %v1404_v2  ;;  %v399_v59 = vadd.s32 %v1358_v29, %v382_v54 }
  0xaa   : > { %v1445_v30 = vmul.f32 %v1424_v12, %v1424_v12  ;;  %vm416_vm5 = vcmp.lt.s32.totalorder %v400_v0, 320 }
  0xab   : > { %v878_v13 = vsel %vm876_vm9, %v1412_v8, 0.0  ;;  %583 = vrot.lane.b32.xlu2 %v1416_v9, %s1254_s23  ;;  %v1164_v18 = vpack.i.bf16 %v1379_v46, %v1412_v8  ;;  %v1099_v58 = vpack.i.bf16 %v1412_v8, %v1379_v46  ;;  %v1488_v62 = vmul.f32 %v1412_v8, %v1412_v8 }
  0xac   : > { %v879_v15 = vadd.f32 %v878_v13, %v877_v7  ;;  %v343_v16 = vpop.f32.mrf.mxu2  ;;  %vm415_vm4 = vcmp.lt.s32.totalorder %v399_v59, 320  ;;  %v1044_v13 = vsel %vm416_vm5, 1.0, %v1253_v39 }
  0xad   : > { %v344_v19 = vadd.f32 %v1366_v32, %v343_v16  ;;  %v358_v20 = vpop.f32.mrf.mxu3  ;;  %v1043_v1 = vsel %vm415_vm4, 1.0, %v1253_v39 }
  0xae   : > { %v359_v22 = vadd.f32 %v1366_v32, %v358_v20  ;;  %v331_v23 = vpop.f32.mrf.mxu0 }
  0xaf   : > { %v1440_v26 = vmul.f32 %v1036_v17, %v344_v19  ;;  %v332_v27 = vadd.f32 %v1366_v32, %v331_v23 }
  0xb0   : > { %v1448_v33 = vmul.f32 %v1042_v21, %v359_v22 }
  0xb1   : > { %v1452_v36 = vmul.f32 %v1031_v24, %v332_v27  ;;  %v1456_v37 = vmul.f32 %v1440_v26, %v1440_v26  ;;  %v1149_v51 = vpack.i.bf16 %v1404_v2, %v1440_v26  ;;  %v1104_v21 = vpack.i.bf16 %v1440_v26, %v1404_v2 }
  0xb2   : > { %v1129_v44 = vpack.i.bf16 %v1424_v12, %v1448_v33  ;;  %v1134_v55 = vpack.i.bf16 %v1448_v33, %v1424_v12  ;;  %v1492_v63 = vmul.f32 %v1448_v33, %v1448_v33 }
  0xb3   : > { %v880_v40 = vsel %vm876_vm9, %v1452_v36, 0.0  ;;  %595 = vrot.lane.b32.xlu2 %v1445_v30, %s1254_s23  ;;  %585 = vrot.lane.b32.xlu1 %v1456_v37, %s1254_s23 }
  0xb4   : > { %v881_v42 = vadd.f32 %v880_v40, %v879_v15  ;;  %v346_v43 = vpop.f32.mrf.mxu2  ;;  %v888_v40 = vsel %vm876_vm9, %v1404_v2, 0.0 }
  0xb5   : > { %v347_v45 = vadd.f32 %v1366_v32, %v346_v43  ;;  %v361_v50 = vpop.f32.mrf.mxu3 }
  0xb6   : > { %v333_v52 = vpop.f32.mrf.mxu0 }
  0xb7   : > { %v334_v56 = vadd.f32 %v1366_v32, %v333_v52  ;;  %v1478_v57 = vmul.f32 %v1383_v48, %v347_v45  ;;  %v362_v48 = vadd.f32 %v1366_v32, %v361_v50 }
  0xb9   : > { %v1484_v61 = vmul.f32 %v1032_v53, %v334_v56  ;;  %v1504_v5 = vmul.f32 %v1043_v1, %v362_v48  ;;  %v892_v43 = vsel %vm876_vm9, %v1478_v57, 0.0  ;;  %v900_v48 = vsel %vm876_vm9, %v1424_v12, 0.0 }
  0xba   : > { %1100 = vrot.lane.b32.xlu0 %v1099_v58, %s1254_s23  ;;  %v902_v1 = vsel %vm876_vm9, %v1448_v33, 0.0 }
  0xbb   : > { %v882_v28 = vsel %vm876_vm9, %v1484_v61, 0.0  ;;  %573 = vrot.lane.b32.xlu2 %v1488_v62, %s1254_s23  ;;  %597 = vrot.lane.b32.xlu1 %v1492_v63, %s1254_s23  ;;  %v1154_v6 = vpack.i.bf16 %v1452_v36, %v1484_v61 }
  0xbc   : > { %v883_v3 = vadd.f32 %v882_v28, %v881_v42  ;;  %v348_v4 = vpop.f32.mrf.mxu2 }
  0xbd   : > { %v349_v29 = vadd.f32 %v1366_v32, %v348_v4  ;;  %v363_v7 = vpop.f32.mrf.mxu3 }
  0xbe   : > { %v336_v14 = vpop.f32.mrf.mxu0  ;;  %v364_v15 = vadd.f32 %v1366_v32, %v363_v7 }
  0xbf   : > { %v337_v16 = vadd.f32 %v1366_v32, %v336_v14  ;;  %v1513_v17 = vmul.f32 %v1419_v10, %v349_v29 }
  0xc0   : > { %v1515_v19 = vmul.f32 %v1044_v13, %v364_v15  ;;  %v500_v15 = vsel %vm292_vm3, %v1416_v9, 0.0 }
  0xc1   : > { %v1518_v20 = vmul.f32 %v1386_v49, %v337_v16  ;;  %v1109_v49 = vpack.i.bf16 %v1484_v61, %v1452_v36  ;;  %v894_v52 = vsel %vm876_vm9, %v1513_v17, 0.0  ;;  %v503_v16 = vsel %vm292_vm3, %v1456_v37, 0.0 }
  0xc2   : > { %v1139_v28 = vpack.i.bf16 %v1515_v19, %v1504_v5  ;;  %v906_v29 = vsel %vm876_vm9, %v1515_v19, 0.0  ;;  %v1124_v7 = vpack.i.bf16 %v1504_v5, %v1515_v19  ;;  %v485_v37 = vsel %vm292_vm3, %v1488_v62, 0.0 }
  0xc3   : > { %1105 = vrot.lane.b32.xlu2 %v1104_v21, %s1254_s23  ;;  %v884_v24 = vsel %vm876_vm9, %v1518_v20, 0.0  ;;  %v518_v21 = vsel %vm292_vm3, %v1445_v30, 0.0  ;;  %v470_v62 = vmul.f32 %v1518_v20, %v1518_v20 }
  0xc4   : > { %v351_v22 = vpop.f32.mrf.mxu2  ;;  %v885_v31 = vadd.f32 %v884_v24, %v883_v3  ;;  %v904_v3 = vsel %vm876_vm9, %v1504_v5, 0.0  ;;  %v469_v24 = vmul.f32 %v1484_v61, %v1484_v61 }
  0xc5   : > { %v352_v39 = vadd.f32 %v1366_v32, %v351_v22  ;;  %v521_v22 = vsel %vm292_vm3, %v1492_v63, 0.0  ;;  %v480_v63 = vmul.f32 %v1504_v5, %v1504_v5 }
  0xc6   : > { %v338_v23 = vpop.f32.mrf.mxu0 }
  0xc7   : > { %v339_v10 = vadd.f32 %v1366_v32, %v338_v23  ;;  %v1527_v25 = vmul.f32 %v1039_v41, %v352_v39  ;;  %v474_v39 = vmul.f32 %v1478_v57, %v1478_v57  ;;  %v468_v23 = vmul.f32 %v1452_v36, %v1452_v36 }
  0xc9   : > { %v1530_v27 = vmul.f32 %v1422_v11, %v339_v10  ;;  %v890_v11 = vsel %vm876_vm9, %v1440_v26, 0.0  ;;  %v896_v54 = vsel %vm876_vm9, %v1527_v25, 0.0  ;;  %v506_v9 = vsel %vm292_vm3, %v474_v39, 0.0 }
  0xca   : > { %v488_v30 = vsel %vm292_vm3, %v468_v23, 0.0  ;;  %v524_v10 = vsel %vm292_vm3, %v480_v63, 0.0 }
  0xcb   : > { %v886_v34 = vsel %vm876_vm9, %v1530_v27, 0.0  ;;  %1110 = vrot.lane.b32.xlu2 %v1109_v49, %s1254_s23  ;;  %v491_v49 = vsel %vm292_vm3, %v469_v24, 0.0  ;;  %v1159_v36 = vpack.i.bf16 %v1518_v20, %v1530_v27  ;;  %v471_v5 = vmul.f32 %v1530_v27, %v1530_v27 }
  0xcc   : > { %v887_v35 = vadd.f32 %v886_v34, %v885_v31  ;;  %v353_v38 = vpop.f32.mrf.mxu2  ;;  %v475_v31 = vmul.f32 %v1513_v17, %v1513_v17  ;;  %v476_v34 = vmul.f32 %v1527_v25, %v1527_v25 }
  0xcd   : > { %v354_v41 = vadd.f32 %v1366_v32, %v353_v38  ;;  %v1119_v32 = vpack.i.bf16 %v1513_v17, %v1478_v57  ;;  %v497_v8 = vsel %vm292_vm3, %v471_v5, 0.0 }
  0xce   : > { %v889_v42 = vadd.f32 %v888_v40, %v887_v35  ;;  %v481_v35 = vmul.f32 %v1515_v19, %v1515_v19  ;;  %v509_v40 = vsel %vm292_vm3, %v475_v31, 0.0 }
  0xcf   : > { %v1544_v45 = vmul.f32 %v1040_v47, %v354_v41  ;;  %v1144_v47 = vpack.i.bf16 %v1478_v57, %v1513_v17 }
  0xd0   : > { %v891_v50 = vadd.f32 %v890_v11, %v889_v42  ;;  %v527_v11 = vsel %vm292_vm3, %v481_v35, 0.0 }
  0xd1   : > { %v898_v58 = vsel %vm876_vm9, %v1544_v45, 0.0  ;;  %v477_v46 = vmul.f32 %v1544_v45, %v1544_v45 }
  0xd2   : > { %v893_v53 = vadd.f32 %v892_v43, %v891_v50  ;;  %v494_v43 = vsel %vm292_vm3, %v470_v62, 0.0  ;;  %v512_v50 = vsel %vm292_vm3, %v476_v34, 0.0 }
  0xd4   : > { %v895_v56 = vadd.f32 %v894_v52, %v893_v53 }
  0xd6   : > { %v897_v59 = vadd.f32 %v896_v54, %v895_v56 }
  0xd8   : > { %v899_v60 = vadd.f32 %v898_v58, %v897_v59  ;;  %v1114_v59 = vpack.i.bf16 %v1530_v27, %v1518_v20 }
  0xda   : > { %v901_v0 = vadd.f32 %v900_v48, %v899_v60 }
  0xdc   : > { %v903_v4 = vadd.f32 %v902_v1, %v901_v0 }
  0xde   : > { %v905_v13 = vadd.f32 %v904_v3, %v903_v4 }
  0xe0   : > { %v1568_v14 = vadd.f32 %v906_v29, %v905_v13 }
  0xe4   : > { %501 = vadd.xlane.f32.xlu0 %v500_v15 }
  0xe5   : > { %504 = vadd.xlane.f32.xlu1 %v503_v16 }
  0xec   : > { %519 = vadd.xlane.f32.xlu0 %v518_v21  ;;  %v1169_v21 = vpack.i.bf16 %v1544_v45, %v1527_v25 }
  0xed   : > { %522 = vadd.xlane.f32.xlu1 %v521_v22  ;;  %v908_v22 = vrot.slane %v1568_v14, 4 }
  0xf4   : > { %507 = vadd.xlane.f32.xlu2 %v506_v9  ;;  %486 = vadd.xlane.f32.xlu0 %v485_v37  ;;  %v1174_v9 = vpack.i.bf16 %v1527_v25, %v1544_v45 }
  0xf5   : > { %489 = vadd.xlane.f32.xlu1 %v488_v30 }
  0xfc   : > { %525 = vadd.xlane.f32.xlu2 %v524_v10 }
  0xfd   : > { %492 = vadd.xlane.f32.xlu1 %v491_v49 }
 0x105   : > { %v584_v48 = vpop.permute.xlu2 %583 }
 0x106   : > { %v637_v57 = vsel %vm292_vm3, %v584_v48, 0.0 }
 0x108   : > { %575 = vrot.lane.b32.xlu0 %v468_v23, %s1254_s23  ;;  %v909_v23 = vadd.f32 %v908_v22, %v1568_v14 }
 0x10a   : > { %v910_v37 = vrot.slane %v909_v23, 2 }
 0x10c   : > { %v911_v10 = vadd.f32 %v910_v37, %v909_v23 }
 0x10d   : > { %v596_v4 = vpop.permute.xlu2 %595 }
 0x10e   : > { %v912_v49 = vrot.slane %v911_v10, 1 }
 0x110   : > { %587 = vrot.lane.b32.xlu0 %v474_v39, %s1254_s23 }
 0x114   : > { %577 = vrot.lane.b32.xlu2 %v469_v24, %s1254_s23 }
 0x115   : > { %v574_v15 = vpop.permute.xlu2 %573 }
 0x116   : > { %579 = vrot.lane.b32.xlu1 %v470_v62, %s1254_s23  ;;  %v622_v62 = vsel %vm292_vm3, %v574_v15, 0.0 }
 0x117   : > { %v572_v38 = vpop.permute.xlu1 %571 }
 0x118   : > { %599 = vrot.lane.b32.xlu0 %v480_v63, %s1254_s23  ;;  %v619_v56 = vsel %vm292_vm3, %v572_v38, 0.0 }
 0x119   : > { %v484_v41 = vpop.xlane.xlu0 %483 }
 0x11c   : > { %589 = vrot.lane.b32.xlu2 %v475_v31, %s1254_s23 }
 0x11e   : > { %591 = vrot.lane.b32.xlu1 %v476_v34, %s1254_s23  ;;  %v913_v34 = vadd.f32 %v912_v49, %v911_v10 }
 0x124   : > { %601 = vrot.lane.b32.xlu2 %v481_v35, %s1254_s23 }
 0x125   : > { %v1610_v42 = vpop.permute.xlu1 %585 }
 0x126   : > { %1140 = vrot.lane.b32.xlu1 %v1139_v28, %s1254_s23 }
 0x12c   : > { %v1615_v52 = vpop.permute.xlu0 %1100 }
 0x12d   : > { %v1617_v53 = vpop.permute.xlu1 %597 }
 0x142   : > { %510 = vadd.xlane.f32.xlu0 %v509_v40 }
 0x14a   : > { %528 = vadd.xlane.f32.xlu0 %v527_v11 }
 0x14d   : > { %495 = vadd.xlane.f32.xlu2 %v494_v43 }
 0x150   : > { %513 = vadd.xlane.f32.xlu1 %v512_v50  ;;  %v515_v50 = vsel %vm292_vm3, %v477_v46, 0.0 }
 0x157   : > { %v1619_v54 = vpop.xlane.xlu0 %501 }
 0x158   : > { %620 = vadd.xlane.f32.xlu1 %v619_v56  ;;  %v1622_v58 = vpop.xlane.xlu1 %504 }
 0x15e   : > { %1115 = vrot.lane.b32.xlu0 %v1114_v59, %s1254_s23 }
 0x15f   : > { %v1627_v60 = vpop.xlane.xlu0 %519 }
 0x160   : > { %v1629_v0 = vpop.xlane.xlu1 %522 }
 0x165   : > { %1130 = vrot.lane.b32.xlu2 %v1129_v44, %s1255_s24 }
 0x166   : > { %1120 = vrot.lane.b32.xlu0 %v1119_v32, %s1254_s23  ;;  %v655_v32 = vsel %vm292_vm3, %v596_v4, 0.0 }
 0x167   : > { %v487_v28 = vpop.xlane.xlu0 %486 }
 0x168   : > { %v530_v1 = vadd.f32 %v487_v28, %v484_v41  ;;  %v490_v3 = vpop.xlane.xlu1 %489 }
 0x16a   : > { %v531_v29 = vadd.f32 %v530_v1, %v490_v3 }
 0x16d   : > { %1150 = vrot.lane.b32.xlu2 %v1149_v51, %s1255_s24  ;;  %v1656_v51 = vpop.permute.xlu2 %1105 }
 0x16e   : > { %1125 = vrot.lane.b32.xlu0 %v1124_v7, %s1255_s24 }
 0x170   : > { %v493_v44 = vpop.xlane.xlu1 %492 }
 0x171   : > { %v532_v13 = vadd.f32 %v531_v29, %v493_v44 }
 0x175   : > { %1155 = vrot.lane.b32.xlu2 %v1154_v6, %s1255_s24  ;;  %v1665_v61 = vpop.permute.xlu2 %1110 }
 0x176   : > { %1135 = vrot.lane.b32.xlu0 %v1134_v55, %s1254_s23 }
 0x17a   : > { %v576_v2 = vpop.permute.xlu0 %575 }
 0x17b   : > { %v625_v26 = vsel %vm292_vm3, %v576_v2, 0.0 }
 0x17c   : > { %626 = vadd.xlane.f32.xlu1 %v625_v26 }
 0x17d   : > { %v1672_v55 = vpop.xlane.xlu2 %507 }
 0x17e   : > { %1145 = vrot.lane.b32.xlu0 %v1144_v47, %s1255_s24 }
 0x182   : > { %v588_v6 = vpop.permute.xlu0 %587 }
 0x183   : > { %v643_v17 = vsel %vm292_vm3, %v588_v6, 0.0 }
 0x185   : > { %v1679_v19 = vpop.xlane.xlu2 %525 }
 0x186   : > { %1160 = vrot.lane.b32.xlu0 %v1159_v36, %s1255_s24 }
 0x188   : > { %v580_v12 = vpop.permute.xlu1 %579 }
 0x189   : > { %v631_v33 = vsel %vm292_vm3, %v580_v12, 0.0  ;;  %v1102_v12 = vunpack.i.l.bf16 %v1615_v52 }
 0x18a   : > { %632 = vadd.xlane.f32.xlu1 %v631_v33  ;;  %v600_v7 = vpop.permute.xlu0 %599 }
 0x18b   : > { %v661_v16 = vsel %vm292_vm3, %v600_v7, 0.0 }
 0x18d   : > { %v578_v27 = vpop.permute.xlu2 %577 }
 0x18e   : > { %1165 = vrot.lane.b32.xlu0 %v1164_v18, %s1255_s24  ;;  %v628_v25 = vsel %vm292_vm3, %v578_v27, 0.0 }
 0x190   : > { %v592_v18 = vpop.permute.xlu1 %591 }
 0x191   : > { %v649_v20 = vsel %vm292_vm3, %v592_v18, 0.0  ;;  %v1112_v18 = vunpack.i.l.bf16 %v1665_v61 }
 0x192   : > { %638 = vadd.xlane.f32.xlu1 %v637_v57  ;;  %v640_v57 = vsel %vm292_vm3, %v1610_v42, 0.0 }
 0x195   : > { %v1687_v47 = vpop.permute.xlu2 %589 }
 0x196   : > { %581 = vrot.lane.b32.xlu0 %v471_v5, %s1254_s23  ;;  %v1103_v5 = vunpack.i.h.bf16 %v1615_v52 }
 0x198   : > { %v1713_v38 = vpop.permute.xlu1 %1140 }
 0x19a   : > { %644 = vadd.xlane.f32.xlu1 %v643_v17 }
 0x19d   : > { %v1694_v39 = vpop.permute.xlu2 %601 }
 0x19e   : > { %498 = vadd.xlane.f32.xlu2 %v497_v8  ;;  %593 = vrot.lane.b32.xlu0 %v477_v46, %s1254_s23  ;;  %v646_v46 = vsel %vm292_vm3, %v1687_v47, 0.0  ;;  %v1113_v47 = vunpack.i.h.bf16 %v1665_v61 }
 0x1a2   : > { %650 = vadd.xlane.f32.xlu1 %v649_v20 }
 0x1aa   : > { %656 = vadd.xlane.f32.xlu1 %v655_v32 }
 0x1b2   : > { %662 = vadd.xlane.f32.xlu1 %v661_v16 }
 0x1b5   : > { %v1699_v30 = vpop.xlane.xlu0 %510 }
 0x1b6   : > { %1170 = vrot.lane.b32.xlu2 %v1169_v21, %s1254_s23  ;;  %v658_v21 = vsel %vm292_vm3, %v1617_v53, 0.0  ;;  %v664_v53 = vsel %vm292_vm3, %v1694_v39, 0.0 }
 0x1bd   : > { %v1705_v31 = vpop.xlane.xlu0 %528 }
 0x1be   : > { %1175 = vrot.lane.b32.xlu2 %v1174_v9, %s1255_s24 }
 0x1c0   : > { %v496_v63 = vpop.xlane.xlu2 %495 }
 0x1c1   : > { %v1702_v24 = vadd.f32 %v532_v13, %v496_v63 }
 0x1c3   : > { %v1718_v48 = vpop.xlane.xlu1 %513 }
 0x1c8   : > { %623 = vadd.xlane.f32.xlu0 %v622_v62  ;;  %v1131_v41 = vpop.permute.xlu2 %1130 }
 0x1c9   : > { %v1132_v43 = vunpack.i.l.bf16 %v1131_v41  ;;  %v1133_v56 = vunpack.i.h.bf16 %v1131_v41 }
 0x1cb   : > { %915 = vrot.lane.b32.xlu1 %v913_v34, %s1254_s23  ;;  %v1720_v1 = vpop.xlane.xlu1 %620 }
 0x1d0   : > { %629 = vadd.xlane.f32.xlu0 %v628_v25  ;;  %v1709_v45 = vpop.permute.xlu0 %1115  ;;  %v1151_v29 = vpop.permute.xlu2 %1150 }
 0x1d1   : > { %v1152_v22 = vunpack.i.l.bf16 %v1151_v29  ;;  %v1153_v9 = vunpack.i.h.bf16 %v1151_v29  ;;  %v1117_v61 = vunpack.i.l.bf16 %v1709_v45  ;;  %v1118_v25 = vunpack.i.h.bf16 %v1709_v45 }
 0x1d8   : > { %v1711_v14 = vpop.permute.xlu0 %1120  ;;  %v1728_v2 = vpop.permute.xlu2 %1155 }
 0x1d9   : > { %v1157_v10 = vunpack.i.l.bf16 %v1728_v2  ;;  %v1158_v49 = vunpack.i.h.bf16 %v1728_v2 }
 0x1e0   : > { %v1126_v35 = vpop.permute.xlu0 %1125 }
 0x1e1   : > { %v1127_v40 = vunpack.i.l.bf16 %v1126_v35  ;;  %v1128_v11 = vunpack.i.h.bf16 %v1126_v35  ;;  %v875_v35 = vld [vmem:[%s1855_s4] sm:$0x1] }
 0x1e3   : > { %838 = vmatpush.msra.mxu1 %v1127_v40  ;;  %1057 = vmatpush.msrb.mxu3 %v1127_v40 }
 0x1e5   : > { %839 = vmatpush.msra.mxu1 %v1128_v11  ;;  %1058 = vmatpush.msrb.mxu3 %v1128_v11  ;;  %v1107_v11 = vunpack.i.l.bf16 %v1656_v51 }
 0x1e7   : > { %516 = vadd.xlane.f32.xlu2 %v515_v50  ;;  %840 = vmatpush.msra.mxu1 %v1132_v43 }
 0x1e8   : > { %1059 = vmatpush.msrb.mxu3 %v1132_v43  ;;  %v1716_v59 = vpop.permute.xlu0 %1135  ;;  %v1108_v43 = vunpack.i.h.bf16 %v1656_v51 }
 0x1e9   : > { %841 = vmatpush.msra.mxu1 %v1133_v56 }
 0x1ea   : > { %1060 = vmatpush.msrb.mxu3 %v1133_v56 }
 0x1ef   : > { %v1722_v4 = vpop.xlane.xlu1 %626 }
 0x1f0   : > { %v1146_v28 = vpop.permute.xlu0 %1145 }
 0x1f1   : > { %v1147_v7 = vunpack.i.l.bf16 %v1146_v28  ;;  %v1148_v16 = vunpack.i.h.bf16 %v1146_v28  ;;  %v1122_v28 = vunpack.i.l.bf16 %v1711_v14 }
 0x1f8   : > { %v1161_v3 = vpop.permute.xlu0 %1160 }
 0x1f9   : > { %v1162_v37 = vunpack.i.l.bf16 %v1161_v3  ;;  %v1163_v63 = vunpack.i.h.bf16 %v1161_v3 }
 0x1fd   : > { %v1726_v13 = vpop.xlane.xlu1 %632 }
 0x200   : > { %v1724_v44 = vpop.permute.xlu0 %1165 }
 0x201   : > { %v1167_v34 = vunpack.i.l.bf16 %v1724_v44  ;;  %v1168_v39 = vunpack.i.h.bf16 %v1724_v44  ;;  %v1123_v44 = vunpack.i.h.bf16 %v1711_v14 }
 0x205   : > { %v1731_v36 = vpop.xlane.xlu1 %638 }
 0x208   : > { %v582_v15 = vpop.permute.xlu0 %581 }
 0x209   : > { %v634_v26 = vsel %vm292_vm3, %v582_v15, 0.0 }
 0x20a   : > { %635 = vadd.xlane.f32.xlu0 %v634_v26 }
 0x20d   : > { %v1739_v6 = vpop.xlane.xlu1 %644 }
 0x210   : > { %758 = vxpose.xlu2.b32.start [1/16] (narrow) %v1102_v12, 32  ;;  %v594_v8 = vpop.permute.xlu0 %593 }
 0x211   : > { %v1734_v33 = vpop.xlane.xlu2 %498  ;;  %v652_v20 = vsel %vm292_vm3, %v594_v8, 0.0 }
 0x212   : > { %641 = vadd.xlane.f32.xlu0 %v640_v57  ;;  %v534_v45 = vadd.f32 %v1702_v24, %v1734_v33 }
 0x214   : > { %v535_v50 = vadd.f32 %v534_v45, %v1619_v54  ;;  %v690_v45 = vld [vmem:[%s1854_s3] sm:$0xff] }
 0x215   : > { %v1747_v27 = vpop.xlane.xlu1 %650 }
 0x216   : > { %v536_v56 = vadd.f32 %v535_v50, %v1622_v58 }
 0x218   : > { %759 = vxpose.xlu2.b32.cont [2/16] (narrow) %v1103_v5, 32  ;;  %v537_v3 = vadd.f32 %v536_v56, %v1672_v55  ;;  %v691_v56 = vld [vmem:[%s1854_s3 + $0x8] sm:$0xff] }
 0x219   : > { %v1741_v17 = vpop.permute.xlu2 %1170 }
 0x21a   : > { %647 = vadd.xlane.f32.xlu0 %v646_v46  ;;  %v538_v29 = vadd.f32 %v537_v3, %v1699_v30  ;;  %v1172_v54 = vunpack.i.l.bf16 %v1741_v17  ;;  %v1173_v30 = vunpack.i.h.bf16 %v1741_v17  ;;  %v465_v46 = vld [vmem:[#allocation2] sm:$0x1] }
 0x21c   : > { %v539_v15 = vadd.f32 %v538_v29, %v1718_v48  ;;  %v692_v29 = vld [vmem:[%s1854_s3 + $0x10] sm:$0xff] }
 0x21d   : > { %v1752_v23 = vpop.xlane.xlu1 %656 }
 0x220   : > { %760 = vxpose.xlu2.b32.cont [3/16] (narrow) %v1112_v18, 32 }
 0x221   : > { %v1176_v42 = vpop.permute.xlu2 %1175 }
 0x222   : > { %653 = vadd.xlane.f32.xlu0 %v652_v20  ;;  %v1177_v52 = vunpack.i.l.bf16 %v1176_v42  ;;  %v1178_v32 = vunpack.i.h.bf16 %v1176_v42  ;;  %v1142_v20 = vunpack.i.l.bf16 %v1713_v38 }
 0x224   : > { %842 = vmatpush.msra.mxu1 %v1177_v52  ;;  %1061 = vmatpush.msrb.mxu3 %v1177_v52 }
 0x225   : > { %v1759_v62 = vpop.xlane.xlu1 %662 }
 0x226   : > { %843 = vmatpush.msra.mxu1 %v1178_v32  ;;  %1062 = vmatpush.msrb.mxu3 %v1178_v32 }
 0x228   : > { %844 = vmatpush.msra.mxu1 %v1147_v7  ;;  %1063 = vmatpush.msrb.mxu3 %v1147_v7 }
 0x229   : > { %761 = vxpose.xlu2.b32.cont [4/16] (narrow) %v1113_v47, 32  ;;  %v1143_v47 = vunpack.i.h.bf16 %v1713_v38 }
 0x22a   : > { %659 = vadd.xlane.f32.xlu0 %v658_v21  ;;  %845 = vmatpush.msra.mxu1 %v1148_v16 }
 0x22b   : > { %1064 = vmatpush.msrb.mxu3 %v1148_v16 }
 0x22c   : > { %846 = vmatpush.msra.mxu1 %v1152_v22 }
 0x22d   : > { %1065 = vmatpush.msrb.mxu3 %v1152_v22 }
 0x22e   : > { %847 = vmatpush.msra.mxu1 %v1153_v9 }
 0x22f   : > { %1066 = vmatpush.msrb.mxu3 %v1153_v9 }
 0x230   : > { %848 = vmatpush.msra.mxu1 %v1162_v37 }
 0x231   : > { %1067 = vmatpush.msrb.mxu3 %v1162_v37  ;;  %762 = vxpose.xlu2.b32.cont [5/16] (narrow) %v1117_v61, 32 }
 0x232   : > { %665 = vadd.xlane.f32.xlu0 %v664_v53  ;;  %849 = vmatpush.msra.mxu1 %v1163_v63 }
 0x233   : > { %1068 = vmatpush.msrb.mxu3 %v1163_v63 }
 0x234   : > { %850 = vmatpush.msra.mxu1 %v1157_v10 }
 0x235   : > { %1069 = vmatpush.msrb.mxu3 %v1157_v10 }
 0x236   : > { %851 = vmatpush.msra.mxu1 %v1158_v49 }
 0x237   : > { %1070 = vmatpush.msrb.mxu3 %v1158_v49 }
 0x238   : > { %852 = vmatpush.msra.mxu1 %v1167_v34 }
 0x239   : > { %1071 = vmatpush.msrb.mxu3 %v1167_v34  ;;  %763 = vxpose.xlu2.b32.cont [6/16] (narrow) %v1118_v25, 32 }
 0x23a   : > { %853 = vmatpush.msra.mxu1 %v1168_v39 }
 0x23b   : > { %1072 = vmatpush.msrb.mxu3 %v1168_v39  ;;  %v624_v48 = vpop.xlane.xlu0 %623 }
 0x23c   : > { %v667_v17 = vadd.f32 %v624_v48, %v1720_v1 }
 0x23d   : > { %v916_v40 = vpop.permute.xlu1 %915 }
 0x23e   : > { %v918_v41 = vadd.f32 %v916_v40, %v875_v35  ;;  %v668_v42 = vadd.f32 %v667_v17, %v1722_v4  ;;  %v554_v40 = vld [vmem:[#allocation4] sm:$0x1] }
 0x240   : > { %920 = vst.msk [vmem:[%s1855_s4] sm:$0x1] %vm919_vm6, %v918_v41 }
 0x241   : > { %764 = vxpose.xlu2.b32.cont [7/16] (narrow) %v1107_v11, 32 }
 0x249   : > { %765 = vxpose.xlu2.b32.cont [8/16] (narrow) %v1108_v43, 32 }
 0x251   : > { %766 = vxpose.xlu2.b32.cont [9/16] (narrow) %v1122_v28, 32 }
 0x259   : > { %767 = vxpose.xlu2.b32.cont [10/16] (narrow) %v1123_v44, 32 }
 0x25a   : > { %v517_v24 = vpop.xlane.xlu2 %516 }
 0x25b   : > { %v540_v2 = vadd.f32 %v539_v15, %v517_v24  ;;  %v693_v24 = vld [vmem:[%s1854_s3 + $0x18] sm:$0xff] }
 0x25d   : > { %v541_v51 = vadd.f32 %v540_v2, %v1627_v60  ;;  %v1137_v60 = vunpack.i.l.bf16 %v1716_v59 }
 0x25f   : > { %v542_v58 = vadd.f32 %v541_v51, %v1629_v0 }
 0x261   : > { %v543_v26 = vadd.f32 %v542_v58, %v1679_v19  ;;  %768 = vxpose.xlu2.b32.cont [11/16] (narrow) %v1172_v54, 32  ;;  %v630_v19 = vpop.xlane.xlu0 %629 }
 0x262   : > { %v669_v52 = vadd.f32 %v668_v42, %v630_v19 }
 0x263   : > { %v544_v55 = vadd.f32 %v543_v26, %v1705_v31  ;;  %v1138_v31 = vunpack.i.h.bf16 %v1716_v59 }
 0x264   : > { %v670_v7 = vadd.f32 %v669_v52, %v1726_v13 }
 0x265   : > { %v545_v12 = vrot.slane %v544_v55, 4 }
 0x267   : > { %v546_v14 = vadd.f32 %v545_v12, %v544_v55 }
 0x269   : > { %v547_v33 = vrot.slane %v546_v14, 2  ;;  %769 = vxpose.xlu2.b32.cont [12/16] (narrow) %v1173_v30, 32 }
 0x26b   : > { %v548_v57 = vadd.f32 %v547_v33, %v546_v14 }
 0x26d   : > { %v549_v5 = vrot.slane %v548_v57, 1 }
 0x26f   : > { %v550_v8 = vadd.f32 %v549_v5, %v548_v57 }
 0x271   : > { %770 = vxpose.xlu2.b32.cont [13/16] (narrow) %v1137_v60, 32  ;;  %v551_v0 = vadd.f32 %v550_v8, %v465_v46 }
 0x273   : > { %553 = vst.msk [vmem:[#allocation2] sm:$0x1] %vm552_vm7, %v551_v0 }
 0x274   : > { %1074 = dma.vmem_to_hbm [thread:$0]  (%p1081_p5), %s934_s30, 16, %s936_s9, [#allocation3]  }
 0x279   : > { %771 = vxpose.xlu2.b32.cont [14/16] (narrow) %v1138_v31, 32 }
 0x27d   : > { %v636_v18 = vpop.xlane.xlu0 %635 }
 0x27e   : > { %v671_v16 = vadd.f32 %v670_v7, %v636_v18 }
 0x280   : > { %v672_v21 = vadd.f32 %v671_v16, %v1731_v36 }
 0x281   : > { %772 = vxpose.xlu2.b32.cont [15/16] (narrow) %v1142_v20, 32 }
 0x285   : > { %v642_v32 = vpop.xlane.xlu0 %641 }
 0x286   : > { %v673_v22 = vadd.f32 %v672_v21, %v642_v32 }
 0x288   : > { %v674_v1 = vadd.f32 %v673_v22, %v1739_v6 }
 0x289   : > { %773 = vxpose.xlu2.b32.end [16/16] (narrow) %v1143_v47, 32 }
 0x28d   : > { %v648_v59 = vpop.xlane.xlu0 %647 }
 0x28e   : > { %v675_v9 = vadd.f32 %v674_v1, %v648_v59 }
 0x290   : > { %v676_v61 = vadd.f32 %v675_v9, %v1747_v27 }
 0x295   : > { %v654_v37 = vpop.xlane.xlu0 %653 }
 0x296   : > { %v677_v4 = vadd.f32 %v676_v61, %v654_v37 }
 0x298   : > { %v678_v53 = vadd.f32 %v677_v4, %v1752_v23 }
 0x29d   : > { %v660_v63 = vpop.xlane.xlu0 %659 }
 0x29e   : > { %v679_v10 = vadd.f32 %v678_v53, %v660_v63 }
 0x2a0   : > { %v680_v13 = vadd.f32 %v679_v10, %v1759_v62 }
 0x2a5   : > { %v666_v38 = vpop.xlane.xlu0 %665 }
 0x2a6   : > { %v681_v49 = vadd.f32 %v680_v13, %v666_v38 }
 0x2a8   : > { %v682_v34 = vrot.slane %v681_v49, 4 }
 0x2aa   : > { %v683_v25 = vadd.f32 %v682_v34, %v681_v49  ;;  %v774_v36 = vpop.trf.xlu2 }
 0x2ab   : > { %854 = vmatmul.f32.vlgmr.msra.gmra.mxu1 %v774_v36 }
 0x2ac   : > { %v684_v39 = vrot.slane %v683_v25, 2 }
 0x2ae   : > { %v685_v6 = vadd.f32 %v684_v39, %v683_v25 }
 0x2b0   : > { %v686_v35 = vrot.slane %v685_v6, 1 }
 0x2b2   : > { %v687_v27 = vadd.f32 %v686_v35, %v685_v6  ;;  %v775_v41 = vpop.trf.xlu2 }
 0x2b3   : > { %857 = vmatmul.f32.gmra.mxu1 %v775_v41 }
 0x2b4   : > { %v688_v11 = vadd.f32 %v687_v27, %v554_v40 }
 0x2b6   : > { %689 = vst.msk [vmem:[#allocation4] sm:$0x1] %vm552_vm7, %v688_v11 }
 0x2b7   : > { %1076 = dma.vmem_to_hbm [thread:$0]  (%p1081_p5), %s946_s14, 16, %s948_s12, [#allocation5]  }
 0x2ba   : > { %v776_v23 = vpop.trf.xlu2 }
 0x2bb   : > { %860 = vmatmul.f32.gmra.mxu1 %v776_v23 }
 0x2c2   : > { %v777_v62 = vpop.trf.xlu2 }
 0x2c3   : > { %863 = vmatmul.f32.vlgmr.msrb.gmra.mxu3 %v777_v62 }
 0x328   : > { %v855_v43 = vpop.f32.mrf.mxu1 }
 0x329   : > { %v867_v50 = vadd.f32 %v855_v43, %v690_v45 }
 0x32b   : > { %871 = vst.msk [vmem:[%s1854_s3] sm:$0xff] %vm292_vm3, %v867_v50 }
 0x330   : > { %v858_v28 = vpop.f32.mrf.mxu1 }
 0x331   : > { %v868_v3 = vadd.f32 %v858_v28, %v691_v56 }
 0x333   : > { %872 = vst.msk [vmem:[%s1854_s3 + $0x8] sm:$0xff] %vm292_vm3, %v868_v3 }
 0x338   : > { %v861_v44 = vpop.f32.mrf.mxu1 }
 0x339   : > { %v869_v15 = vadd.f32 %v861_v44, %v692_v29 }
 0x33b   : > { %873 = vst.msk [vmem:[%s1854_s3 + $0x10] sm:$0xff] %vm292_vm3, %v869_v15 }
 0x346   : > { %v864_v2 = vpop.f32.mrf.mxu3 }
 0x347   : > { %v870_v51 = vadd.f32 %v864_v2, %v693_v24 }
 0x349   : > { %874 = vst.msk [vmem:[%s1854_s3 + $0x18] sm:$0xff] %vm292_vm3, %v870_v51 }
 0x34a   : > { %1241 = dma.done.wait (%p1081_p5), [#allocation3], 16  }
 0x34b   : > { %1243 = vsyncadd (%p1081_p5), [#allocation3], 4294967280 }
 0x34c   : > { %1245 = dma.done.wait (%p1081_p5), [#allocation5], 16  }
 0x34d   : > { %1247 = vsyncadd (%p1081_p5), [#allocation5], 4294967280 }
 0x34e PF: > { %s19_s21 = sadd.s32 1, %s1250_s21  }
 0x34f   : > { %p16_p6 = scmp.ge.s32.totalorder %s19_s21, 5  }
 0x351   :  { %18 = sbr.rel (!%p16_p6) target bundleno = 2 (0x2), region = 87 }
 0x356   :  { %972 = vsyncpa [#allocation3], 1 }
 0x357   :  { %974 = vsyncpa [#allocation3 + $0x1], 1 }
 0x358   :  { %975 = vsyncpa [#allocation5], 1 }

// kernel: sgformer_forward.11
= control target key start
LH: loop header
LB: loop body
LE: loop exit
PB: predicated region body
PF: predicated region fallthrough
CT: control target
= control target key end

     0   :  { %9 = vsyncpa [#allocation5], 0  ;;  %s680_s15 = smov 0   ;;  %s760_s0 = inlined_call_operand.vmem [shape: f32[384,32], index: 0, kind: input, shape index: {}]   ;;  %s761_s1 = inlined_call_operand.vmem [shape: s32[384,1], index: 1, kind: input, shape index: {}]   ;;  %s762_s2 = inlined_call_operand.vmem [shape: f32[32,8], index: 2, kind: input, shape index: {}]   ;;  %s763_s3 = inlined_call_operand.vmem [shape: f32[1,8], index: 3, kind: input, shape index: {}]   ;;  %s764_s4 = inlined_call_operand.hbm [shape: f32[2,8], index: 4, kind: output, shape index: {}]  }
   0x1 LB: > { %s686_s16 = sadd.s32 4294967295, %s647_s15   ;;  %p551_p0 = scmp.ge.s32.totalorder %s647_s15, 1  ;;  %s647_s15 = sphi %s680_s15, %s15_s15  }
   0x2   : > { %p170_p1 = scmp.lt.s32.totalorder %s647_s15, 4 }
   0x4   : > { %p171_p2 = pnand %p551_p0, %p170_p1 }
   0x5   : > { %s552_s17 = sshll.u32 (!%p171_p2), %s686_s16, 4  ;;  %p556_p4 = scmp.ne.s32.totalorder (!%p171_p2), %s686_s16, 0 }
   0x6   : > { %174 = sbr.rel (%p171_p2) target bundleno = 712 (0x2c8), region = 36  ;;  %p197_p3 = scmp.lt.s32.totalorder (!%p171_p2), %s552_s17, 47 }
   0xb   : > { %s766_s17 = smov (!%p197_p3, %s552_s17), 47  ;;  %211 = sbr.rel (%p556_p4) target bundleno = 19 (0x13), region = 40 }
   0xc   : > { %s553_s18 = sshll.u32 %s766_s17, 3 }
   0xd   : > { %s694_s21 = scalar_lea.vmem %s760_s0, %s553_s18  ;;  %s699_s24 = scalar_lea.vmem %s761_s1, %s553_s18 }
  0x10   : > { %vm212_vm0 = vcmask 254976   ;;  %vm214_vm1 = vcmask 1024   ;;  %v649_v0 = vmov 0.0  }
  0x11   : > { %213 = vst.msk [vmem:[#allocation2] sm:$0x3] %vm212_vm0, %v649_v0 }
  0x12   : > { %215 = vst.msk [vmem:[#allocation3] sm:$0x3] %vm214_vm1, %v649_v0 }
  0x13 PF: > { %v234_v1 = vld [vmem:[%s699_s24 + $0x10] sm:$0xff]  ;;  %v232_v2 = vld [vmem:[%s699_s24] sm:$0xff]  ;;  %v650_v3 = vmov 0   ;;  %v235_v5 = vld [vmem:[%s699_s24 + $0x18] sm:$0xff]  ;;  %v248_v20 = vlaneseq  ;;  %v651_v23 = vmov 0.0   ;;  %v652_v55 = vmov 1.0  }
  0x14   : > { %603 = vset.pattern.permute.xlu1 %v650_v3  ;;  %602 = vset.pattern.permute.xlu0 %v650_v3  ;;  %v236_v4 = vld [vmem:[%s699_s24 + $0x20] sm:$0xff]  ;;  %v233_v6 = vld [vmem:[%s699_s24 + $0x8] sm:$0xff]  ;;  %v239_v8 = vld [vmem:[%s699_s24 + $0x38] sm:$0xff]  ;;  %p573_p5 = scmp.ne.s32.totalorder %s686_s16, 2 }
  0x15   : > { %257 = vperm.xlu1 %603, %v234_v1   ;;  %251 = vperm.xlu0 %602, %v232_v2   ;;  %v237_v7 = vld [vmem:[%s699_s24 + $0x28] sm:$0xff]  ;;  %v238_v9 = vld [vmem:[%s699_s24 + $0x30] sm:$0xff]  ;;  %v240_v10 = vld [vmem:[%s699_s24 + $0x40] sm:$0xff]  ;;  %v249_v21 = vand.u32 127, %v248_v20 }
  0x16   : > { %604 = vset.pattern.permute.xlu2 %v650_v3  ;;  %v242_v11 = vld [vmem:[%s699_s24 + $0x50] sm:$0xff]  ;;  %v241_v12 = vld [vmem:[%s699_s24 + $0x48] sm:$0xff]  ;;  %v243_v13 = vld [vmem:[%s699_s24 + $0x58] sm:$0xff]  ;;  %403 = vmatpush.msra.mxu1 %v652_v55 }
  0x17   : > { %263 = vperm.xlu2 %604, %v236_v4   ;;  %v245_v14 = vld [vmem:[%s699_s24 + $0x68] sm:$0xff]  ;;  %v244_v15 = vld [vmem:[%s699_s24 + $0x60] sm:$0xff]  ;;  %v246_v16 = vld [vmem:[%s699_s24 + $0x70] sm:$0xff] }
  0x18   : > { %v247_v17 = vld [vmem:[%s699_s24 + $0x78] sm:$0xff]  ;;  %v230_v54 = vld [vmem:[%s694_s21 + $0x70] sm:$0xff]  ;;  %v229_v56 = vld [vmem:[%s694_s21 + $0x68] sm:$0xff]  ;;  %404 = vmatpush.msra.mxu1 %v652_v55 }
  0x19   : > { %v231_v53 = vld [vmem:[%s694_s21 + $0x78] sm:$0xff]  ;;  %v228_v57 = vld [vmem:[%s694_s21 + $0x60] sm:$0xff]  ;;  %v226_v59 = vld [vmem:[%s694_s21 + $0x50] sm:$0xff] }
  0x1a   : > { %379 = vmatpush.msra.mxu0 %v231_v53  ;;  %405 = vmatpush.msra.mxu1 %v652_v55  ;;  %v227_v58 = vld [vmem:[%s694_s21 + $0x58] sm:$0xff]  ;;  %v225_v60 = vld [vmem:[%s694_s21 + $0x48] sm:$0xff]  ;;  %v224_v61 = vld [vmem:[%s694_s21 + $0x40] sm:$0xff] }
  0x1b   : > { %v223_v62 = vld [vmem:[%s694_s21 + $0x38] sm:$0xff]  ;;  %v222_v63 = vld [vmem:[%s694_s21 + $0x30] sm:$0xff]  ;;  %v221_v0 = vld [vmem:[%s694_s21 + $0x28] sm:$0xff] }
  0x1c   : > { %380 = vmatpush.msra.mxu0 %v230_v54  ;;  %406 = vmatpush.msra.mxu1 %v652_v55  ;;  %v220_v1 = vld [vmem:[%s694_s21 + $0x20] sm:$0xff]  ;;  %v219_v2 = vld [vmem:[%s694_s21 + $0x18] sm:$0xff]  ;;  %v218_v3 = vld [vmem:[%s694_s21 + $0x10] sm:$0xff] }
  0x1d   : > { %260 = vperm.xlu1 %603, %v235_v5   ;;  %254 = vperm.xlu0 %602, %v233_v6   ;;  %v217_v4 = vld [vmem:[%s694_s21 + $0x8] sm:$0xff]  ;;  %v216_v5 = vld [vmem:[%s694_s21] sm:$0xff] }
  0x1e   : > { %381 = vmatpush.msra.mxu0 %v229_v56  ;;  %407 = vmatpush.msra.mxu1 %v652_v55 }
  0x1f   : > { %266 = vperm.xlu2 %604, %v237_v7   ;;  %v346_v7 = vld [vmem:[#allocation2] sm:$0x3] }
  0x20   : > { %382 = vmatpush.msra.mxu0 %v228_v57  ;;  %408 = vmatpush.msra.mxu1 %v652_v55 }
  0x22   : > { %383 = vmatpush.msra.mxu0 %v227_v58  ;;  %409 = vmatpush.msra.mxu1 %v652_v55 }
  0x24   : > { %384 = vmatpush.msra.mxu0 %v226_v59  ;;  %410 = vmatpush.msra.mxu1 %v652_v55 }
  0x25   : > { %272 = vperm.xlu1 %603, %v239_v8   ;;  %269 = vperm.xlu0 %602, %v238_v9   ;;  %v402_v8 = vld [vmem:[#allocation3] sm:$0x3] }
  0x26   : > { %385 = vmatpush.msra.mxu0 %v225_v60  ;;  %411 = vmatpush.msra.mxu1 %v652_v55 }
  0x27   : > { %275 = vperm.xlu2 %604, %v240_v10  }
  0x28   : > { %386 = vmatpush.msra.mxu0 %v224_v61  ;;  %412 = vmatpush.msra.mxu1 %v652_v55 }
  0x2a   : > { %387 = vmatpush.msra.mxu0 %v223_v62  ;;  %413 = vmatpush.msra.mxu1 %v652_v55 }
  0x2c   : > { %388 = vmatpush.msra.mxu0 %v222_v63  ;;  %414 = vmatpush.msra.mxu1 %v652_v55 }
  0x2d   : > { %281 = vperm.xlu1 %603, %v242_v11   ;;  %278 = vperm.xlu0 %602, %v241_v12  }
  0x2e   : > { %389 = vmatpush.msra.mxu0 %v221_v0  ;;  %415 = vmatpush.msra.mxu1 %v652_v55 }
  0x2f   : > { %284 = vperm.xlu2 %604, %v243_v13  }
  0x30   : > { %390 = vmatpush.msra.mxu0 %v220_v1  ;;  %416 = vmatpush.msra.mxu1 %v652_v55 }
  0x32   : > { %391 = vmatpush.msra.mxu0 %v219_v2  ;;  %417 = vmatpush.msra.mxu1 %v652_v55 }
  0x34   : > { %392 = vmatpush.msra.mxu0 %v218_v3  ;;  %418 = vmatpush.msra.mxu1 %v652_v55 }
  0x35   : > { %290 = vperm.xlu1 %603, %v245_v14   ;;  %287 = vperm.xlu0 %602, %v244_v15  }
  0x36   : > { %393 = vmatpush.msra.mxu0 %v217_v4 }
  0x37   : > { %293 = vperm.xlu2 %604, %v246_v16  }
  0x38   : > { %394 = vmatpush.msra.mxu0 %v216_v5 }
  0x3d   : > { %296 = vperm.xlu0 %602, %v247_v17  }
  0x71   : > { %v264_v18 = vpop.permute.xlu2 %263 }
  0x72   : > { %vm302_vm11 = vcmp.eq.s32.totalorder %v264_v18, %v249_v21 }
  0x73   : > { %v561_v43 = vsel %vm302_vm11, 1.0, %v651_v23 }
  0x79   : > { %v267_v19 = vpop.permute.xlu2 %266 }
  0x7a   : > { %vm303_vm14 = vcmp.eq.s32.totalorder %v267_v19, %v249_v21 }
  0x7b   : > { %v562_v49 = vsel %vm303_vm14, 1.0, %v651_v23 }
  0x81   : > { %v276_v22 = vpop.permute.xlu2 %275 }
  0x82   : > { %vm306_vm2 = vcmp.eq.s32.totalorder %v276_v22, %v249_v21 }
  0x83   : > { %v565_v24 = vsel %vm306_vm2, 1.0, %v651_v23  ;;  %vm400_vm2 = vcmask 254976  }
  0x87   : > { %v258_v25 = vpop.permute.xlu1 %257  ;;  %v252_v26 = vpop.permute.xlu0 %251 }
  0x88   : > { %vm298_vm3 = vcmp.eq.s32.totalorder %v252_v26, %v249_v21  ;;  %vm300_vm7 = vcmp.eq.s32.totalorder %v258_v25, %v249_v21 }
  0x89   : > { %v557_v27 = vsel %vm298_vm3, 1.0, %v651_v23  ;;  %v285_v28 = vpop.permute.xlu2 %284  ;;  %v559_v35 = vsel %vm300_vm7, 1.0, %v651_v23  ;;  %vm424_vm3 = vcmask 1024  }
  0x8a   : > { %347 = vxpose.xlu1.b32.start [1/16] (narrow) %v557_v27, 8  ;;  %vm309_vm4 = vcmp.eq.s32.totalorder %v285_v28, %v249_v21 }
  0x8b   : > { %v568_v29 = vsel %vm309_vm4, 1.0, %v651_v23 }
  0x8f   : > { %v261_v30 = vpop.permute.xlu1 %260  ;;  %v255_v31 = vpop.permute.xlu0 %254 }
  0x90   : > { %vm299_vm5 = vcmp.eq.s32.totalorder %v255_v31, %v249_v21  ;;  %vm301_vm8 = vcmp.eq.s32.totalorder %v261_v30, %v249_v21 }
  0x91   : > { %v558_v32 = vsel %vm299_vm5, 1.0, %v651_v23  ;;  %v294_v33 = vpop.permute.xlu2 %293  ;;  %v560_v40 = vsel %vm301_vm8, 1.0, %v651_v23 }
  0x92   : > { %348 = vxpose.xlu1.b32.cont [2/16] (narrow) %v558_v32, 8  ;;  %vm312_vm6 = vcmp.eq.s32.totalorder %v294_v33, %v249_v21 }
  0x93   : > { %v718_v34 = vsel %vm312_vm6, 1.0, %v651_v23 }
  0x97   : > { %v273_v36 = vpop.permute.xlu1 %272  ;;  %v270_v37 = vpop.permute.xlu0 %269 }
  0x98   : > { %vm304_vm0 = vcmp.eq.s32.totalorder %v270_v37, %v249_v21  ;;  %vm305_vm1 = vcmp.eq.s32.totalorder %v273_v36, %v249_v21 }
  0x99   : > { %v563_v51 = vsel %vm304_vm0, 1.0, %v651_v23  ;;  %v564_v52 = vsel %vm305_vm1, 1.0, %v651_v23 }
  0x9a   : > { %349 = vxpose.xlu1.b32.cont [3/16] (narrow) %v559_v35, 8 }
  0x9f   : > { %v282_v38 = vpop.permute.xlu1 %281  ;;  %v279_v39 = vpop.permute.xlu0 %278 }
  0xa0   : > { %vm308_vm9 = vcmp.eq.s32.totalorder %v282_v38, %v249_v21  ;;  %vm307_vm10 = vcmp.eq.s32.totalorder %v279_v39, %v249_v21 }
  0xa1   : > { %v567_v41 = vsel %vm308_vm9, 1.0, %v651_v23  ;;  %v566_v42 = vsel %vm307_vm10, 1.0, %v651_v23 }
  0xa2   : > { %350 = vxpose.xlu1.b32.cont [4/16] (narrow) %v560_v40, 8 }
  0xa7   : > { %v291_v44 = vpop.permute.xlu1 %290  ;;  %v288_v45 = vpop.permute.xlu0 %287 }
  0xa8   : > { %vm311_vm12 = vcmp.eq.s32.totalorder %v291_v44, %v249_v21  ;;  %vm310_vm13 = vcmp.eq.s32.totalorder %v288_v45, %v249_v21 }
  0xa9   : > { %v570_v46 = vsel %vm311_vm12, 1.0, %v651_v23  ;;  %v569_v47 = vsel %vm310_vm13, 1.0, %v651_v23 }
  0xaa   : > { %351 = vxpose.xlu1.b32.cont [5/16] (narrow) %v561_v43, 8 }
  0xaf   : > { %v297_v48 = vpop.permute.xlu0 %296 }
  0xb0   : > { %vm313_vm15 = vcmp.eq.s32.totalorder %v297_v48, %v249_v21 }
  0xb1   : > { %v572_v50 = vsel %vm313_vm15, 1.0, %v651_v23 }
  0xb2   : > { %352 = vxpose.xlu1.b32.cont [6/16] (narrow) %v562_v49, 8 }
  0xba   : > { %353 = vxpose.xlu1.b32.cont [7/16] (narrow) %v563_v51, 8 }
  0xc2   : > { %354 = vxpose.xlu1.b32.cont [8/16] (narrow) %v564_v52, 8 }
  0xca   : > { %355 = vxpose.xlu1.b32.cont [9/16] (narrow) %v565_v24, 8 }
  0xd2   : > { %356 = vxpose.xlu1.b32.cont [10/16] (narrow) %v566_v42, 8 }
  0xda   : > { %357 = vxpose.xlu1.b32.cont [11/16] (narrow) %v567_v41, 8 }
  0xe2   : > { %358 = vxpose.xlu1.b32.cont [12/16] (narrow) %v568_v29, 8 }
  0xea   : > { %359 = vxpose.xlu1.b32.cont [13/16] (narrow) %v569_v47, 8 }
  0xf2   : > { %360 = vxpose.xlu1.b32.cont [14/16] (narrow) %v570_v46, 8 }
  0xfa   : > { %361 = vxpose.xlu1.b32.cont [15/16] (narrow) %v718_v34, 8 }
 0x102   : > { %362 = vxpose.xlu1.b32.end [16/16] (narrow) %v572_v50, 8 }
 0x12e   : > { %v363_v6 = vpop.trf.xlu1 }
 0x12f   : > { %395 = vmatmul.f32.vlgmr.msra.gmra.mxu0 %v363_v6  ;;  %419 = vmatmul.f32.vlgmr.msra.gmra.mxu1 %v363_v6 }
 0x1ac   : > { %v396_v9 = vpop.f32.mrf.mxu0  ;;  %v420_v10 = vpop.f32.mrf.mxu1  ;;  %429 = sbr.rel (%p573_p5) target bundleno = 707 (0x2c3), region = 44 }
 0x1ad   : > { %v399_v11 = vadd.f32 %v396_v9, %v346_v7  ;;  %v423_v12 = vadd.f32 %v420_v10, %v402_v8 }
 0x1af   : > { %401 = vst.msk [vmem:[#allocation2] sm:$0x3] %vm400_vm2, %v399_v11 }
 0x1b0   : > { %425 = vst.msk [vmem:[#allocation3] sm:$0x3] %vm424_vm3, %v423_v12 }
 0x1b1   : > { %v653_v14 = vmov 0   ;;  %v457_v16 = vld [vmem:[%s762_s2 + $0x18] sm:$0xff]  ;;  %v456_v17 = vld [vmem:[%s762_s2 + $0x10] sm:$0xff]  ;;  %v455_v18 = vld [vmem:[%s762_s2 + $0x8] sm:$0xff]  ;;  %vm462_vm8 = vcmask 261120   ;;  %vm486_vm9 = vcmask 58368  }
 0x1b2   : > { %605 = vset.pattern.permute.xlu0 %v653_v14  ;;  %478 = vmatpush.msra.mxu0 %v457_v16  ;;  %v454_v19 = vld [vmem:[%s762_s2] sm:$0xff] }
 0x1b3   : > { %v606_v34 = vld [vmem:[%s763_s3] ss:$0 sm:$0xff] }
 0x1b4   : > { %479 = vmatpush.msra.mxu0 %v456_v17 }
 0x1b6   : > { %480 = vmatpush.msra.mxu0 %v455_v18  ;;  %v430_v29 = vld [vmem:[#allocation2] sm:$0x3] }
 0x1b7   : > { %v431_v13 = vld [vmem:[#allocation3] sm:$0x3] }
 0x1b8   : > { %v432_v15 = vmax.f32 %v431_v13, 1.0  ;;  %481 = vmatpush.msra.mxu0 %v454_v19 }
 0x1ba   : > { %435 = vperm.xlu0 %605, %v432_v15  }
 0x22c   : > { %v436_v20 = vpop.permute.xlu0 %435 }
 0x22d   : > { %607 = vrcp.f32 %v436_v20  ;;  %v449_v24 = vand.u32 2147483648, %v436_v20  ;;  %v447_v26 = vand.u32 2147483647, %v436_v20  ;;  %vm443_vm5 = vweird.f32 %v436_v20 }
 0x22f   : > { %v450_v28 = vor.u32 1.1754944e-38, %v449_v24  ;;  %vm448_vm7 = vcmp.eq.f32.partialorder %v447_v26, 8.507059e+37 }
 0x233   : > { %v608_v21 = vpop.eup %607 }
 0x234   : > { %v439_v22 = vmul.f32 %v608_v21, %v436_v20  ;;  %vm444_vm4 = vweird.f32 %v608_v21 }
 0x235   : > { %vm445_vm6 = vmor %vm443_vm5, %vm444_vm4 }
 0x236   : > { %v440_v23 = vsub.f32 1.0, %v439_v22 }
 0x238   : > { %v441_v25 = vmul.f32 %v608_v21, %v440_v23 }
 0x23a   : > { %v442_v27 = vadd.f32 %v608_v21, %v441_v25 }
 0x23c   : > { %v446_v30 = vsel %vm445_vm6, %v608_v21, %v442_v27 }
 0x23d   : > { %v451_v31 = vsel %vm448_vm7, %v450_v28, %v446_v30 }
 0x23e   : > { %v452_v32 = vmul.f32 %v451_v31, %v430_v29 }
 0x240   : > { %v453_v33 = vmul.f32 0.2, %v452_v32 }
 0x242   : > { %574 = vmatmul.msk.f32.vlgmr.msra.gmra.mxu0 %vm462_vm8, %v453_v33 }
 0x2bf   : > { %v483_v35 = vpop.f32.mrf.mxu0 }
 0x2c0   : > { %v484_v36 = vadd.f32 %v606_v34, %v483_v35 }
 0x2c2   : > { %487 = vst.msk [vmem:[#allocation4] sm:$0x3] %vm486_vm9, %v484_v36 }
 0x2c3 PF: > { %p586_p6 = scmp.eq.s32.totalorder %s686_s16, 2  ;;  %s654_s9 = smov [#allocation4]  }
 0x2c4   : > { %s494_s10 = sshll.u32 %s654_s9, 4  ;;  %s496_s13 = sshll.u32 %s764_s4, 4  ;;  %s495_s10 = int_to_ptr.vmem [resolvable:$true] %s494_s10  ;;  %s497_s13 = int_to_ptr.hbm [resolvable:$true] %s496_s13 }
 0x2c5   : > { %583 = dma.vmem_to_hbm [thread:$0]  (%p586_p6), %s495_s10, 32, %s497_s13, [#allocation5]  }
 0x2c6   : > { %642 = dma.done.wait (%p586_p6), [#allocation5], 32  }
 0x2c7   : > { %644 = vsyncadd (%p586_p6), [#allocation5], 4294967264 }
 0x2c8 PF: > { %s15_s15 = sadd.s32 1, %s647_s15  }
 0x2c9   : > { %p12_p7 = scmp.ge.s32.totalorder %s15_s15, 5  }
 0x2cb   :  { %14 = sbr.rel (!%p12_p7) target bundleno = 1 (0x1), region = 74 }
 0x2d0   :  { %510 = vsyncpa [#allocation5], 1 }
 0x2d1   :  { %512 = vsyncpa [#allocation5 + $0x1], 1 }

// kernel: sgformer_forward.8
= control target key start
LH: loop header
LB: loop body
LE: loop exit
PB: predicated region body
PF: predicated region fallthrough
CT: control target
= control target key end

     0   :  { %s1777_s13 = smov 0   ;;  %s2519_s0 = inlined_call_operand.vmem [shape: f32[384,32], index: 0, kind: input, shape index: {}, may-alias: {0,9}]   ;;  %s2520_s1 = inlined_call_operand.vmem [shape: bf16[32,96], index: 1, kind: input, shape index: {}]   ;;  %s2521_s2 = inlined_call_operand.vmem [shape: f32[1,96], index: 2, kind: input, shape index: {}]   ;;  %s2522_s3 = inlined_call_operand.vmem [shape: f32[32,32], index: 3, kind: input, shape index: {}]   ;;  %s2523_s4 = inlined_call_operand.vmem [shape: f32[1,32], index: 4, kind: input, shape index: {}]   ;;  %s2524_s5 = inlined_call_operand.<no memory space> [shape: f32[1,1], index: 5, kind: input, shape index: {}]   ;;  %s2525_s7 = inlined_call_operand.vmem [shape: f32[1,32], index: 7, kind: input, shape index: {}]   ;;  %s2526_s8 = inlined_call_operand.vmem [shape: f32[1,32], index: 8, kind: input, shape index: {}]   ;;  %s2527_s9 = inlined_call_operand.vmem [shape: f32[384,32], index: 9, kind: output, shape index: {}, may-alias: {0,9}]   ;;  %s2528_s6 = inlined_call_operand.<no memory space> [shape: f32[1,1], index: 6, kind: input, shape index: {}]  }
   0x1   :  { %v14_v0 = vstv %s2524_s5  ;;  %v16_v1 = vstv %s2528_s6 }
   0x2   :  { %15 = vst [vmem:[#allocation2] sm:$0x1] %v14_v0 }
   0x3   :  { %17 = vst [vmem:[#allocation3] sm:$0x1] %v16_v1 }
   0x4 LB: > { %s1554_s14 = sadd.s32 4294967295, %s1715_s13   ;;  %p1558_p0 = scmp.ge.s32.totalorder %s1715_s13, 1  ;;  %s1715_s13 = sphi %s1777_s13, %s23_s13  }
   0x5   : > { %p292_p1 = scmp.lt.s32.totalorder %s1715_s13, 4 }
   0x7   : > { %p293_p2 = pnand %p1558_p0, %p292_p1 }
   0x8   : > { %s1559_s6 = sshll.u32 (!%p293_p2), %s1554_s14, 4  ;;  %s1718_s5 = smov (!%p293_p2), 64  }
   0x9   : > { %296 = sbr.rel (%p293_p2) target bundleno = 997 (0x3e5), region = 56  ;;  %p329_p3 = scmp.lt.s32.totalorder (!%p293_p2), %s1559_s6, 47 }
   0xa   : > { %s1595_s15 = sshll.u32 (!%p293_p2), %s1554_s14, 7 }
   0xe   : > { %v1615_v2 = vld [vmem:[%s2520_s1 + $0x8] sm:$0xff]  ;;  %v1614_v3 = vld [vmem:[%s2520_s1] sm:$0xff]  ;;  %s2530_s6 = smov (!%p329_p3, %s1559_s6), 47  ;;  %vm385_vm0 = vcmask 261120   ;;  %v475_v16 = vld [vmem:[%s2522_s3 + $0x18] sm:$0xff]  ;;  %v1717_v17 = vmov 0  }
   0xf   : > { %416 = vmatpush.bf16.msra.mxu0 %v1615_v2  ;;  %1616 = vmatpush.bf16.msra.mxu2 %v1615_v2  ;;  %s1560_s18 = sshll.u32 %s2530_s6, 3  ;;  %v459_v18 = vld [vmem:[#allocation2] sm:$0x1]  ;;  %v460_v19 = vld [vmem:[#allocation3] sm:$0x1]  ;;  %v474_v20 = vld [vmem:[%s2522_s3 + $0x10] sm:$0xff] }
  0x10   : > { %s1801_s21 = scalar_lea.vmem %s2519_s0, %s1560_s18  ;;  %1634 = vset.pattern.permute.xlu0 %v1717_v17  ;;  %537 = vmatpush.msra.mxu1 %v475_v16  ;;  %v461_v21 = vmul.f32 %v460_v19, %v459_v18  ;;  %v473_v42 = vld [vmem:[%s2522_s3 + $0x8] sm:$0xff]  ;;  %v472_v43 = vld [vmem:[%s2522_s3] sm:$0xff]  ;;  %s2307_s22 = scalar_lea.vmem %s2527_s9, %s1560_s18 }
  0x11   : > { %v1804_v4 = vld [vmem:[%s1801_s21] sm:$0xff]  ;;  %v1807_v5 = vld [vmem:[%s1801_s21 + $0x8] sm:$0xff]  ;;  %v1822_v10 = vld [vmem:[%s1801_s21 + $0x10] sm:$0xff]  ;;  %1618 = vmatpush.msra.mxu3 %v475_v16  ;;  %1635 = vset.pattern.permute.xlu2 %v1717_v17 }
  0x12   : > { %v1810_v6 = vld [vmem:[%s1801_s21 + $0x40] sm:$0xff]  ;;  %v357_v7 = vpack.c.bf16 %v1807_v5, %v1804_v4  ;;  %v1815_v8 = vld [vmem:[%s1801_s21 + $0x48] sm:$0xff]  ;;  %v1825_v11 = vld [vmem:[%s1801_s21 + $0x18] sm:$0xff]  ;;  %538 = vmatpush.msra.mxu1 %v474_v20  ;;  %1636 = vset.pattern.permute.xlu1 %v1717_v17  ;;  %1641 = vrsqrt.f32 %v461_v21  ;;  %vm468_vm1 = vweird.f32 %v461_v21 }
  0x13   : > { %417 = vmatpush.bf16.msra.mxu0 %v1614_v3  ;;  %1617 = vmatpush.bf16.msra.mxu2 %v1614_v3  ;;  %v361_v9 = vpack.c.bf16 %v1815_v8, %v1810_v6  ;;  %v1828_v12 = vld [vmem:[%s1801_s21 + $0x50] sm:$0xff]  ;;  %v1831_v13 = vld [vmem:[%s1801_s21 + $0x58] sm:$0xff]  ;;  %v358_v14 = vpack.c.bf16 %v1825_v11, %v1822_v10  ;;  %v1846_v22 = vld [vmem:[%s1801_s21 + $0x20] sm:$0xff] }
  0x14   : > { %v362_v15 = vpack.c.bf16 %v1831_v13, %v1828_v12  ;;  %1619 = vmatpush.msra.mxu3 %v474_v20  ;;  %v1849_v23 = vld [vmem:[%s1801_s21 + $0x28] sm:$0xff]  ;;  %v1852_v24 = vld [vmem:[%s1801_s21 + $0x60] sm:$0xff]  ;;  %v1866_v36 = vld [vmem:[%s1801_s21 + $0x30] sm:$0xff]  ;;  %539 = vmatpush.msra.mxu1 %v473_v42 }
  0x15   : > { %v1855_v25 = vld [vmem:[%s1801_s21 + $0x68] sm:$0xff]  ;;  %v359_v27 = vpack.c.bf16 %v1849_v23, %v1846_v22  ;;  %v1869_v37 = vld [vmem:[%s1801_s21 + $0x38] sm:$0xff]  ;;  %v1873_v38 = vld [vmem:[%s1801_s21 + $0x70] sm:$0xff] }
  0x16   : > { %1571 = vmatmul.msk.bf16.vlgmr.msra.gmra.mxu0 %vm385_vm0, %v357_v7  ;;  %1575 = vmatmul.msk.bf16.vlgmr.msra.gmra.mxu2 %vm385_vm0, %v361_v9  ;;  %v363_v29 = vpack.c.bf16 %v1855_v25, %v1852_v24  ;;  %v1876_v39 = vld [vmem:[%s1801_s21 + $0x78] sm:$0xff]  ;;  %v360_v40 = vpack.c.bf16 %v1869_v37, %v1866_v36  ;;  %v1893_v44 = vld [vmem:[%s2521_s2] ss:$0 sm:$0xff] }
  0x17   : > { %v364_v41 = vpack.c.bf16 %v1876_v39, %v1873_v38  ;;  %1620 = vmatpush.msra.mxu3 %v473_v42  ;;  %540 = vmatpush.msra.mxu1 %v472_v43  ;;  %v1898_v45 = vld [vmem:[%s2523_s4] ss:$0 sm:$0xff] }
  0x18   : > { %v1642_v26 = vpop.eup %1641 }
  0x19   : > { %v463_v28 = vmul.f32 %v1642_v26, %v461_v21  ;;  %vm469_vm2 = vweird.f32 %v1642_v26  ;;  %1621 = vmatpush.msra.mxu3 %v472_v43 }
  0x1a   : > { %vm470_vm3 = vmor %vm468_vm1, %vm469_vm2 }
  0x1b   : > { %v464_v30 = vmul.f32 %v1642_v26, %v463_v28 }
  0x1d   : > { %v465_v31 = vmul.f32 0.5, %v464_v30 }
  0x1f   : > { %v466_v32 = vsub.f32 1.5, %v465_v31 }
  0x21   : > { %v467_v33 = vmul.f32 %v1642_v26, %v466_v32 }
  0x23   : > { %v471_v34 = vsel %vm470_vm3, %v1642_v26, %v467_v33 }
  0x24   : > { %v1863_v35 = vperm.slane %v471_v34, 0 }
  0x26   : > { %1572 = vmatmul.msk.bf16.gmra.mxu0 %vm385_vm0, %v358_v14  ;;  %1576 = vmatmul.msk.bf16.gmra.mxu2 %vm385_vm0, %v362_v15 }
  0x27   : > { %593 = vperm.xlu0 %1634, %v1863_v35  }
  0x36   : > { %1573 = vmatmul.msk.bf16.gmra.mxu0 %vm385_vm0, %v359_v27  ;;  %1577 = vmatmul.msk.bf16.gmra.mxu2 %vm385_vm0, %v363_v29 }
  0x46   : > { %1574 = vmatmul.msk.bf16.gmra.mxu0 %vm385_vm0, %v360_v40  ;;  %1578 = vmatmul.msk.bf16.gmra.mxu2 %vm385_vm0, %v364_v41 }
  0x93   : > { %v419_v46 = vpop.f32.mrf.mxu0 }
  0x94   : > { %v420_v47 = vadd.f32 %v1893_v44, %v419_v46 }
  0x96   : > { %1579 = vmatmul.msk.f32.vlgmr.msra.gmra.mxu1 %vm385_vm0, %v420_v47  ;;  %v612_v48 = vmul.f32 320.0, %v420_v47  ;;  %v711_v49 = vmul.f32 %v1898_v45, %v420_v47 }
  0x98   : > { %644 = vrot.lane.b32.xlu0 %v612_v48, %s1718_s5  ;;  %v727_v50 = vsel %vm385_vm0, %v711_v49, 0.0 }
  0x99   : > { %728 = vadd.xlane.f32.xlu2 %v727_v50  ;;  %v439_v51 = vpop.f32.mrf.mxu2 }
  0x9a   : > { %v440_v52 = vadd.f32 %v1893_v44, %v439_v51  ;;  %v1968_v51 = vpop.permute.xlu0 %593 }
  0x9b   : > { %v421_v53 = vpop.f32.mrf.mxu0 }
  0x9c   : > { %v422_v54 = vadd.f32 %v1893_v44, %v421_v53  ;;  %1587 = vmatmul.msk.f32.vlgmr.msra.gmra.mxu3 %vm385_vm0, %v440_v52  ;;  %v620_v55 = vmul.f32 320.0, %v440_v52  ;;  %v719_v27 = vmul.f32 %v1898_v45, %v440_v52 }
  0x9e   : > { %1580 = vmatmul.msk.f32.gmra.mxu1 %vm385_vm0, %v422_v54  ;;  %v613_v56 = vmul.f32 320.0, %v422_v54  ;;  %v751_v28 = vsel %vm385_vm0, %v719_v27, 0.0  ;;  %v712_v34 = vmul.f32 %v1898_v45, %v422_v54 }
  0xa0   : > { %646 = vrot.lane.b32.xlu1 %v613_v56, %s1718_s5  ;;  %660 = vrot.lane.b32.xlu0 %v620_v55, %s1718_s5  ;;  %v730_v41 = vsel %vm385_vm0, %v712_v34, 0.0 }
  0xa1   : > { %v441_v57 = vpop.f32.mrf.mxu2 }
  0xa2   : > { %v442_v58 = vadd.f32 %v1893_v44, %v441_v57 }
  0xa3   : > { %v424_v59 = vpop.f32.mrf.mxu0 }
  0xa4   : > { %v425_v60 = vadd.f32 %v1893_v44, %v424_v59  ;;  %1588 = vmatmul.msk.f32.gmra.mxu3 %vm385_vm0, %v442_v58  ;;  %v621_v61 = vmul.f32 320.0, %v442_v58  ;;  %v720_v33 = vmul.f32 %v1898_v45, %v442_v58 }
  0xa6   : > { %1581 = vmatmul.msk.f32.gmra.mxu1 %vm385_vm0, %v425_v60  ;;  %v754_v40 = vsel %vm385_vm0, %v720_v33, 0.0  ;;  %v614_v49 = vmul.f32 320.0, %v425_v60  ;;  %v713_v53 = vmul.f32 %v1898_v45, %v425_v60 }
  0xa8   : > { %662 = vrot.lane.b32.xlu1 %v621_v61, %s1718_s5  ;;  %v733_v56 = vsel %vm385_vm0, %v713_v53, 0.0 }
  0xa9   : > { %v444_v62 = vpop.f32.mrf.mxu2 }
  0xaa   : > { %v445_v63 = vadd.f32 %v1893_v44, %v444_v62 }
  0xab   : > { %v426_v0 = vpop.f32.mrf.mxu0 }
  0xac   : > { %v427_v1 = vadd.f32 %v1893_v44, %v426_v0  ;;  %1589 = vmatmul.msk.f32.gmra.mxu3 %vm385_vm0, %v445_v63  ;;  %v622_v2 = vmul.f32 320.0, %v445_v63  ;;  %v721_v46 = vmul.f32 %v1898_v45, %v445_v63 }
  0xae   : > { %1582 = vmatmul.msk.f32.gmra.mxu1 %vm385_vm0, %v427_v1  ;;  %v757_v47 = vsel %vm385_vm0, %v721_v46, 0.0  ;;  %v615_v50 = vmul.f32 320.0, %v427_v1  ;;  %v714_v58 = vmul.f32 %v1898_v45, %v427_v1 }
  0xb0   : > { %v736_v61 = vsel %vm385_vm0, %v714_v58, 0.0 }
  0xb1   : > { %664 = vrot.lane.b32.xlu2 %v622_v2, %s1718_s5  ;;  %v446_v3 = vpop.f32.mrf.mxu2 }
  0xb2   : > { %v447_v7 = vadd.f32 %v1893_v44, %v446_v3 }
  0xb3   : > { %v429_v9 = vpop.f32.mrf.mxu0 }
  0xb4   : > { %v1923_v14 = vadd.f32 %v1893_v44, %v429_v9  ;;  %1590 = vmatmul.msk.f32.gmra.mxu3 %vm385_vm0, %v447_v7  ;;  %v623_v48 = vmul.f32 320.0, %v447_v7 }
  0xb6   : > { %1583 = vmatmul.msk.f32.gmra.mxu1 %vm385_vm0, %v1923_v14  ;;  %v616_v60 = vmul.f32 320.0, %v1923_v14 }
  0xb9   : > { %v449_v15 = vpop.f32.mrf.mxu2 }
  0xba   : > { %v450_v16 = vadd.f32 %v1893_v44, %v449_v15 }
  0xbb   : > { %v431_v17 = vpop.f32.mrf.mxu0 }
  0xbc   : > { %v432_v18 = vadd.f32 %v1893_v44, %v431_v17  ;;  %1591 = vmatmul.msk.f32.gmra.mxu3 %vm385_vm0, %v450_v16  ;;  %v624_v63 = vmul.f32 320.0, %v450_v16  ;;  %v723_v1 = vmul.f32 %v1898_v45, %v450_v16 }
  0xbe   : > { %1584 = vmatmul.msk.f32.gmra.mxu1 %vm385_vm0, %v432_v18  ;;  %v617_v62 = vmul.f32 320.0, %v432_v18  ;;  %v716_v0 = vmul.f32 %v1898_v45, %v432_v18  ;;  %v763_v3 = vsel %vm385_vm0, %v723_v1, 0.0 }
  0xc0   : > { %v742_v2 = vsel %vm385_vm0, %v716_v0, 0.0 }
  0xc1   : > { %v451_v19 = vpop.f32.mrf.mxu2 }
  0xc2   : > { %v1933_v20 = vadd.f32 %v1893_v44, %v451_v19 }
  0xc3   : > { %v434_v21 = vpop.f32.mrf.mxu0 }
  0xc4   : > { %v1936_v26 = vadd.f32 %v1893_v44, %v434_v21  ;;  %1592 = vmatmul.msk.f32.gmra.mxu3 %vm385_vm0, %v1933_v20  ;;  %v625_v18 = vmul.f32 320.0, %v1933_v20 }
  0xc6   : > { %1585 = vmatmul.msk.f32.gmra.mxu1 %vm385_vm0, %v1936_v26  ;;  %v618_v17 = vmul.f32 320.0, %v1936_v26 }
  0xc9   : > { %v454_v29 = vpop.f32.mrf.mxu2 }
  0xca   : > { %752 = vadd.xlane.f32.xlu0 %v751_v28  ;;  %v1945_v30 = vadd.f32 %v1893_v44, %v454_v29 }
  0xcb   : > { %v436_v31 = vpop.f32.mrf.mxu0 }
  0xcc   : > { %v1948_v32 = vadd.f32 %v1893_v44, %v436_v31  ;;  %1593 = vmatmul.msk.f32.gmra.mxu3 %vm385_vm0, %v1945_v30  ;;  %v626_v15 = vmul.f32 320.0, %v1945_v30  ;;  %v725_v28 = vmul.f32 %v1898_v45, %v1945_v30 }
  0xce   : > { %1586 = vmatmul.msk.f32.gmra.mxu1 %vm385_vm0, %v1948_v32  ;;  %v769_v29 = vsel %vm385_vm0, %v725_v28, 0.0  ;;  %v619_v58 = vmul.f32 320.0, %v1948_v32 }
  0xd1   : > { %v456_v42 = vpop.f32.mrf.mxu2 }
  0xd2   : > { %755 = vadd.xlane.f32.xlu1 %v754_v40  ;;  %731 = vadd.xlane.f32.xlu0 %v730_v41  ;;  %v1959_v43 = vadd.f32 %v1893_v44, %v456_v42  ;;  %v722_v44 = vmul.f32 %v1898_v45, %v447_v7  ;;  %v715_v7 = vmul.f32 %v1898_v45, %v1923_v14 }
  0xd4   : > { %1594 = vmatmul.msk.f32.gmra.mxu3 %vm385_vm0, %v1959_v43  ;;  %v760_v52 = vsel %vm385_vm0, %v722_v44, 0.0  ;;  %v739_v9 = vsel %vm385_vm0, %v715_v7, 0.0  ;;  %v726_v1 = vmul.f32 %v1898_v45, %v1959_v43 }
  0xda   : > { %758 = vadd.xlane.f32.xlu2 %v757_v47  ;;  %v717_v47 = vmul.f32 %v1898_v45, %v1936_v26 }
  0xe6   : > { %666 = vrot.lane.b32.xlu0 %v623_v48, %s1718_s5  ;;  %v724_v48 = vmul.f32 %v1898_v45, %v1933_v20 }
  0xeb   : > { %648 = vrot.lane.b32.xlu1 %v614_v49, %s1718_s5  ;;  %v745_v49 = vsel %vm385_vm0, %v717_v47, 0.0 }
  0xf2   : > { %650 = vrot.lane.b32.xlu2 %v615_v50, %s1718_s5  ;;  %v766_v50 = vsel %vm385_vm0, %v724_v48, 0.0 }
 0x10a   : > { %v645_v57 = vpop.permute.xlu0 %644 }
 0x10c   : > { %v729_v16 = vpop.xlane.xlu2 %728 }
 0x110   : > { %761 = vadd.xlane.f32.xlu0 %v760_v52 }
 0x112   : > { %v1996_v19 = vpop.permute.xlu0 %660  ;;  %v1998_v14 = vpop.permute.xlu1 %646 }
 0x113   : > { %v542_v54 = vpop.f32.mrf.mxu1 }
 0x114   : > { %v596_v55 = vmul.f32 %v1968_v51, %v542_v54  ;;  %v2000_v21 = vpop.permute.xlu2 %664 }
 0x115   : > { %734 = vadd.xlane.f32.xlu1 %v733_v56  ;;  %v627_v56 = vmul.f32 320.0, %v1959_v43 }
 0x116   : > { %v1976_v59 = vadd.f32 %v645_v57, %v596_v55 }
 0x11a   : > { %v2005_v33 = vpop.permute.xlu1 %662 }
 0x11b   : > { %737 = vadd.xlane.f32.xlu2 %v736_v61 }
 0x124   : > { %654 = vrot.lane.b32.xlu0 %v617_v62, %s1718_s5 }
 0x12e   : > { %668 = vrot.lane.b32.xlu1 %v624_v63, %s1718_s5 }
 0x133   : > { %652 = vrot.lane.b32.xlu2 %v616_v60, %s1718_s5 }
 0x13d   : > { %v753_v27 = vpop.xlane.xlu0 %752 }
 0x13e   : > { %v784_v28 = vmul.f32 %v753_v27, %v1863_v35 }
 0x140   : > { %v800_v43 = vadd.f32 320.0, %v784_v28 }
 0x145   : > { %v732_v34 = vpop.xlane.xlu0 %731  ;;  %v756_v42 = vpop.xlane.xlu1 %755 }
 0x146   : > { %v777_v40 = vmul.f32 %v732_v34, %v1863_v35  ;;  %v785_v30 = vmul.f32 %v756_v42, %v1863_v35 }
 0x148   : > { %v793_v41 = vadd.f32 320.0, %v777_v40  ;;  %v801_v44 = vadd.f32 320.0, %v785_v30 }
 0x14a   : > { %1643 = vrcp.f32 %v793_v41 }
 0x14b   : > { %1645 = vrcp.f32 %v801_v44 }
 0x14d   : > { %v759_v31 = vpop.xlane.xlu2 %758 }
 0x14e   : > { %743 = vadd.xlane.f32.xlu0 %v742_v2 }
 0x150   : > { %v1644_v53 = vpop.eup %1643 }
 0x151   : > { %v1646_v55 = vpop.eup %1645 }
 0x155   : > { %v2008_v46 = vpop.permute.xlu2 %650 }
 0x158   : > { %764 = vadd.xlane.f32.xlu1 %v763_v3  ;;  %v718_v3 = vmul.f32 %v1898_v45, %v1948_v32  ;;  %v2031_v7 = vpop.permute.xlu0 %666  ;;  %v786_v45 = vmul.f32 %v759_v31, %v1863_v35 }
 0x15a   : > { %v802_v41 = vadd.f32 320.0, %v786_v45 }
 0x15c   : > { %740 = vadd.xlane.f32.xlu2 %v739_v9  ;;  %v772_v9 = vsel %vm385_vm0, %v726_v1, 0.0 }
 0x15d   : > { %v2019_v57 = vpop.permute.xlu1 %648 }
 0x162   : > { %672 = vrot.lane.b32.xlu0 %v626_v15, %s1718_s5  ;;  %v748_v15 = vsel %vm385_vm0, %v718_v3, 0.0 }
 0x171   : > { %656 = vrot.lane.b32.xlu1 %v618_v17, %s1718_s5 }
 0x174   : > { %670 = vrot.lane.b32.xlu2 %v625_v18, %s1718_s5  ;;  %v776_v18 = vmul.f32 %v729_v16, %v1863_v35 }
 0x183   : > { %v762_v17 = vpop.xlane.xlu0 %761 }
 0x188   : > { %v735_v61 = vpop.xlane.xlu1 %734 }
 0x189   : > { %v778_v32 = vmul.f32 %v735_v61, %v1863_v35 }
 0x18b   : > { %v794_v47 = vadd.f32 320.0, %v778_v32 }
 0x18c   : > { %770 = vadd.xlane.f32.xlu0 %v769_v29  ;;  %v792_v29 = vadd.f32 320.0, %v776_v18 }
 0x18e   : > { %v738_v52 = vpop.xlane.xlu2 %737 }
 0x18f   : > { %v779_v54 = vmul.f32 %v738_v52, %v1863_v35 }
 0x191   : > { %v795_v26 = vadd.f32 320.0, %v779_v54 }
 0x193   : > { %1647 = vrcp.f32 %v795_v26 }
 0x196   : > { %v2037_v34 = vpop.permute.xlu0 %654  ;;  %v2039_v40 = vpop.permute.xlu2 %652 }
 0x199   : > { %v1648_v20 = vpop.eup %1647 }
 0x19b   : > { %746 = vadd.xlane.f32.xlu1 %v745_v49  ;;  %v787_v49 = vmul.f32 %v762_v17, %v1863_v35 }
 0x19d   : > { %767 = vadd.xlane.f32.xlu2 %v766_v50  ;;  %v803_v31 = vadd.f32 320.0, %v787_v49 }
 0x1a0   : > { %831 = vperm.xlu0 %1634, %v1644_v53   ;;  %v2024_v62 = vpop.permute.xlu1 %668 }
 0x1a8   : > { %871 = vperm.xlu0 %1634, %v1646_v55  }
 0x1b0   : > { %841 = vperm.xlu0 %1634, %v1648_v20  }
 0x1b4   : > { %674 = vrot.lane.b32.xlu1 %v627_v56, %s1718_s5 }
 0x1b5   : > { %658 = vrot.lane.b32.xlu2 %v619_v58, %s1718_s5 }
 0x1c1   : > { %v744_v42 = vpop.xlane.xlu0 %743 }
 0x1c2   : > { %v781_v54 = vmul.f32 %v744_v42, %v1863_v35 }
 0x1c4   : > { %v797_v55 = vadd.f32 320.0, %v781_v54 }
 0x1cb   : > { %v765_v63 = vpop.xlane.xlu1 %764 }
 0x1cc   : > { %v788_v60 = vmul.f32 %v765_v63, %v1863_v35 }
 0x1ce   : > { %v804_v0 = vadd.f32 320.0, %v788_v60 }
 0x1cf   : > { %v741_v48 = vpop.xlane.xlu2 %740 }
 0x1d0   : > { %1649 = vrcp.f32 %v804_v0  ;;  %v780_v27 = vmul.f32 %v741_v48, %v1863_v35  ;;  %v953_v48 = vmul.f32 0.5, %v1807_v5 }
 0x1d1   : > { %1651 = vrcp.f32 %v792_v29 }
 0x1d2   : > { %1653 = vrcp.f32 %v800_v43  ;;  %v796_v50 = vadd.f32 320.0, %v780_v27  ;;  %v545_v43 = vpop.f32.mrf.mxu1 }
 0x1d3   : > { %1655 = vrcp.f32 %v802_v41  ;;  %v597_v45 = vmul.f32 %v1968_v51, %v545_v43 }
 0x1d4   : > { %1657 = vrcp.f32 %v794_v47  ;;  %v2045_v44 = vpop.permute.xlu0 %672 }
 0x1d5   : > { %1659 = vrcp.f32 %v796_v50  ;;  %v693_v41 = vadd.f32 %v1998_v14, %v597_v45 }
 0x1d6   : > { %v1650_v2 = vpop.eup %1649  ;;  %1661 = vrcp.f32 %v803_v31 }
 0x1d7   : > { %886 = vperm.xlu0 %1634, %v1650_v2   ;;  %v1652_v30 = vpop.eup %1651  ;;  %1663 = vrcp.f32 %v797_v55  ;;  %v2051_v63 = vpop.permute.xlu2 %670 }
 0x1d8   : > { %v1654_v16 = vpop.eup %1653 }
 0x1d9   : > { %v1656_v52 = vpop.eup %1655 }
 0x1da   : > { %v1658_v53 = vpop.eup %1657 }
 0x1db   : > { %v1660_v20 = vpop.eup %1659 }
 0x1dc   : > { %v1662_v56 = vpop.eup %1661 }
 0x1dd   : > { %v1664_v0 = vpop.eup %1663 }
 0x1de   : > { %773 = vadd.xlane.f32.xlu1 %v772_v9  ;;  %749 = vadd.xlane.f32.xlu2 %v748_v15 }
 0x1e3   : > { %v2048_v58 = vpop.permute.xlu1 %656 }
 0x1f6   : > { %826 = vperm.xlu2 %1635, %v1652_v30  }
 0x1f7   : > { %866 = vperm.xlu1 %1636, %v1654_v16   ;;  %v566_v16 = vpop.f32.mrf.mxu3 }
 0x1fe   : > { %876 = vperm.xlu2 %1635, %v1656_v52   ;;  %v548_v52 = vpop.f32.mrf.mxu1 }
 0x1ff   : > { %836 = vperm.xlu1 %1636, %v1658_v53   ;;  %v771_v26 = vpop.xlane.xlu0 %770  ;;  %v569_v31 = vpop.f32.mrf.mxu3 }
 0x200   : > { %v790_v61 = vmul.f32 %v771_v26, %v1863_v35 }
 0x202   : > { %v806_v60 = vadd.f32 320.0, %v790_v61 }
 0x204   : > { %1665 = vrcp.f32 %v806_v60 }
 0x206   : > { %846 = vperm.xlu2 %1635, %v1660_v20   ;;  %v551_v61 = vpop.f32.mrf.mxu1 }
 0x207   : > { %881 = vperm.xlu1 %1636, %v1662_v56   ;;  %v572_v5 = vpop.f32.mrf.mxu3 }
 0x20a   : > { %v1666_v18 = vpop.eup %1665 }
 0x20e   : > { %v747_v2 = vpop.xlane.xlu1 %746 }
 0x20f   : > { %v782_v1 = vmul.f32 %v747_v2, %v1863_v35  ;;  %851 = vperm.xlu1 %1636, %v1664_v0   ;;  %v606_v0 = vmul.f32 %v1968_v51, %v572_v5 }
 0x210   : > { %v768_v3 = vpop.xlane.xlu2 %767 }
 0x211   : > { %v798_v9 = vadd.f32 320.0, %v782_v1  ;;  %v789_v15 = vmul.f32 %v768_v3, %v1863_v35  ;;  %v575_v1 = vpop.f32.mrf.mxu3  ;;  %v702_v3 = vadd.f32 %v2000_v21, %v606_v0  ;;  %v956_v21 = vmul.f32 0.5, %v1846_v22 }
 0x212   : > { %v832_v32 = vpop.permute.xlu0 %831 }
 0x213   : > { %1667 = vrcp.f32 %v798_v9  ;;  %v805_v17 = vadd.f32 320.0, %v789_v15  ;;  %v905_v42 = vmul.f32 %v832_v32, %v693_v41 }
 0x215   : > { %1669 = vrcp.f32 %v805_v17  ;;  %v937_v47 = vmul.f32 0.5, %v905_v42 }
 0x217   : > { %896 = vperm.xlu1 %1636, %v1666_v18   ;;  %v2058_v30 = vadd.f32 %v953_v48, %v937_v47  ;;  %v554_v18 = vpop.f32.mrf.mxu1 }
 0x218   : > { %v2062_v49 = vpop.permute.xlu2 %658 }
 0x219   : > { %v1668_v28 = vpop.eup %1667  ;;  %v989_v27 = vsel %vm385_vm0, %v2058_v30, 0.0  ;;  %v578_v43 = vpop.f32.mrf.mxu3 }
 0x21a   : > { %856 = vperm.xlu0 %1634, %v1668_v28   ;;  %v600_v28 = vmul.f32 %v1968_v51, %v554_v18 }
 0x21b   : > { %v1670_v29 = vpop.eup %1669 }
 0x21c   : > { %891 = vperm.xlu2 %1635, %v1670_v29   ;;  %v696_v45 = vadd.f32 %v2039_v40, %v600_v28  ;;  %v604_v40 = vmul.f32 %v1968_v51, %v566_v16  ;;  %v598_v16 = vmul.f32 %v1968_v51, %v548_v52  ;;  %v599_v52 = vmul.f32 %v1968_v51, %v551_v61 }
 0x21e   : > { %v700_v22 = vadd.f32 %v1996_v19, %v604_v40  ;;  %v960_v19 = vmul.f32 0.5, %v1810_v6  ;;  %v608_v40 = vmul.f32 %v1968_v51, %v578_v43 }
 0x226   : > { %v2064_v50 = vpop.permute.xlu1 %674 }
 0x241   : > { %990 = vadd.xlane.f32.xlu1 %v989_v27 }
 0x251   : > { %v774_v53 = vpop.xlane.xlu1 %773  ;;  %v750_v54 = vpop.xlane.xlu2 %749 }
 0x252   : > { %v791_v14 = vmul.f32 %v774_v53, %v1863_v35  ;;  %v783_v26 = vmul.f32 %v750_v54, %v1863_v35  ;;  %v962_v35 = vmul.f32 0.5, %v1828_v12  ;;  %v581_v53 = vpop.f32.mrf.mxu3 }
 0x253   : > { %v609_v54 = vmul.f32 %v1968_v51, %v581_v53 }
 0x254   : > { %v807_v55 = vadd.f32 320.0, %v791_v14  ;;  %v799_v20 = vadd.f32 320.0, %v783_v26 }
 0x255   : > { %v705_v14 = vadd.f32 %v2051_v63, %v609_v54 }
 0x256   : > { %1671 = vrcp.f32 %v807_v55  ;;  %v965_v55 = vmul.f32 0.5, %v1855_v25  ;;  %v952_v25 = vmul.f32 0.5, %v1804_v4  ;;  %v961_v4 = vmul.f32 0.5, %v1815_v8 }
 0x257   : > { %1673 = vrcp.f32 %v799_v20 }
 0x259   : > { %v827_v56 = vpop.permute.xlu2 %826 }
 0x25a   : > { %v904_v0 = vmul.f32 %v827_v56, %v1976_v59  ;;  %v694_v56 = vadd.f32 %v2019_v57, %v598_v16 }
 0x25c   : > { %v1672_v60 = vpop.eup %1671 }
 0x25d   : > { %v1674_v2 = vpop.eup %1673  ;;  %901 = vperm.xlu0 %1634, %v1672_v60  }
 0x25e   : > { %861 = vperm.xlu2 %1635, %v1674_v2  }
 0x261   : > { %v877_v9 = vpop.permute.xlu2 %876 }
 0x262   : > { %v914_v15 = vmul.f32 %v877_v9, %v702_v3  ;;  %v605_v3 = vmul.f32 %v1968_v51, %v569_v31 }
 0x264   : > { %v946_v17 = vmul.f32 0.5, %v914_v15  ;;  %v872_v15 = vpop.permute.xlu0 %871  ;;  %v701_v59 = vadd.f32 %v2005_v33, %v605_v3 }
 0x266   : > { %v2072_v29 = vadd.f32 %v962_v35, %v946_v17  ;;  %v936_v35 = vmul.f32 0.5, %v904_v0  ;;  %v913_v31 = vmul.f32 %v872_v15, %v701_v59 }
 0x268   : > { %v1016_v32 = vsel %vm385_vm0, %v2072_v29, 0.0  ;;  %v2098_v28 = vadd.f32 %v952_v25, %v936_v35 }
 0x269   : > { %v847_v41 = vpop.permute.xlu2 %846  ;;  %1017 = vadd.xlane.f32.xlu1 %v1016_v32  ;;  %v867_v12 = vpop.permute.xlu1 %866 }
 0x26a   : > { %v908_v42 = vmul.f32 %v847_v41, %v696_v45  ;;  %v912_v2 = vmul.f32 %v867_v12, %v700_v22  ;;  %v607_v41 = vmul.f32 %v1968_v51, %v575_v1  ;;  %v986_v33 = vsel %vm385_vm0, %v2098_v28, 0.0  ;;  %v557_v1 = vpop.f32.mrf.mxu1 }
 0x26b   : > { %v695_v12 = vadd.f32 %v2008_v46, %v599_v52 }
 0x26c   : > { %v940_v47 = vmul.f32 0.5, %v908_v42  ;;  %v944_v17 = vmul.f32 0.5, %v912_v2  ;;  %v945_v42 = vmul.f32 0.5, %v913_v31  ;;  %v703_v61 = vadd.f32 %v2031_v7, %v607_v41 }
 0x26e   : > { %v2078_v48 = vadd.f32 %v956_v21, %v940_v47  ;;  %v2100_v45 = vadd.f32 %v960_v19, %v944_v17  ;;  %v842_v21 = vpop.permute.xlu0 %841  ;;  %v954_v47 = vmul.f32 0.5, %v1822_v10  ;;  %v2112_v8 = vadd.f32 %v961_v4, %v945_v42 }
 0x26f   : > { %v955_v10 = vmul.f32 0.5, %v1825_v11  ;;  %v957_v19 = vmul.f32 0.5, %v1849_v23  ;;  %v966_v23 = vmul.f32 0.5, %v1873_v38 }
 0x270   : > { %v998_v27 = vsel %vm385_vm0, %v2078_v48, 0.0  ;;  %v1010_v57 = vsel %vm385_vm0, %v2100_v45, 0.0  ;;  %v1013_v7 = vsel %vm385_vm0, %v2112_v8, 0.0 }
 0x271   : > { %999 = vadd.xlane.f32.xlu1 %v998_v27  ;;  %v837_v20 = vpop.permute.xlu1 %836  ;;  %v907_v27 = vmul.f32 %v842_v21, %v695_v12 }
 0x272   : > { %v906_v18 = vmul.f32 %v837_v20, %v694_v56  ;;  %v963_v20 = vmul.f32 0.5, %v1831_v13  ;;  %v560_v15 = vpop.f32.mrf.mxu1 }
 0x273   : > { %v602_v16 = vmul.f32 %v1968_v51, %v560_v15 }
 0x274   : > { %v938_v6 = vmul.f32 0.5, %v906_v18 }
 0x275   : > { %v698_v18 = vadd.f32 %v2048_v58, %v602_v16  ;;  %v958_v58 = vmul.f32 0.5, %v1866_v36 }
 0x276   : > { %v892_v26 = vpop.permute.xlu2 %891  ;;  %v2114_v54 = vadd.f32 %v954_v47, %v938_v6  ;;  %v887_v46 = vpop.permute.xlu0 %886 }
 0x277   : > { %v917_v5 = vmul.f32 %v892_v26, %v705_v14  ;;  %v601_v14 = vmul.f32 %v1968_v51, %v557_v1  ;;  %v939_v26 = vmul.f32 0.5, %v907_v27 }
 0x278   : > { %v992_v22 = vsel %vm385_vm0, %v2114_v54, 0.0 }
 0x279   : > { %v949_v60 = vmul.f32 0.5, %v917_v5  ;;  %v882_v32 = vpop.permute.xlu1 %881  ;;  %v697_v43 = vadd.f32 %v2037_v34, %v601_v14  ;;  %v2126_v2 = vadd.f32 %v955_v10, %v939_v26 }
 0x27a   : > { %v915_v53 = vmul.f32 %v882_v32, %v703_v61  ;;  %v1719_v32 = vmov 32.0   ;;  %v563_v36 = vpop.f32.mrf.mxu1 }
 0x27b   : > { %v2089_v9 = vadd.f32 %v965_v55, %v949_v60  ;;  %v704_v60 = vadd.f32 %v2024_v62, %v608_v40  ;;  %v995_v13 = vsel %vm385_vm0, %v2126_v2, 0.0  ;;  %v964_v62 = vmul.f32 0.5, %v1852_v24 }
 0x27c   : > { %v947_v55 = vmul.f32 0.5, %v915_v53  ;;  %1675 = vrcp.f32 %v1719_v32  ;;  %v603_v26 = vmul.f32 %v1968_v51, %v563_v36 }
 0x27d   : > { %v1025_v63 = vsel %vm385_vm0, %v2089_v9, 0.0  ;;  %v916_v0 = vmul.f32 %v887_v46, %v704_v60 }
 0x27e   : > { %1026 = vadd.xlane.f32.xlu1 %v1025_v63  ;;  %v2128_v3 = vadd.f32 %v963_v20, %v947_v55  ;;  %v584_v63 = vpop.f32.mrf.mxu3  ;;  %v699_v10 = vadd.f32 %v2062_v49, %v603_v26  ;;  %v959_v20 = vmul.f32 0.5, %v1869_v37 }
 0x27f   : > { %v610_v35 = vmul.f32 %v1968_v51, %v584_v63  ;;  %v948_v17 = vmul.f32 0.5, %v916_v0 }
 0x280   : > { %v1019_v34 = vsel %vm385_vm0, %v2128_v3, 0.0 }
 0x281   : > { %v852_v5 = vpop.permute.xlu1 %851  ;;  %v706_v31 = vadd.f32 %v2045_v44, %v610_v35  ;;  %v2140_v52 = vadd.f32 %v964_v62, %v948_v17  ;;  %v967_v35 = vmul.f32 0.5, %v1876_v39 }
 0x282   : > { %v909_v11 = vmul.f32 %v852_v5, %v697_v43 }
 0x283   : > { %v1022_v4 = vsel %vm385_vm0, %v2140_v52, 0.0 }
 0x284   : > { %v941_v25 = vmul.f32 0.5, %v909_v11 }
 0x286   : > { %v2142_v42 = vadd.f32 %v957_v19, %v941_v25  ;;  %v587_v49 = vpop.f32.mrf.mxu3 }
 0x287   : > { %987 = vadd.xlane.f32.xlu2 %v986_v33  ;;  %1011 = vadd.xlane.f32.xlu0 %v1010_v57  ;;  %v1676_v33 = vpop.eup %1675 }
 0x288   : > { %v1001_v44 = vsel %vm385_vm0, %v2142_v42, 0.0  ;;  %v1035_v12 = vmul.f32 32.0, %v1676_v33  ;;  %vm1039_vm4 = vweird.f32 %v1676_v33 }
 0x289   : > { %v897_v59 = vpop.permute.xlu1 %896 }
 0x28a   : > { %v918_v41 = vmul.f32 %v897_v59, %v706_v31  ;;  %v1036_v1 = vsub.f32 1.0, %v1035_v12 }
 0x28c   : > { %v857_v56 = vpop.permute.xlu0 %856  ;;  %v950_v21 = vmul.f32 0.5, %v918_v41  ;;  %v1037_v27 = vmul.f32 %v1676_v33, %v1036_v1 }
 0x28d   : > { %v910_v24 = vmul.f32 %v857_v56, %v698_v18 }
 0x28e   : > { %v2152_v47 = vadd.f32 %v966_v23, %v950_v21  ;;  %v1038_v53 = vadd.f32 %v1676_v33, %v1037_v27 }
 0x28f   : > { %1014 = vadd.xlane.f32.xlu2 %v1013_v7  ;;  %993 = vadd.xlane.f32.xlu0 %v992_v22  ;;  %v942_v6 = vmul.f32 0.5, %v910_v24 }
 0x290   : > { %v1028_v38 = vsel %vm385_vm0, %v2152_v47, 0.0  ;;  %v2158_v40 = vsel %vm1039_vm4, %v1676_v33, %v1038_v53 }
 0x291   : > { %v2150_v57 = vadd.f32 %v958_v58, %v942_v6 }
 0x293   : > { %v1004_v61 = vsel %vm385_vm0, %v2150_v57, 0.0 }
 0x297   : > { %996 = vadd.xlane.f32.xlu2 %v995_v13  ;;  %1020 = vadd.xlane.f32.xlu0 %v1019_v34 }
 0x29f   : > { %1023 = vadd.xlane.f32.xlu2 %v1022_v4  ;;  %1002 = vadd.xlane.f32.xlu0 %v1001_v44 }
 0x2a7   : > { %1005 = vadd.xlane.f32.xlu2 %v1004_v61  ;;  %1029 = vadd.xlane.f32.xlu0 %v1028_v38 }
 0x2b4   : > { %v991_v14 = vpop.xlane.xlu1 %990 }
 0x2b5   : > { %v1042_v5 = vmul.f32 %v2158_v40, %v991_v14 }
 0x2b7   : > { %v2164_v46 = vsub.f32 %v2058_v30, %v1042_v5  ;;  %v611_v30 = vmul.f32 %v1968_v51, %v587_v49 }
 0x2b8   : > { %v862_v55 = vpop.permute.xlu2 %861 }
 0x2b9   : > { %v911_v7 = vmul.f32 %v862_v55, %v699_v10  ;;  %v1074_v22 = vmul.f32 %v2164_v46, %v2164_v46  ;;  %v707_v15 = vadd.f32 %v2064_v50, %v611_v30 }
 0x2bb   : > { %v943_v60 = vmul.f32 0.5, %v911_v7  ;;  %v1092_v43 = vsel %vm385_vm0, %v1074_v22, 0.0 }
 0x2bc   : > { %1093 = vadd.xlane.f32.xlu0 %v1092_v43 }
 0x2bd   : > { %v2170_v0 = vadd.f32 %v959_v20, %v943_v60 }
 0x2bf   : > { %v1007_v11 = vsel %vm385_vm0, %v2170_v0, 0.0 }
 0x2c0   : > { %1008 = vadd.xlane.f32.xlu1 %v1007_v11 }
 0x2cf   : > { %v902_v16 = vpop.permute.xlu0 %901 }
 0x2d0   : > { %v919_v63 = vmul.f32 %v902_v16, %v707_v15 }
 0x2d2   : > { %v951_v37 = vmul.f32 0.5, %v919_v63 }
 0x2d4   : > { %v2177_v17 = vadd.f32 %v967_v35, %v951_v37 }
 0x2d6   : > { %v1031_v13 = vsel %vm385_vm0, %v2177_v17, 0.0 }
 0x2d7   : > { %1032 = vadd.xlane.f32.xlu2 %v1031_v13 }
 0x2dc   : > { %v1018_v62 = vpop.xlane.xlu1 %1017 }
 0x2dd   : > { %v1051_v25 = vmul.f32 %v2158_v40, %v1018_v62 }
 0x2df   : > { %v2183_v34 = vsub.f32 %v2072_v29, %v1051_v25 }
 0x2e1   : > { %v1083_v51 = vmul.f32 %v2183_v34, %v2183_v34 }
 0x2e3   : > { %v1119_v50 = vsel %vm385_vm0, %v1083_v51, 0.0 }
 0x2e4   : > { %v1000_v19 = vpop.xlane.xlu1 %999  ;;  %1120 = vadd.xlane.f32.xlu0 %v1119_v50 }
 0x2e5   : > { %v1045_v39 = vmul.f32 %v2158_v40, %v1000_v19 }
 0x2e7   : > { %v2190_v59 = vsub.f32 %v2078_v48, %v1045_v39 }
 0x2e9   : > { %v1077_v56 = vmul.f32 %v2190_v59, %v2190_v59 }
 0x2eb   : > { %v1101_v31 = vsel %vm385_vm0, %v1077_v56, 0.0 }
 0x2ec   : > { %1102 = vadd.xlane.f32.xlu0 %v1101_v31 }
 0x2f1   : > { %v1027_v50 = vpop.xlane.xlu1 %1026 }
 0x2f2   : > { %v1054_v31 = vmul.f32 %v2158_v40, %v1027_v50 }
 0x2fa   : > { %v988_v29 = vpop.xlane.xlu2 %987  ;;  %v1012_v18 = vpop.xlane.xlu0 %1011 }
 0x2fb   : > { %v1041_v32 = vmul.f32 %v2158_v40, %v988_v29  ;;  %v1049_v41 = vmul.f32 %v2158_v40, %v1012_v18  ;;  %v1384_v29 = vlaneseq }
 0x2fd   : > { %v2198_v24 = vsub.f32 %v2098_v28, %v1041_v32  ;;  %v2201_v4 = vsub.f32 %v2100_v45, %v1049_v41 }
 0x2ff   : > { %v1073_v48 = vmul.f32 %v2198_v24, %v2198_v24  ;;  %v1081_v23 = vmul.f32 %v2201_v4, %v2201_v4 }
 0x301   : > { %v1089_v21 = vsel %vm385_vm0, %v1073_v48, 0.0  ;;  %v1113_v6 = vsel %vm385_vm0, %v1081_v23, 0.0  ;;  %v2274_v48 = vsub.f32 %v2089_v9, %v1054_v31  ;;  %v2276_v23 = vshrl.u32 %v1384_v29, 7 }
 0x302   : > { %v1015_v44 = vpop.xlane.xlu2 %1014  ;;  %1090 = vadd.xlane.f32.xlu1 %v1089_v21  ;;  %v994_v58 = vpop.xlane.xlu0 %993  ;;  %1114 = vadd.xlane.f32.xlu2 %v1113_v6 }
 0x303   : > { %v1050_v28 = vmul.f32 %v2158_v40, %v1015_v44  ;;  %v1043_v33 = vmul.f32 %v2158_v40, %v994_v58  ;;  %v1386_v58 = vadd.s32 8, %v2276_v23  ;;  %v1389_v31 = vadd.s32 32, %v2276_v23 }
 0x305   : > { %v2212_v45 = vsub.f32 %v2112_v8, %v1050_v28  ;;  %v2215_v12 = vsub.f32 %v2114_v54, %v1043_v33  ;;  %v2284_v28 = vstv %s1595_s15 }
 0x306   : > { %v1403_v9 = vadd.s32 %v2284_v28, %v1386_v58 }
 0x307   : > { %v1082_v61 = vmul.f32 %v2212_v45, %v2212_v45  ;;  %v1075_v38 = vmul.f32 %v2215_v12, %v2215_v12 }
 0x308   : > { %vm1419_vm8 = vcmp.lt.s32.totalorder %v1403_v9, 320 }
 0x309   : > { %v1116_v1 = vsel %vm385_vm0, %v1082_v61, 0.0  ;;  %v1095_v27 = vsel %vm385_vm0, %v1075_v38, 0.0 }
 0x30a   : > { %v997_v53 = vpop.xlane.xlu2 %996  ;;  %1117 = vadd.xlane.f32.xlu1 %v1116_v1  ;;  %v1021_v36 = vpop.xlane.xlu0 %1020  ;;  %1096 = vadd.xlane.f32.xlu2 %v1095_v27  ;;  %v2291_v27 = vld [vmem:[%s2525_s7] ss:$0 sm:$0xff] }
 0x30b   : > { %v1044_v8 = vmul.f32 %v2158_v40, %v997_v53  ;;  %v1052_v14 = vmul.f32 %v2158_v40, %v1021_v36  ;;  %v2296_v36 = vld [vmem:[%s2526_s8] ss:$0 sm:$0xff] }
 0x30d   : > { %v2226_v54 = vsub.f32 %v2126_v2, %v1044_v8  ;;  %v2229_v26 = vsub.f32 %v2128_v3, %v1052_v14 }
 0x30f   : > { %v1076_v5 = vmul.f32 %v2226_v54, %v2226_v54  ;;  %v1084_v10 = vmul.f32 %v2229_v26, %v2229_v26 }
 0x311   : > { %v1098_v55 = vsel %vm385_vm0, %v1076_v5, 0.0  ;;  %v1122_v7 = vsel %vm385_vm0, %v1084_v10, 0.0  ;;  %v1720_v5 = vmov 0.0  }
 0x312   : > { %v1024_v22 = vpop.xlane.xlu2 %1023  ;;  %1099 = vadd.xlane.f32.xlu1 %v1098_v55  ;;  %v1003_v20 = vpop.xlane.xlu0 %1002  ;;  %1123 = vadd.xlane.f32.xlu2 %v1122_v7  ;;  %v1597_v10 = vsel %vm1419_vm8, 1.0, %v1720_v5 }
 0x313   : > { %v1053_v2 = vmul.f32 %v2158_v40, %v1024_v22  ;;  %v1046_v60 = vmul.f32 %v2158_v40, %v1003_v20 }
 0x315   : > { %v2240_v3 = vsub.f32 %v2140_v52, %v1053_v2  ;;  %v2243_v43 = vsub.f32 %v2142_v42, %v1046_v60 }
 0x317   : > { %v1085_v11 = vmul.f32 %v2240_v3, %v2240_v3  ;;  %v1078_v49 = vmul.f32 %v2243_v43, %v2243_v43 }
 0x319   : > { %v1125_v30 = vsel %vm385_vm0, %v1085_v11, 0.0  ;;  %v1104_v15 = vsel %vm385_vm0, %v1078_v49, 0.0 }
 0x31a   : > { %v1006_v16 = vpop.xlane.xlu2 %1005  ;;  %1126 = vadd.xlane.f32.xlu1 %v1125_v30  ;;  %v1030_v63 = vpop.xlane.xlu0 %1029  ;;  %1105 = vadd.xlane.f32.xlu2 %v1104_v15 }
 0x31b   : > { %v1047_v52 = vmul.f32 %v2158_v40, %v1006_v16  ;;  %v1055_v35 = vmul.f32 %v2158_v40, %v1030_v63 }
 0x31d   : > { %v2254_v42 = vsub.f32 %v2150_v57, %v1047_v52  ;;  %v2257_v37 = vsub.f32 %v2152_v47, %v1055_v35 }
 0x31f   : > { %v1079_v13 = vmul.f32 %v2254_v42, %v2254_v42  ;;  %v1087_v62 = vmul.f32 %v2257_v37, %v2257_v37 }
 0x321   : > { %v1107_v25 = vsel %vm385_vm0, %v1079_v13, 0.0  ;;  %v1131_v51 = vsel %vm385_vm0, %v1087_v62, 0.0  ;;  %v1395_v13 = vadd.s32 80, %v2276_v23 }
 0x322   : > { %1108 = vadd.xlane.f32.xlu1 %v1107_v25  ;;  %1132 = vadd.xlane.f32.xlu2 %v1131_v51 }
 0x323   : > { %v1412_v50 = vadd.s32 %v2284_v28, %v1395_v13  ;;  %v1387_v13 = vadd.s32 16, %v2276_v23 }
 0x325   : > { %vm1428_vm12 = vcmp.lt.s32.totalorder %v1412_v50, 320 }
 0x32f   : > { %v1094_v19 = vpop.xlane.xlu0 %1093 }
 0x330   : > { %v1138_v57 = vmul.f32 %v1094_v19, %v2158_v40 }
 0x332   : > { %v1154_v39 = vadd.f32 1e-05, %v1138_v57 }
 0x333   : > { %v1009_v47 = vpop.xlane.xlu1 %1008 }
 0x334   : > { %1677 = vrsqrt.f32 %v1154_v39  ;;  %v1048_v56 = vmul.f32 %v2158_v40, %v1009_v47  ;;  %vm1185_vm6 = vweird.f32 %v1154_v39 }
 0x336   : > { %v2269_v18 = vsub.f32 %v2170_v0, %v1048_v56  ;;  %v1086_v0 = vmul.f32 %v2274_v48, %v2274_v48 }
 0x338   : > { %v1080_v32 = vmul.f32 %v2269_v18, %v2269_v18  ;;  %v1128_v38 = vsel %vm385_vm0, %v1086_v0, 0.0 }
 0x33a   : > { %v1678_v41 = vpop.eup %1677  ;;  %v1110_v21 = vsel %vm385_vm0, %v1080_v32, 0.0 }
 0x33b   : > { %v1180_v6 = vmul.f32 %v1678_v41, %v1154_v39  ;;  %1111 = vadd.xlane.f32.xlu0 %v1110_v21  ;;  %vm1186_vm5 = vweird.f32 %v1678_v41 }
 0x33c   : > { %vm1187_vm7 = vmor %vm1185_vm6, %vm1186_vm5 }
 0x33d   : > { %v1181_v44 = vmul.f32 %v1678_v41, %v1180_v6 }
 0x33f   : > { %v1182_v33 = vmul.f32 0.5, %v1181_v44  ;;  %v1406_v44 = vadd.s32 %v2284_v28, %v1389_v31 }
 0x341   : > { %v1183_v61 = vsub.f32 1.5, %v1182_v33  ;;  %vm1422_vm1 = vcmp.lt.s32.totalorder %v1406_v44, 320 }
 0x343   : > { %v1184_v1 = vmul.f32 %v1678_v41, %v1183_v61  ;;  %1129 = vadd.xlane.f32.xlu0 %v1128_v38 }
 0x345   : > { %v1188_v53 = vsel %vm1187_vm7, %v1678_v41, %v1184_v1  ;;  %v1606_v41 = vsel %vm1428_vm12, 1.0, %v1720_v5 }
 0x346   : > { %v1330_v8 = vmul.f32 %v1188_v53, %v2164_v46 }
 0x348   : > { %v1349_v14 = vmul.f32 %v2291_v27, %v1330_v8 }
 0x34a   : > { %v1368_v55 = vadd.f32 %v2296_v36, %v1349_v14  ;;  %v1033_v7 = vpop.xlane.xlu2 %1032 }
 0x34b   : > { %v1056_v22 = vmul.f32 %v2158_v40, %v1033_v7 }
 0x34c   : > { %v1467_v20 = vmul.f32 %v1597_v10, %v1368_v55  ;;  %v1600_v10 = vsel %vm1422_vm1, 1.0, %v1720_v5 }
 0x34d   : > { %v2311_v46 = vsub.f32 %v2177_v17, %v1056_v22  ;;  %v1393_v22 = vadd.s32 64, %v2276_v23 }
 0x34e   : > { %1483 = vst.msk [vmem:[%s2307_s22 + $0x8] sm:$0xff] %vm385_vm0, %v1467_v20 }
 0x34f   : > { %v1088_v2 = vmul.f32 %v2311_v46, %v2311_v46 }
 0x351   : > { %v1134_v60 = vsel %vm385_vm0, %v1088_v2, 0.0 }
 0x352   : > { %1135 = vadd.xlane.f32.xlu1 %v1134_v60 }
 0x357   : > { %v1121_v11 = vpop.xlane.xlu0 %1120 }
 0x358   : > { %v1147_v49 = vmul.f32 %v1121_v11, %v2158_v40 }
 0x35a   : > { %v1163_v30 = vadd.f32 1e-05, %v1147_v49  ;;  %v1394_v49 = vadd.s32 72, %v2276_v23 }
 0x35c   : > { %1679 = vrsqrt.f32 %v1163_v30  ;;  %vm1275_vm10 = vweird.f32 %v1163_v30 }
 0x35f   : > { %v1103_v15 = vpop.xlane.xlu0 %1102 }
 0x360   : > { %v1141_v16 = vmul.f32 %v1103_v15, %v2158_v40 }
 0x362   : > { %v1680_v63 = vpop.eup %1679  ;;  %v1157_v52 = vadd.f32 1e-05, %v1141_v16 }
 0x363   : > { %v1270_v17 = vmul.f32 %v1680_v63, %v1163_v30  ;;  %vm1276_vm9 = vweird.f32 %v1680_v63 }
 0x364   : > { %1681 = vrsqrt.f32 %v1157_v52  ;;  %vm1277_vm11 = vmor %vm1275_vm10, %vm1276_vm9  ;;  %vm1215_vm14 = vweird.f32 %v1157_v52 }
 0x365   : > { %v1271_v35 = vmul.f32 %v1680_v63, %v1270_v17  ;;  %v1410_v17 = vadd.s32 %v2284_v28, %v1393_v22 }
 0x367   : > { %v1272_v62 = vmul.f32 0.5, %v1271_v35  ;;  %vm1426_vm3 = vcmp.lt.s32.totalorder %v1410_v17, 320 }
 0x369   : > { %v1273_v25 = vsub.f32 1.5, %v1272_v62 }
 0x36a   : > { %v1682_v51 = vpop.eup %1681 }
 0x36b   : > { %v1274_v19 = vmul.f32 %v1680_v63, %v1273_v25  ;;  %v1210_v57 = vmul.f32 %v1682_v51, %v1157_v52  ;;  %vm1216_vm13 = vweird.f32 %v1682_v51  ;;  %v1411_v25 = vadd.s32 %v2284_v28, %v1394_v49 }
 0x36c   : > { %vm1217_vm15 = vmor %vm1215_vm14, %vm1216_vm13 }
 0x36d   : > { %v1278_v39 = vsel %vm1277_vm11, %v1680_v63, %v1274_v19  ;;  %v1211_v47 = vmul.f32 %v1682_v51, %v1210_v57  ;;  %vm1427_vm6 = vcmp.lt.s32.totalorder %v1411_v25, 320 }
 0x36e   : > { %v1339_v56 = vmul.f32 %v1278_v39, %v2183_v34 }
 0x36f   : > { %v1212_v29 = vmul.f32 0.5, %v1211_v47 }
 0x370   : > { %v1358_v32 = vmul.f32 %v2291_v27, %v1339_v56  ;;  %v2355_v56 = vadd.s32 %v2284_v28, %v1387_v13 }
 0x371   : > { %v1213_v21 = vsub.f32 1.5, %v1212_v29 }
 0x372   : > { %v1377_v6 = vadd.f32 %v2296_v36, %v1358_v32  ;;  %vm1420_vm11 = vcmp.lt.s32.totalorder %v2355_v56, 320 }
 0x373   : > { %v1214_v58 = vmul.f32 %v1682_v51, %v1213_v21 }
 0x374   : > { %v1476_v0 = vmul.f32 %v1606_v41, %v1377_v6 }
 0x375   : > { %v1218_v33 = vsel %vm1217_vm15, %v1682_v51, %v1214_v58  ;;  %v1091_v34 = vpop.xlane.xlu1 %1090  ;;  %v1115_v61 = vpop.xlane.xlu2 %1114 }
 0x376   : > { %1492 = vst.msk [vmem:[%s2307_s22 + $0x50] sm:$0xff] %vm385_vm0, %v1476_v0  ;;  %v1333_v9 = vmul.f32 %v1218_v33, %v2190_v59  ;;  %v1137_v38 = vmul.f32 %v1091_v34, %v2158_v40  ;;  %v1145_v1 = vmul.f32 %v1115_v61, %v2158_v40  ;;  %v1402_v59 = vadd.s32 %v2284_v28, %v2276_v23 }
 0x377   : > { %v1388_v34 = vadd.s32 24, %v2276_v23 }
 0x378   : > { %v1352_v53 = vmul.f32 %v2291_v27, %v1333_v9  ;;  %v1153_v8 = vadd.f32 1e-05, %v1137_v38  ;;  %v1161_v14 = vadd.f32 1e-05, %v1145_v1  ;;  %vm1418_vm2 = vcmp.lt.s32.totalorder %v1402_v59, 320 }
 0x379   : > { %v1596_v50 = vsel %vm1418_vm2, 1.0, %v1720_v5  ;;  %v1396_v38 = vadd.s32 88, %v2276_v23 }
 0x37a   : > { %v1371_v55 = vadd.f32 %v2296_v36, %v1352_v53  ;;  %1683 = vrsqrt.f32 %v1153_v8  ;;  %vm1175_vm4 = vweird.f32 %v1153_v8  ;;  %vm1255_vm8 = vweird.f32 %v1161_v14 }
 0x37b   : > { %1685 = vrsqrt.f32 %v1161_v14  ;;  %v1604_v53 = vsel %vm1426_vm3, 1.0, %v1720_v5 }
 0x37c   : > { %v1470_v7 = vmul.f32 %v1600_v10, %v1371_v55  ;;  %v2375_v55 = vsel %vm1427_vm6, 1.0, %v1720_v5 }
 0x37d   : > { %v1118_v20 = vpop.xlane.xlu1 %1117  ;;  %v1097_v2 = vpop.xlane.xlu2 %1096 }
 0x37e   : > { %1486 = vst.msk [vmem:[%s2307_s22 + $0x20] sm:$0xff] %vm385_vm0, %v1470_v7  ;;  %v1146_v60 = vmul.f32 %v1118_v20, %v2158_v40  ;;  %v1139_v11 = vmul.f32 %v1097_v2, %v2158_v40  ;;  %v2380_v2 = vadd.s32 %v2284_v28, %v1388_v34 }
 0x380   : > { %v1684_v30 = vpop.eup %1683  ;;  %v2344_v15 = vadd.f32 1e-05, %v1146_v60  ;;  %v2346_v16 = vadd.f32 1e-05, %v1139_v11  ;;  %vm1421_vm3 = vcmp.lt.s32.totalorder %v2380_v2, 320  ;;  %v1390_v2 = vadd.s32 40, %v2276_v23 }
 0x381   : > { %v1686_v63 = vpop.eup %1685  ;;  %v1170_v52 = vmul.f32 %v1684_v30, %v1153_v8  ;;  %vm1176_vm5 = vweird.f32 %v1684_v30 }
 0x382   : > { %v1250_v35 = vmul.f32 %v1686_v63, %v1161_v14  ;;  %1687 = vrsqrt.f32 %v2344_v15  ;;  %vm1256_vm7 = vweird.f32 %v1686_v63  ;;  %vm1177_vm9 = vmor %vm1175_vm4, %vm1176_vm5  ;;  %vm1265_vm12 = vweird.f32 %v2344_v15 }
 0x383   : > { %v1171_v62 = vmul.f32 %v1684_v30, %v1170_v52  ;;  %1689 = vrsqrt.f32 %v2346_v16  ;;  %vm1257_vm10 = vmor %vm1255_vm8, %vm1256_vm7  ;;  %vm1195_vm1 = vweird.f32 %v2346_v16 }
 0x384   : > { %v1251_v51 = vmul.f32 %v1686_v63, %v1250_v35 }
 0x385   : > { %v1172_v19 = vmul.f32 0.5, %v1171_v62  ;;  %v1100_v57 = vpop.xlane.xlu1 %1099  ;;  %v1124_v39 = vpop.xlane.xlu2 %1123 }
 0x386   : > { %v1252_v47 = vmul.f32 0.5, %v1251_v51  ;;  %v1140_v31 = vmul.f32 %v1100_v57, %v2158_v40  ;;  %v1148_v29 = vmul.f32 %v1124_v39, %v2158_v40 }
 0x387   : > { %v1173_v32 = vsub.f32 1.5, %v1172_v19 }
 0x388   : > { %v1688_v41 = vpop.eup %1687  ;;  %v1253_v21 = vsub.f32 1.5, %v1252_v47  ;;  %v2359_v6 = vadd.f32 1e-05, %v1140_v31  ;;  %v2361_v44 = vadd.f32 1e-05, %v1148_v29 }
 0x389   : > { %v1690_v58 = vpop.eup %1689  ;;  %v1174_v0 = vmul.f32 %v1684_v30, %v1173_v32  ;;  %v1260_v33 = vmul.f32 %v1688_v41, %v2344_v15  ;;  %vm1266_vm13 = vweird.f32 %v1688_v41 }
 0x38a   : > { %v1254_v61 = vmul.f32 %v1686_v63, %v1253_v21  ;;  %v1190_v9 = vmul.f32 %v1690_v58, %v2346_v16  ;;  %1691 = vrsqrt.f32 %v2359_v6  ;;  %vm1196_vm14 = vweird.f32 %v1690_v58  ;;  %vm1267_vm15 = vmor %vm1265_vm12, %vm1266_vm13 }
 0x38b   : > { %v1178_v1 = vsel %vm1177_vm9, %v1684_v30, %v1174_v0  ;;  %v1261_v8 = vmul.f32 %v1688_v41, %v1260_v33  ;;  %1693 = vrsqrt.f32 %v2361_v44  ;;  %vm1197_vm2 = vmor %vm1195_vm1, %vm1196_vm14  ;;  %vm1205_vm7 = vweird.f32 %v2359_v6 }
 0x38c   : > { %v1329_v14 = vmul.f32 %v1178_v1, %v2198_v24  ;;  %v1258_v10 = vsel %vm1257_vm10, %v1686_v63, %v1254_v61  ;;  %v1191_v7 = vmul.f32 %v1690_v58, %v1190_v9  ;;  %v2384_v24 = vadd.s32 %v2284_v28, %v1396_v38 }
 0x38d   : > { %v1337_v22 = vmul.f32 %v1258_v10, %v2201_v4  ;;  %v1262_v20 = vmul.f32 0.5, %v1261_v8  ;;  %v1127_v59 = vpop.xlane.xlu1 %1126  ;;  %v1106_v60 = vpop.xlane.xlu2 %1105  ;;  %vm1285_vm9 = vweird.f32 %v2361_v44 }
 0x38e   : > { %v1348_v11 = vmul.f32 %v2291_v27, %v1329_v14  ;;  %v1192_v49 = vmul.f32 0.5, %v1191_v7  ;;  %v1149_v30 = vmul.f32 %v1127_v59, %v2158_v40  ;;  %v1142_v57 = vmul.f32 %v1106_v60, %v2158_v40 }
 0x38f   : > { %v1356_v63 = vmul.f32 %v2291_v27, %v1337_v22  ;;  %v1263_v52 = vsub.f32 1.5, %v1262_v20  ;;  %vm1429_vm4 = vcmp.lt.s32.totalorder %v2384_v24, 320 }
 0x390   : > { %v1692_v4 = vpop.eup %1691  ;;  %v1367_v17 = vadd.f32 %v2296_v36, %v1348_v11  ;;  %v1193_v35 = vsub.f32 1.5, %v1192_v49  ;;  %v2390_v13 = vadd.f32 1e-05, %v1149_v30  ;;  %v2408_v34 = vadd.f32 1e-05, %v1142_v57 }
 0x391   : > { %v1694_v62 = vpop.eup %1693  ;;  %v1375_v25 = vadd.f32 %v2296_v36, %v1356_v63  ;;  %v1264_v51 = vmul.f32 %v1688_v41, %v1263_v52  ;;  %v1200_v19 = vmul.f32 %v1692_v4, %v2359_v6  ;;  %vm1206_vm5 = vweird.f32 %v1692_v4 }
 0x392   : > { %v1466_v39 = vmul.f32 %v1596_v50, %v1367_v17  ;;  %v1194_v15 = vmul.f32 %v1690_v58, %v1193_v35  ;;  %v1280_v47 = vmul.f32 %v1694_v62, %v2361_v44  ;;  %1695 = vrsqrt.f32 %v2390_v13  ;;  %vm1207_vm8 = vmor %vm1205_vm7, %vm1206_vm5 }
 0x393   : > { %v1474_v31 = vmul.f32 %v1604_v53, %v1375_v25  ;;  %v1268_v29 = vsel %vm1267_vm15, %v1688_v41, %v1264_v51  ;;  %v1201_v32 = vmul.f32 %v1692_v4, %v1200_v19  ;;  %v1598_v50 = vsel %vm1420_vm11, 1.0, %v1720_v5 }
 0x394   : > { %1482 = vst.msk [vmem:[%s2307_s22] sm:$0xff] %vm385_vm0, %v1466_v39  ;;  %v1338_v21 = vmul.f32 %v1268_v29, %v2212_v45  ;;  %v1198_v0 = vsel %vm1197_vm2, %v1690_v58, %v1194_v15  ;;  %v1281_v33 = vmul.f32 %v1694_v62, %v1280_v47  ;;  %1697 = vrsqrt.f32 %v2408_v34 }
 0x395   : > { %1490 = vst.msk [vmem:[%s2307_s22 + $0x40] sm:$0xff] %vm385_vm0, %v1474_v31  ;;  %v1331_v16 = vmul.f32 %v1198_v0, %v2215_v12  ;;  %v1202_v41 = vmul.f32 0.5, %v1201_v32  ;;  %v1109_v61 = vpop.xlane.xlu1 %1108  ;;  %v1133_v38 = vpop.xlane.xlu2 %1132  ;;  %vm1286_vm6 = vweird.f32 %v1694_v62  ;;  %v1397_v30 = vadd.s32 96, %v2276_v23 }
 0x396   : > { %v1357_v9 = vmul.f32 %v2291_v27, %v1338_v21  ;;  %v1282_v45 = vmul.f32 0.5, %v1281_v33  ;;  %v1143_v56 = vmul.f32 %v1109_v61, %v2158_v40  ;;  %v1151_v22 = vmul.f32 %v1133_v38, %v2158_v40  ;;  %vm1287_vm10 = vmor %vm1285_vm9, %vm1286_vm6 }
 0x397   : > { %v1350_v58 = vmul.f32 %v2291_v27, %v1331_v16  ;;  %v1203_v1 = vsub.f32 1.5, %v1202_v41  ;;  %v1599_v44 = vsel %vm1421_vm3, 1.0, %v1720_v5  ;;  %v1607_v25 = vsel %vm1429_vm4, 1.0, %v1720_v5 }
 0x398   : > { %v1376_v12 = vadd.f32 %v2296_v36, %v1357_v9  ;;  %v1283_v53 = vsub.f32 1.5, %v1282_v45  ;;  %v2416_v8 = vadd.f32 1e-05, %v1143_v56  ;;  %v1696_v14 = vpop.eup %1695  ;;  %v2435_v17 = vadd.f32 1e-05, %v1151_v22 }
 0x399   : > { %v1369_v10 = vadd.f32 %v2296_v36, %v1350_v58  ;;  %v1204_v7 = vmul.f32 %v1692_v4, %v1203_v1  ;;  %v1290_v60 = vmul.f32 %v1696_v14, %v2390_v13  ;;  %v1414_v19 = vadd.s32 %v2284_v28, %v1397_v30 }
 0x39a   : > { %v1475_v20 = vmul.f32 %v2375_v55, %v1376_v12  ;;  %v1284_v59 = vmul.f32 %v1694_v62, %v1283_v53  ;;  %1699 = vrsqrt.f32 %v2416_v8  ;;  %v1698_v55 = vpop.eup %1697  ;;  %vm1296_vm11 = vweird.f32 %v1696_v14 }
 0x39b   : > { %v1468_v11 = vmul.f32 %v1598_v50, %v1369_v10  ;;  %v1208_v49 = vsel %vm1207_vm8, %v1692_v4, %v1204_v7  ;;  %v1291_v52 = vmul.f32 %v1696_v14, %v1290_v60  ;;  %1701 = vrsqrt.f32 %v2435_v17 }
 0x39c   : > { %1491 = vst.msk [vmem:[%s2307_s22 + $0x48] sm:$0xff] %vm385_vm0, %v1475_v20  ;;  %v1332_v6 = vmul.f32 %v1208_v49, %v2226_v54  ;;  %v1288_v63 = vsel %vm1287_vm10, %v1694_v62, %v1284_v59  ;;  %v1220_v62 = vmul.f32 %v1698_v55, %v2408_v34  ;;  %vm1295_vm12 = vweird.f32 %v2390_v13 }
 0x39d   : > { %1484 = vst.msk [vmem:[%s2307_s22 + $0x10] sm:$0xff] %vm385_vm0, %v1468_v11  ;;  %v1340_v4 = vmul.f32 %v1288_v63, %v2229_v26  ;;  %v1292_v54 = vmul.f32 0.5, %v1291_v52  ;;  %vm1430_vm13 = vcmp.lt.s32.totalorder %v1414_v19, 320  ;;  %vm1297_vm14 = vmor %vm1295_vm12, %vm1296_vm11  ;;  %v1407_v50 = vadd.s32 %v2284_v28, %v1390_v2 }
 0x39e   : > { %v1351_v35 = vmul.f32 %v2291_v27, %v1332_v6  ;;  %v1221_v39 = vmul.f32 %v1698_v55, %v1220_v62  ;;  %vm1226_vm15 = vweird.f32 %v1698_v55  ;;  %v1391_v61 = vadd.s32 48, %v2276_v23 }
 0x39f   : > { %v1359_v51 = vmul.f32 %v2291_v27, %v1340_v4  ;;  %v1293_v57 = vsub.f32 1.5, %v1292_v54  ;;  %vm1225_vm1 = vweird.f32 %v2408_v34  ;;  %v1608_v38 = vsel %vm1430_vm13, 1.0, %v1720_v5 }
 0x3a0   : > { %v1370_v26 = vadd.f32 %v2296_v36, %v1351_v35  ;;  %v1700_v15 = vpop.eup %1699  ;;  %v1222_v29 = vmul.f32 0.5, %v1221_v39  ;;  %vm1423_vm2 = vcmp.lt.s32.totalorder %v1407_v50, 320  ;;  %vm1227_vm3 = vmor %vm1225_vm1, %vm1226_vm15  ;;  %v1408_v34 = vadd.s32 %v2284_v28, %v1391_v61 }
 0x3a1   : > { %v1378_v24 = vadd.f32 %v2296_v36, %v1359_v51  ;;  %v1294_v31 = vmul.f32 %v1696_v14, %v1293_v57  ;;  %v1230_v32 = vmul.f32 %v1700_v15, %v2416_v8  ;;  %v1702_v41 = vpop.eup %1701  ;;  %vm1236_vm4 = vweird.f32 %v1700_v15 }
 0x3a2   : > { %v1469_v47 = vmul.f32 %v1599_v44, %v1370_v26  ;;  %v1223_v33 = vsub.f32 1.5, %v1222_v29  ;;  %v1310_v56 = vmul.f32 %v1702_v41, %v2435_v17  ;;  %v1399_v10 = vadd.s32 112, %v2276_v23 }
 0x3a3   : > { %v1477_v21 = vmul.f32 %v1607_v25, %v1378_v24  ;;  %v1298_v0 = vsel %vm1297_vm14, %v1696_v14, %v1294_v31  ;;  %v1231_v16 = vmul.f32 %v1700_v15, %v1230_v32  ;;  %vm1235_vm5 = vweird.f32 %v2416_v8 }
 0x3a4   : > { %1485 = vst.msk [vmem:[%s2307_s22 + $0x18] sm:$0xff] %vm385_vm0, %v1469_v47  ;;  %v1341_v13 = vmul.f32 %v1298_v0, %v2240_v3  ;;  %v1224_v9 = vmul.f32 %v1698_v55, %v1223_v33  ;;  %v1311_v3 = vmul.f32 %v1702_v41, %v1310_v56  ;;  %vm1237_vm6 = vmor %vm1235_vm5, %vm1236_vm4  ;;  %v1601_v60 = vsel %vm1423_vm2, 1.0, %v1720_v5 }
 0x3a5   : > { %1493 = vst.msk [vmem:[%s2307_s22 + $0x58] sm:$0xff] %vm385_vm0, %v1477_v21  ;;  %v1232_v45 = vmul.f32 0.5, %v1231_v16  ;;  %vm1316_vm7 = vweird.f32 %v1702_v41  ;;  %vm1424_vm8 = vcmp.lt.s32.totalorder %v1408_v34, 320  ;;  %v1416_v8 = vadd.s32 %v2284_v28, %v1399_v10 }
 0x3a6   : > { %v1360_v58 = vmul.f32 %v2291_v27, %v1341_v13  ;;  %v1228_v1 = vsel %vm1227_vm3, %v1698_v55, %v1224_v9  ;;  %v1312_v22 = vmul.f32 0.5, %v1311_v3  ;;  %vm1315_vm9 = vweird.f32 %v2435_v17 }
 0x3a7   : > { %v1233_v12 = vsub.f32 1.5, %v1232_v45  ;;  %v1334_v14 = vmul.f32 %v1228_v1, %v2243_v43  ;;  %vm1317_vm10 = vmor %vm1315_vm9, %vm1316_vm7  ;;  %v1602_v4 = vsel %vm1424_vm8, 1.0, %v1720_v5  ;;  %vm1432_vm11 = vcmp.lt.s32.totalorder %v1416_v8, 320 }
 0x3a8   : > { %v1379_v53 = vadd.f32 %v2296_v36, %v1360_v58  ;;  %v1313_v49 = vsub.f32 1.5, %v1312_v22  ;;  %v1610_v51 = vsel %vm1432_vm11, 1.0, %v1720_v5  ;;  %v1392_v47 = vadd.s32 56, %v2276_v23 }
 0x3a9   : > { %v1234_v7 = vmul.f32 %v1700_v15, %v1233_v12  ;;  %v1353_v59 = vmul.f32 %v2291_v27, %v1334_v14  ;;  %v1398_v13 = vadd.s32 104, %v2276_v23 }
 0x3aa   : > { %v1478_v20 = vmul.f32 %v1608_v38, %v1379_v53  ;;  %v1314_v6 = vmul.f32 %v1702_v41, %v1313_v49  ;;  %v1409_v21 = vadd.s32 %v2284_v28, %v1392_v47 }
 0x3ab   : > { %v1238_v11 = vsel %vm1237_vm6, %v1700_v15, %v1234_v7  ;;  %v1372_v43 = vadd.f32 %v2296_v36, %v1353_v59  ;;  %v1415_v3 = vadd.s32 %v2284_v28, %v1398_v13 }
 0x3ac   : > { %1494 = vst.msk [vmem:[%s2307_s22 + $0x60] sm:$0xff] %vm385_vm0, %v1478_v20  ;;  %v1335_v30 = vmul.f32 %v1238_v11, %v2254_v42  ;;  %v1318_v35 = vsel %vm1317_vm10, %v1702_v41, %v1314_v6  ;;  %vm1425_vm15 = vcmp.lt.s32.totalorder %v1409_v21, 320  ;;  %v1400_v11 = vadd.s32 120, %v2276_v23 }
 0x3ad   : > { %v1471_v52 = vmul.f32 %v1601_v60, %v1372_v43  ;;  %v1343_v25 = vmul.f32 %v1318_v35, %v2257_v37  ;;  %v1603_v38 = vsel %vm1425_vm15, 1.0, %v1720_v5  ;;  %vm1431_vm4 = vcmp.lt.s32.totalorder %v1415_v3, 320 }
 0x3ae   : > { %v1112_v63 = vpop.xlane.xlu0 %1111  ;;  %v1354_v55 = vmul.f32 %v2291_v27, %v1335_v30  ;;  %v1609_v7 = vsel %vm1431_vm4, 1.0, %v1720_v5 }
 0x3af   : > { %v1144_v44 = vmul.f32 %v1112_v63, %v2158_v40  ;;  %1487 = vst.msk [vmem:[%s2307_s22 + $0x28] sm:$0xff] %vm385_vm0, %v1471_v52  ;;  %v1362_v62 = vmul.f32 %v2291_v27, %v1343_v25 }
 0x3b0   : > { %v1373_v42 = vadd.f32 %v2296_v36, %v1354_v55 }
 0x3b1   : > { %v1160_v17 = vadd.f32 1e-05, %v1144_v44  ;;  %v1381_v19 = vadd.f32 %v2296_v36, %v1362_v62 }
 0x3b2   : > { %v1472_v54 = vmul.f32 %v1602_v4, %v1373_v42 }
 0x3b3   : > { %1703 = vrsqrt.f32 %v1160_v17  ;;  %v1480_v26 = vmul.f32 %v1610_v51, %v1381_v19  ;;  %vm1245_vm13 = vweird.f32 %v1160_v17 }
 0x3b4   : > { %1488 = vst.msk [vmem:[%s2307_s22 + $0x30] sm:$0xff] %vm385_vm0, %v1472_v54 }
 0x3b5   : > { %1496 = vst.msk [vmem:[%s2307_s22 + $0x70] sm:$0xff] %vm385_vm0, %v1480_v26 }
 0x3b6   : > { %v1130_v2 = vpop.xlane.xlu0 %1129 }
 0x3b7   : > { %v1150_v57 = vmul.f32 %v1130_v2, %v2158_v40 }
 0x3b9   : > { %v1704_v39 = vpop.eup %1703  ;;  %v1166_v15 = vadd.f32 1e-05, %v1150_v57 }
 0x3ba   : > { %v1240_v37 = vmul.f32 %v1704_v39, %v1160_v17  ;;  %vm1246_vm12 = vweird.f32 %v1704_v39 }
 0x3bb   : > { %1705 = vrsqrt.f32 %v1166_v15  ;;  %vm1247_vm14 = vmor %vm1245_vm13, %vm1246_vm12  ;;  %vm1305_vm2 = vweird.f32 %v1166_v15 }
 0x3bc   : > { %v1241_v24 = vmul.f32 %v1704_v39, %v1240_v37 }
 0x3be   : > { %v1242_v31 = vmul.f32 0.5, %v1241_v24 }
 0x3c0   : > { %v1243_v29 = vsub.f32 1.5, %v1242_v31 }
 0x3c1   : > { %v1706_v32 = vpop.eup %1705 }
 0x3c2   : > { %v1244_v50 = vmul.f32 %v1704_v39, %v1243_v29  ;;  %v1300_v0 = vmul.f32 %v1706_v32, %v1166_v15  ;;  %vm1306_vm1 = vweird.f32 %v1706_v32 }
 0x3c3   : > { %vm1307_vm3 = vmor %vm1305_vm2, %vm1306_vm1 }
 0x3c4   : > { %v1248_v33 = vsel %vm1247_vm14, %v1704_v39, %v1244_v50  ;;  %v1301_v16 = vmul.f32 %v1706_v32, %v1300_v0 }
 0x3c5   : > { %v1336_v41 = vmul.f32 %v1248_v33, %v2269_v18  ;;  %v1136_v61 = vpop.xlane.xlu1 %1135 }
 0x3c6   : > { %v1302_v9 = vmul.f32 0.5, %v1301_v16  ;;  %v1152_v45 = vmul.f32 %v1136_v61, %v2158_v40 }
 0x3c7   : > { %v1355_v56 = vmul.f32 %v2291_v27, %v1336_v41 }
 0x3c8   : > { %v1303_v58 = vsub.f32 1.5, %v1302_v9  ;;  %v1168_v1 = vadd.f32 1e-05, %v1152_v45 }
 0x3c9   : > { %v1374_v12 = vadd.f32 %v2296_v36, %v1355_v56 }
 0x3ca   : > { %v1304_v53 = vmul.f32 %v1706_v32, %v1303_v58  ;;  %1707 = vrsqrt.f32 %v1168_v1  ;;  %vm1325_vm6 = vweird.f32 %v1168_v1 }
 0x3cb   : > { %v1473_v18 = vmul.f32 %v1603_v38, %v1374_v12 }
 0x3cc   : > { %v1308_v14 = vsel %vm1307_vm3, %v1706_v32, %v1304_v53 }
 0x3cd   : > { %1489 = vst.msk [vmem:[%s2307_s22 + $0x38] sm:$0xff] %vm385_vm0, %v1473_v18  ;;  %v1342_v40 = vmul.f32 %v1308_v14, %v2274_v48  ;;  %v1417_v48 = vadd.s32 %v2284_v28, %v1400_v11 }
 0x3cf   : > { %v1361_v34 = vmul.f32 %v2291_v27, %v1342_v40  ;;  %vm1433_vm8 = vcmp.lt.s32.totalorder %v1417_v48, 320 }
 0x3d0   : > { %v1708_v10 = vpop.eup %1707  ;;  %v1611_v52 = vsel %vm1433_vm8, 1.0, %v1720_v5 }
 0x3d1   : > { %v1380_v22 = vadd.f32 %v2296_v36, %v1361_v34  ;;  %v1320_v20 = vmul.f32 %v1708_v10, %v1168_v1  ;;  %vm1326_vm5 = vweird.f32 %v1708_v10 }
 0x3d2   : > { %vm1327_vm7 = vmor %vm1325_vm6, %vm1326_vm5 }
 0x3d3   : > { %v1479_v59 = vmul.f32 %v1609_v7, %v1380_v22  ;;  %v1321_v60 = vmul.f32 %v1708_v10, %v1320_v20 }
 0x3d5   : > { %1495 = vst.msk [vmem:[%s2307_s22 + $0x68] sm:$0xff] %vm385_vm0, %v1479_v59  ;;  %v1322_v49 = vmul.f32 0.5, %v1321_v60 }
 0x3d7   : > { %v1323_v43 = vsub.f32 1.5, %v1322_v49 }
 0x3d9   : > { %v1324_v30 = vmul.f32 %v1708_v10, %v1323_v43 }
 0x3db   : > { %v1328_v8 = vsel %vm1327_vm7, %v1708_v10, %v1324_v30 }
 0x3dc   : > { %v1344_v6 = vmul.f32 %v1328_v8, %v2311_v46 }
 0x3de   : > { %v1363_v63 = vmul.f32 %v2291_v27, %v1344_v6 }
 0x3e0   : > { %v1382_v23 = vadd.f32 %v2296_v36, %v1363_v63 }
 0x3e2   : > { %v1481_v55 = vmul.f32 %v1611_v52, %v1382_v23 }
 0x3e4   : > { %1497 = vst.msk [vmem:[%s2307_s22 + $0x78] sm:$0xff] %vm385_vm0, %v1481_v55 }
 0x3e5 PF: > { %s23_s13 = sadd.s32 1, %s1715_s13  }
 0x3e6   : > { %p20_p4 = scmp.ge.s32.totalorder %s23_s13, 5  }
 0x3e8   :  { %22 = sbr.rel (!%p20_p4) target bundleno = 4 (0x4), region = 86 }

</bundles_post_ra>
